<compile_context>
chip_gen: v5e
topology: v5e:2x2
jax: 0.10.0
libtpu: 0.0.40
codegen_flags: <defaults>
</compile_context>

<pallas_src>
import functools

import jax
import jax.numpy as jnp
from jax.experimental import pallas as pl
from jax.experimental.pallas import tpu as pltpu


def _round_up(x, m):
    return (x + m - 1) // m * m


def _pad2d(a, rows, cols):
    return jnp.pad(a, ((0, rows - a.shape[0]), (0, cols - a.shape[1])))


def mlp_kernel(x_ref,
               w1_ref, b1_ref,
               w2_ref, b2_ref,
               w3_ref, b3_ref,
               w4_ref, b4_ref,
               w5_ref, b5_ref,
               o_ref):
    """Fused 5-layer MLP on one (TB, feat) batch tile; weights VMEM-resident."""
    h = x_ref[...]  # bf16 (TB, 128)
    layers = ((w1_ref, b1_ref, False),
              (w2_ref, b2_ref, False),
              (w3_ref, b3_ref, False),
              (w4_ref, b4_ref, False),
              (w5_ref, b5_ref, True))
    for w_ref, b_ref, is_last in layers:
        # bf16 x bf16 matmul, f32 accumulation on the MXU.
        acc = jnp.dot(h, w_ref[...], preferred_element_type=jnp.float32)
        acc = acc + b_ref[...]                     # f32 bias add
        if is_last:
            o_ref[...] = acc.astype(o_ref.dtype)   # no ReLU on final layer
        else:
            h = jnp.maximum(acc, 0.0).astype(jnp.bfloat16)  # ReLU in f32, cast for next dot


def init_mlp_params(key, in_features=100, num_classes=2):
    """Deterministic synthetic params (PyTorch-style init). Weight layout: [in, out]."""
    dims = [in_features, 2048, 512, 128, 32, num_classes]
    params = []
    for i in range(len(dims) - 1):
        key, wk, bk = jax.random.split(key, 3)
        bound = 1.0 / jnp.sqrt(dims[i])
        w = jax.random.uniform(wk, (dims[i], dims[i + 1]),
                               minval=-bound, maxval=bound, dtype=jnp.float32)
        b = jax.random.uniform(bk, (dims[i + 1],),
                               minval=-bound, maxval=bound, dtype=jnp.float32)
        params.append((w, b))
    return params


def prepare_params(params):
    """One-time: pad feature dims to multiples of 128, cast weights to bf16.

    Returns a flat tuple (w1, b1, ..., w5, b5) of device arrays ready for the
    kernel.  Weights: bf16 [pad_in, pad_out].  Biases: f32 [1, pad_out].
    """
    flat = []
    for w, b in params:
        pin = _round_up(w.shape[0], 128)
        pout = _round_up(w.shape[1], 128)
        wp = _pad2d(w, pin, pout).astype(jnp.bfloat16)
        bp = _pad2d(b[None, :], 1, pout).astype(jnp.float32)
        flat.extend([wp, bp])
    return tuple(flat)


@functools.partial(jax.jit, static_argnames=("num_classes",))
def mlp_forward(x, flat_params, num_classes=2):
    batch, in_features = x.shape
    pd_in = flat_params[0].shape[0]     # padded input features (128)
    pd_out = flat_params[-2].shape[1]   # padded output features (128)

    # Batch tile: small batches run as one tile, large batches tile at 256.
    tb = min(256, _round_up(batch, 8))
    pbatch = _round_up(batch, tb)
    grid = (pbatch // tb,)

    # Only the (small) input is padded per call; weights were prepared once.
    xp = _pad2d(x.astype(jnp.float32), pbatch, pd_in).astype(jnp.bfloat16)

    in_specs = [pl.BlockSpec((tb, pd_in), lambda i: (i, 0))]
    for p in flat_params:
        # Whole-array block, constant index map -> stays resident across steps.
        in_specs.append(pl.BlockSpec(p.shape, lambda i: (0, 0)))
    out_spec = pl.BlockSpec((tb, pd_out), lambda i: (i, 0))

    out_padded = pl.pallas_call(
        mlp_kernel,
        out_shape=jax.ShapeDtypeStruct((pbatch, pd_out), jnp.float32),
        grid=grid,
        in_specs=in_specs,
        out_specs=out_spec,
        compiler_params=pltpu.CompilerParams(
            dimension_semantics=("parallel",),   # megacore-split batch on v7x
            vmem_limit_bytes=32 << 20,           # bf16 weights ~2.7MiB + tiles << 32MiB
        ),
    )(xp, *flat_params)

    return out_padded[:batch, :num_classes]


def mlp_reference(x, params):
    """Pure-JAX reference matching the kernel's precision path (bf16 in, f32 acc)."""
    h = x.astype(jnp.bfloat16)
    for i, (w, b) in enumerate(params):
        acc = jnp.dot(h, w.astype(jnp.bfloat16),
                      preferred_element_type=jnp.float32) + b.astype(jnp.float32)
        if i < len(params) - 1:
            h = jnp.maximum(acc, 0.0).astype(jnp.bfloat16)
        else:
            h = acc
    return h


if __name__ == "__main__":
    key = jax.random.PRNGKey(0)
    pkey, xkey = jax.random.split(key)

    in_features = 100
    num_classes = 2
    batch = 2

    params = init_mlp_params(pkey, in_features, num_classes)
    flat_params = prepare_params(params)                    # pad + cast ONCE
    x = jax.random.normal(xkey, (batch, in_features), dtype=jnp.float32)

    out = mlp_forward(x, flat_params, num_classes=num_classes)
    out = jax.block_until_ready(out)

    ref = mlp_reference(x, params)
    assert out.shape == (batch, num_classes), out.shape
    assert jnp.allclose(out, ref, atol=1e-2, rtol=1e-2), (out, ref)

    print("KERNEL_OK")
</pallas_src>

<mosaic_0001>
module attributes {stable_mosaic.version = 11 : i64} {
  func.func @mlp_kernel(%arg0: i32, %arg1: memref<8x128xbf16, #tpu.memory_space<vmem>>, %arg2: memref<128x2048xbf16, #tpu.memory_space<vmem>>, %arg3: memref<1x2048xf32, #tpu.memory_space<vmem>>, %arg4: memref<2048x512xbf16, #tpu.memory_space<vmem>>, %arg5: memref<1x512xf32, #tpu.memory_space<vmem>>, %arg6: memref<512x128xbf16, #tpu.memory_space<vmem>>, %arg7: memref<1x128xf32, #tpu.memory_space<vmem>>, %arg8: memref<128x128xbf16, #tpu.memory_space<vmem>>, %arg9: memref<1x128xf32, #tpu.memory_space<vmem>>, %arg10: memref<128x128xbf16, #tpu.memory_space<vmem>>, %arg11: memref<1x128xf32, #tpu.memory_space<vmem>>, %arg12: memref<8x128xf32, #tpu.memory_space<vmem>>) attributes {dimension_semantics = [#tpu.dimension_semantics<parallel>], iteration_bounds = array<i64: 1>, scalar_prefetch = 0 : i64, scratch_operands = 0 : i64, tpu.core_type = #tpu.core_type<tc>, window_params = [{transform_indices = @transform_0, window_bounds = array<i64: 8, 128>}, {pipeline_mode = #tpu.pipeline_mode<synchronous>, transform_indices = @transform_1, window_bounds = array<i64: 128, 2048>}, {pipeline_mode = #tpu.pipeline_mode<synchronous>, transform_indices = @transform_2, window_bounds = array<i64: 1, 2048>}, {pipeline_mode = #tpu.pipeline_mode<synchronous>, transform_indices = @transform_3, window_bounds = array<i64: 2048, 512>}, {pipeline_mode = #tpu.pipeline_mode<synchronous>, transform_indices = @transform_4, window_bounds = array<i64: 1, 512>}, {pipeline_mode = #tpu.pipeline_mode<synchronous>, transform_indices = @transform_5, window_bounds = array<i64: 512, 128>}, {pipeline_mode = #tpu.pipeline_mode<synchronous>, transform_indices = @transform_6, window_bounds = array<i64: 1, 128>}, {pipeline_mode = #tpu.pipeline_mode<synchronous>, transform_indices = @transform_7, window_bounds = array<i64: 128, 128>}, {pipeline_mode = #tpu.pipeline_mode<synchronous>, transform_indices = @transform_8, window_bounds = array<i64: 1, 128>}, {pipeline_mode = #tpu.pipeline_mode<synchronous>, transform_indices = @transform_9, window_bounds = array<i64: 128, 128>}, {pipeline_mode = #tpu.pipeline_mode<synchronous>, transform_indices = @transform_10, window_bounds = array<i64: 1, 128>}, {transform_indices = @transform_11, window_bounds = array<i64: 8, 128>}]} {
    %c0 = arith.constant 0 : index
    %c0_0 = arith.constant 0 : index
    %0 = vector.load %arg1[%c0, %c0_0] : memref<8x128xbf16, #tpu.memory_space<vmem>>, vector<8x128xbf16>
    %c0_1 = arith.constant 0 : index
    %c0_2 = arith.constant 0 : index
    %1 = vector.load %arg2[%c0_1, %c0_2] : memref<128x2048xbf16, #tpu.memory_space<vmem>>, vector<128x2048xbf16>
    %cst = arith.constant dense<0.000000e+00> : vector<8x2048xf32>
    %2 = tpu.matmul %0, %1, %cst {dimension_numbers = #tpu.dot_dimension_numbers<[1], [0], [0], [1], [0, 0, 1, 1], [], []>} : vector<8x128xbf16>, vector<128x2048xbf16>, vector<8x2048xf32> -> vector<8x2048xf32>
    %c0_3 = arith.constant 0 : index
    %c0_4 = arith.constant 0 : index
    %3 = vector.load %arg3[%c0_3, %c0_4] : memref<1x2048xf32, #tpu.memory_space<vmem>>, vector<1x2048xf32>
    %4 = vector.broadcast %3 : vector<1x2048xf32> to vector<8x2048xf32>
    %5 = arith.addf %2, %4 : vector<8x2048xf32>
    %cst_5 = arith.constant 0.000000e+00 : f32
    %6 = vector.broadcast %cst_5 : f32 to vector<8x2048xf32>
    %7 = arith.maximumf %5, %6 : vector<8x2048xf32>
    %8 = arith.truncf %7 : vector<8x2048xf32> to vector<8x2048xbf16>
    %c0_6 = arith.constant 0 : index
    %c0_7 = arith.constant 0 : index
    %9 = vector.load %arg4[%c0_6, %c0_7] : memref<2048x512xbf16, #tpu.memory_space<vmem>>, vector<2048x512xbf16>
    %cst_8 = arith.constant dense<0.000000e+00> : vector<8x512xf32>
    %10 = tpu.matmul %8, %9, %cst_8 {dimension_numbers = #tpu.dot_dimension_numbers<[1], [0], [0], [1], [0, 0, 1, 1], [], []>} : vector<8x2048xbf16>, vector<2048x512xbf16>, vector<8x512xf32> -> vector<8x512xf32>
    %c0_9 = arith.constant 0 : index
    %c0_10 = arith.constant 0 : index
    %11 = vector.load %arg5[%c0_9, %c0_10] : memref<1x512xf32, #tpu.memory_space<vmem>>, vector<1x512xf32>
    %12 = vector.broadcast %11 : vector<1x512xf32> to vector<8x512xf32>
    %13 = arith.addf %10, %12 : vector<8x512xf32>
    %cst_11 = arith.constant 0.000000e+00 : f32
    %14 = vector.broadcast %cst_11 : f32 to vector<8x512xf32>
    %15 = arith.maximumf %13, %14 : vector<8x512xf32>
    %16 = arith.truncf %15 : vector<8x512xf32> to vector<8x512xbf16>
    %c0_12 = arith.constant 0 : index
    %c0_13 = arith.constant 0 : index
    %17 = vector.load %arg6[%c0_12, %c0_13] : memref<512x128xbf16, #tpu.memory_space<vmem>>, vector<512x128xbf16>
    %cst_14 = arith.constant dense<0.000000e+00> : vector<8x128xf32>
    %18 = tpu.matmul %16, %17, %cst_14 {dimension_numbers = #tpu.dot_dimension_numbers<[1], [0], [0], [1], [0, 0, 1, 1], [], []>} : vector<8x512xbf16>, vector<512x128xbf16>, vector<8x128xf32> -> vector<8x128xf32>
    %c0_15 = arith.constant 0 : index
    %c0_16 = arith.constant 0 : index
    %19 = vector.load %arg7[%c0_15, %c0_16] : memref<1x128xf32, #tpu.memory_space<vmem>>, vector<1x128xf32>
    %20 = vector.broadcast %19 : vector<1x128xf32> to vector<8x128xf32>
    %21 = arith.addf %18, %20 : vector<8x128xf32>
    %cst_17 = arith.constant 0.000000e+00 : f32
    %22 = vector.broadcast %cst_17 : f32 to vector<8x128xf32>
    %23 = arith.maximumf %21, %22 : vector<8x128xf32>
    %24 = arith.truncf %23 : vector<8x128xf32> to vector<8x128xbf16>
    %c0_18 = arith.constant 0 : index
    %c0_19 = arith.constant 0 : index
    %25 = vector.load %arg8[%c0_18, %c0_19] : memref<128x128xbf16, #tpu.memory_space<vmem>>, vector<128x128xbf16>
    %cst_20 = arith.constant dense<0.000000e+00> : vector<8x128xf32>
    %26 = tpu.matmul %24, %25, %cst_20 {dimension_numbers = #tpu.dot_dimension_numbers<[1], [0], [0], [1], [0, 0, 1, 1], [], []>} : vector<8x128xbf16>, vector<128x128xbf16>, vector<8x128xf32> -> vector<8x128xf32>
    %c0_21 = arith.constant 0 : index
    %c0_22 = arith.constant 0 : index
    %27 = vector.load %arg9[%c0_21, %c0_22] : memref<1x128xf32, #tpu.memory_space<vmem>>, vector<1x128xf32>
    %28 = vector.broadcast %27 : vector<1x128xf32> to vector<8x128xf32>
    %29 = arith.addf %26, %28 : vector<8x128xf32>
    %cst_23 = arith.constant 0.000000e+00 : f32
    %30 = vector.broadcast %cst_23 : f32 to vector<8x128xf32>
    %31 = arith.maximumf %29, %30 : vector<8x128xf32>
    %32 = arith.truncf %31 : vector<8x128xf32> to vector<8x128xbf16>
    %c0_24 = arith.constant 0 : index
    %c0_25 = arith.constant 0 : index
    %33 = vector.load %arg10[%c0_24, %c0_25] : memref<128x128xbf16, #tpu.memory_space<vmem>>, vector<128x128xbf16>
    %cst_26 = arith.constant dense<0.000000e+00> : vector<8x128xf32>
    %34 = tpu.matmul %32, %33, %cst_26 {dimension_numbers = #tpu.dot_dimension_numbers<[1], [0], [0], [1], [0, 0, 1, 1], [], []>} : vector<8x128xbf16>, vector<128x128xbf16>, vector<8x128xf32> -> vector<8x128xf32>
    %c0_27 = arith.constant 0 : index
    %c0_28 = arith.constant 0 : index
    %35 = vector.load %arg11[%c0_27, %c0_28] : memref<1x128xf32, #tpu.memory_space<vmem>>, vector<1x128xf32>
    %36 = vector.broadcast %35 : vector<1x128xf32> to vector<8x128xf32>
    %37 = arith.addf %34, %36 : vector<8x128xf32>
    %c0_29 = arith.constant 0 : index
    %c0_30 = arith.constant 0 : index
    %38 = vector.load %arg12[%c0_29, %c0_30] : memref<8x128xf32, #tpu.memory_space<vmem>>, vector<8x128xf32>
    tpu.vector_store %arg12[%c0_29, %c0_30], %37 {strides = array<i32>} : memref<8x128xf32, #tpu.memory_space<vmem>>, vector<8x128xf32>,
    return
  }
  func.func @transform_0(%arg0: i32) -> (i32, i32) {
    %c0_i32 = arith.constant 0 : i32
    %c0_i32_0 = arith.constant 0 : i32
    return %arg0, %c0_i32 : i32, i32
  }
  func.func @transform_1(%arg0: i32) -> (i32, i32) {
    %c0_i32 = arith.constant 0 : i32
    %c0_i32_0 = arith.constant 0 : i32
    %c0_i32_1 = arith.constant 0 : i32
    return %c0_i32, %c0_i32_0 : i32, i32
  }
  func.func @transform_2(%arg0: i32) -> (i32, i32) {
    %c0_i32 = arith.constant 0 : i32
    %c0_i32_0 = arith.constant 0 : i32
    %c0_i32_1 = arith.constant 0 : i32
    return %c0_i32, %c0_i32_0 : i32, i32
  }
  func.func @transform_3(%arg0: i32) -> (i32, i32) {
    %c0_i32 = arith.constant 0 : i32
    %c0_i32_0 = arith.constant 0 : i32
    %c0_i32_1 = arith.constant 0 : i32
    return %c0_i32, %c0_i32_0 : i32, i32
  }
  func.func @transform_4(%arg0: i32) -> (i32, i32) {
    %c0_i32 = arith.constant 0 : i32
    %c0_i32_0 = arith.constant 0 : i32
    %c0_i32_1 = arith.constant 0 : i32
    return %c0_i32, %c0_i32_0 : i32, i32
  }
  func.func @transform_5(%arg0: i32) -> (i32, i32) {
    %c0_i32 = arith.constant 0 : i32
    %c0_i32_0 = arith.constant 0 : i32
    %c0_i32_1 = arith.constant 0 : i32
    return %c0_i32, %c0_i32_0 : i32, i32
  }
  func.func @transform_6(%arg0: i32) -> (i32, i32) {
    %c0_i32 = arith.constant 0 : i32
    %c0_i32_0 = arith.constant 0 : i32
    %c0_i32_1 = arith.constant 0 : i32
    return %c0_i32, %c0_i32_0 : i32, i32
  }
  func.func @transform_7(%arg0: i32) -> (i32, i32) {
    %c0_i32 = arith.constant 0 : i32
    %c0_i32_0 = arith.constant 0 : i32
    %c0_i32_1 = arith.constant 0 : i32
    return %c0_i32, %c0_i32_0 : i32, i32
  }
  func.func @transform_8(%arg0: i32) -> (i32, i32) {
    %c0_i32 = arith.constant 0 : i32
    %c0_i32_0 = arith.constant 0 : i32
    %c0_i32_1 = arith.constant 0 : i32
    return %c0_i32, %c0_i32_0 : i32, i32
  }
  func.func @transform_9(%arg0: i32) -> (i32, i32) {
    %c0_i32 = arith.constant 0 : i32
    %c0_i32_0 = arith.constant 0 : i32
    %c0_i32_1 = arith.constant 0 : i32
    return %c0_i32, %c0_i32_0 : i32, i32
  }
  func.func @transform_10(%arg0: i32) -> (i32, i32) {
    %c0_i32 = arith.constant 0 : i32
    %c0_i32_0 = arith.constant 0 : i32
    %c0_i32_1 = arith.constant 0 : i32
    return %c0_i32, %c0_i32_0 : i32, i32
  }
  func.func @transform_11(%arg0: i32) -> (i32, i32) {
    %c0_i32 = arith.constant 0 : i32
    %c0_i32_0 = arith.constant 0 : i32
    return %arg0, %c0_i32 : i32, i32
  }
}

</mosaic_0001>

<bundles_post_ra>
// kernel: mlp_forward.1
= control target key start
LH: loop header
LB: loop body
LE: loop exit
PB: predicated region body
PF: predicated region fallthrough
CT: control target
= control target key end

     0   :  { %16 = vsyncpa [#allocation3], 0  ;;  %s9653_s0 = inlined_call_operand.vmem [shape: bf16[8,128], index: 0, kind: input, shape index: {}]   ;;  %s9654_s1 = inlined_call_operand.hbm [shape: bf16[128,2048], index: 1, kind: input, shape index: {}]   ;;  %s9655_s2 = inlined_call_operand.hbm [shape: f32[1,2048], index: 2, kind: input, shape index: {}]   ;;  %s9656_s3 = inlined_call_operand.hbm [shape: bf16[2048,512], index: 3, kind: input, shape index: {}]   ;;  %s9657_s4 = inlined_call_operand.hbm [shape: f32[1,512], index: 4, kind: input, shape index: {}]   ;;  %s9658_s5 = inlined_call_operand.hbm [shape: bf16[512,128], index: 5, kind: input, shape index: {}]   ;;  %s9659_s6 = inlined_call_operand.hbm [shape: f32[1,128], index: 6, kind: input, shape index: {}]   ;;  %s9660_s7 = inlined_call_operand.hbm [shape: bf16[128,128], index: 7, kind: input, shape index: {}]   ;;  %s9661_s8 = inlined_call_operand.hbm [shape: f32[1,128], index: 8, kind: input, shape index: {}]   ;;  %s9662_s9 = inlined_call_operand.hbm [shape: bf16[128,128], index: 9, kind: input, shape index: {}]   ;;  %s9663_s10 = inlined_call_operand.hbm [shape: f32[1,128], index: 10, kind: input, shape index: {}]   ;;  %s9664_s11 = inlined_call_operand.vmem [shape: f32[8,128], index: 11, kind: output, shape index: {}]  }
   0x1   :  { %17 = vsyncpa [#allocation5], 0 }
   0x2   :  { %18 = vsyncpa [#allocation8], 0 }
   0x3   :  { %19 = vsyncpa [#allocation11], 0 }
   0x4   :  { %20 = vsyncpa [#allocation14], 0  ;;  %s42_s19 = sshll.u32 %s9655_s2, 4  ;;  %s43_s19 = int_to_ptr.hbm [resolvable:$true] %s42_s19 }
   0x5   :  { %21 = vsyncpa [#allocation17], 0  ;;  %s9352_s20 = smov [#allocation4]   ;;  %s66_s24 = sshll.u32 %s9657_s4, 4  ;;  %s67_s24 = int_to_ptr.hbm [resolvable:$true] %s66_s24 }
   0x6   :  { %s44_s21 = sshll.u32 %s9352_s20, 4  ;;  %s9353_s25 = smov [#allocation7]   ;;  %s45_s21 = int_to_ptr.vmem [resolvable:$true] %s44_s21 }
   0x7   :  { %47 = dma.hbm_to_vmem [thread:$0]  %s43_s19, 256, %s45_s21, [#allocation5]  }
   0x8   :  { %s68_s26 = sshll.u32 %s9353_s25, 4  ;;  %s90_s29 = sshll.u32 %s9659_s6, 4  ;;  %s69_s26 = int_to_ptr.vmem [resolvable:$true] %s68_s26  ;;  %s91_s29 = int_to_ptr.hbm [resolvable:$true] %s90_s29 }
   0x9   :  { %71 = dma.hbm_to_vmem [thread:$0]  %s67_s24, 64, %s69_s26, [#allocation8]  }
   0xa   :  { %s114_s12 = sshll.u32 %s9661_s8, 4  ;;  %s9354_s13 = smov [#allocation10]   ;;  %s115_s12 = int_to_ptr.hbm [resolvable:$true] %s114_s12 }
   0xb   :  { %s92_s14 = sshll.u32 %s9354_s13, 4  ;;  %s9355_s4 = smov [#allocation13]   ;;  %s93_s14 = int_to_ptr.vmem [resolvable:$true] %s92_s14 }
   0xc   :  { %95 = dma.hbm_to_vmem [thread:$0]  %s91_s29, 16, %s93_s14, [#allocation11]  }
   0xd   :  { %s116_s15 = sshll.u32 %s9355_s4, 4  ;;  %s28_s18 = sshll.u32 %s9654_s1, 4  ;;  %s117_s15 = int_to_ptr.vmem [resolvable:$true] %s116_s15  ;;  %s29_s18 = int_to_ptr.hbm [resolvable:$true] %s28_s18 }
   0xe   :  { %119 = dma.hbm_to_vmem [thread:$0]  %s115_s12, 16, %s117_s15, [#allocation14]  }
   0xf   :  { %s9356_s6 = smov [#allocation2]   ;;  %s52_s8 = sshll.u32 %s9656_s3, 4  ;;  %s53_s8 = int_to_ptr.hbm [resolvable:$true] %s52_s8 }
  0x10   :  { %s30_s19 = sshll.u32 %s9356_s6, 4  ;;  %s9357_s22 = smov 1024   ;;  %s31_s19 = int_to_ptr.vmem [resolvable:$true] %s30_s19 }
  0x11   :  { %s9358_s23 = smov 64   ;;  %s9359_s24 = smov [#allocation6]  }
  0x12   :  { %36 = dma.hbm_to_vmem [thread:$0]  %s29_s18, 16384, %s31_s19, [#allocation3], %s9357_s22, %s9357_s22, %s9358_s23  }
  0x13   :  { %s54_s25 = sshll.u32 %s9359_s24, 4  ;;  %s9360_s26 = smov 256   ;;  %s55_s25 = int_to_ptr.vmem [resolvable:$true] %s54_s25 }
  0x14   :  { %s9361_s1 = smov 16   ;;  %s76_s29 = sshll.u32 %s9658_s5, 4  ;;  %s77_s29 = int_to_ptr.hbm [resolvable:$true] %s76_s29 }
  0x15   :  { %60 = dma.hbm_to_vmem [thread:$0]  %s53_s8, 65536, %s55_s25, [#allocation5], %s9360_s26, %s9360_s26, %s9361_s1  }
  0x16   :  { %s9362_s2 = smov [#allocation9]   ;;  %s9363_s3 = smov 4  }
  0x17   :  { %s78_s30 = sshll.u32 %s9362_s2, 4  ;;  %s100_s14 = sshll.u32 %s9660_s7, 4  ;;  %s79_s30 = int_to_ptr.vmem [resolvable:$true] %s78_s30  ;;  %s101_s14 = int_to_ptr.hbm [resolvable:$true] %s100_s14 }
  0x18   :  { %84 = dma.hbm_to_vmem [thread:$0]  %s77_s29, 4096, %s79_s30, [#allocation8], %s9358_s23, %s9358_s23, %s9363_s3  }
  0x19   :  { %s9364_s4 = smov [#allocation12]   ;;  %s124_s5 = sshll.u32 %s9662_s9, 4  ;;  %s125_s5 = int_to_ptr.hbm [resolvable:$true] %s124_s5 }
  0x1a   :  { %s102_s15 = sshll.u32 %s9364_s4, 4  ;;  %s9365_s18 = smov [#allocation15]   ;;  %s103_s15 = int_to_ptr.vmem [resolvable:$true] %s102_s15 }
  0x1b   :  { %108 = dma.hbm_to_vmem [thread:$0]  %s101_s14, 1024, %s103_s15, [#allocation11], %s9358_s23, %s9358_s23, %s9363_s3  }
  0x1c   :  { %s126_s6 = sshll.u32 %s9365_s18, 4  ;;  %s138_s21 = sshll.u32 %s9663_s10, 4  ;;  %s127_s6 = int_to_ptr.vmem [resolvable:$true] %s126_s6  ;;  %s139_s21 = int_to_ptr.hbm [resolvable:$true] %s138_s21 }
  0x1d   :  { %132 = dma.hbm_to_vmem [thread:$0]  %s125_s5, 1024, %s127_s6, [#allocation14], %s9358_s23, %s9358_s23, %s9363_s3  }
  0x1e   :  { %s9366_s7 = smov [#allocation16]  }
  0x1f   :  { %s140_s8 = sshll.u32 %s9366_s7, 4  ;;  %s141_s8 = int_to_ptr.vmem [resolvable:$true] %s140_s8 }
  0x20   :  { %143 = dma.hbm_to_vmem [thread:$0]  %s139_s21, 16, %s141_s8, [#allocation17]  }
  0x21   :  { %9340 = dma.done.wait [#allocation3], 16384  }
  0x22   :  { %9341 = vsyncadd [#allocation3], 4294950912 }
  0x23   :  { %9342 = dma.done.wait [#allocation5], 65792  }
  0x24   :  { %9343 = vsyncadd [#allocation5], 4294901504 }
  0x25   :  { %9344 = dma.done.wait [#allocation8], 4160  }
  0x26   :  { %9345 = vsyncadd [#allocation8], 4294963136 }
  0x27   :  { %9346 = dma.done.wait [#allocation11], 1040  }
  0x28   :  { %9347 = vsyncadd [#allocation11], 4294966256 }
  0x29   :  { %9348 = dma.done.wait [#allocation14], 1040  }
  0x2a   :  { %9349 = vsyncadd [#allocation14], 4294966256 }
  0x2b   :  { %9350 = dma.done.wait [#allocation17], 16  }
  0x2c   :  { %9351 = vsyncadd [#allocation17], 4294967280  ;;  %v6090_v0 = vld [vmem:[#allocation2 + $0x380] sm:$0xf]  ;;  %v8504_v2 = vld [vmem:[#allocation2 + $0x384] sm:$0xf] }
  0x2d   :  { %v8512_v1 = vld [vmem:[#allocation2 + $0x3bc] sm:$0xf0]  ;;  %v6092_v4 = vld [vmem:[#allocation2 + $0x3c0] sm:$0xf0]  ;;  %v6098_v5 = vld [vmem:[#allocation2 + $0x388] sm:$0xf] }
  0x2e   :  { %v6091_v3 = vor.u32 %v8512_v1, %v6090_v0  ;;  %v8513_v6 = vld [vmem:[#allocation2 + $0x3c4] sm:$0xf0]  ;;  %v6095_v7 = vor.u32 %v8504_v2, %v6092_v4  ;;  %v8505_v9 = vld [vmem:[#allocation2 + $0x38c] sm:$0xf]  ;;  %v6026_v11 = vld [vmem:[#allocation2 + $0x300] sm:$0xf] }
  0x2f   :  { %v6099_v8 = vor.u32 %v8513_v6, %v6098_v5  ;;  %v6100_v10 = vld [vmem:[#allocation2 + $0x3c8] sm:$0xf0]  ;;  %v8496_v13 = vld [vmem:[#allocation2 + $0x33c] sm:$0xf0]  ;;  %v8488_v14 = vld [vmem:[#allocation2 + $0x304] sm:$0xf] }
  0x30   :  { %989 = vmatpush.bf16.msra.mxu0 %v6091_v3  ;;  %v6103_v12 = vor.u32 %v8505_v9, %v6100_v10  ;;  %v6028_v15 = vld [vmem:[#allocation2 + $0x340] sm:$0xf0]  ;;  %1002 = vmatpush.bf16.msra.mxu1 %v6095_v7  ;;  %v6027_v16 = vor.u32 %v8496_v13, %v6026_v11  ;;  %v6034_v18 = vld [vmem:[#allocation2 + $0x308] sm:$0xf]  ;;  %v8489_v20 = vld [vmem:[#allocation2 + $0x30c] sm:$0xf] }
  0x31   :  { %1015 = vmatpush.bf16.msra.mxu2 %v6099_v8  ;;  %v6031_v17 = vor.u32 %v8488_v14, %v6028_v15  ;;  %v8497_v19 = vld [vmem:[#allocation2 + $0x344] sm:$0xf0]  ;;  %v6036_v22 = vld [vmem:[#allocation2 + $0x348] sm:$0xf0]  ;;  %v5962_v23 = vld [vmem:[#allocation2 + $0x280] sm:$0xf] }
  0x32   :  { %1028 = vmatpush.bf16.msra.mxu3 %v6103_v12  ;;  %v6035_v21 = vor.u32 %v8497_v19, %v6034_v18  ;;  %v8480_v24 = vld [vmem:[#allocation2 + $0x2bc] sm:$0xf0]  ;;  %v6039_v25 = vor.u32 %v8489_v20, %v6036_v22  ;;  %v8472_v26 = vld [vmem:[#allocation2 + $0x284] sm:$0xf]  ;;  %v5970_v28 = vld [vmem:[#allocation2 + $0x288] sm:$0xf] }
  0x33   :  { %v5964_v27 = vld [vmem:[#allocation2 + $0x2c0] sm:$0xf0]  ;;  %v5963_v29 = vor.u32 %v8480_v24, %v5962_v23  ;;  %v8481_v30 = vld [vmem:[#allocation2 + $0x2c4] sm:$0xf0]  ;;  %v8473_v31 = vld [vmem:[#allocation2 + $0x28c] sm:$0xf] }
  0x34   :  { %990 = vmatpush.bf16.msra.mxu0 %v6027_v16  ;;  %v5972_v32 = vld [vmem:[#allocation2 + $0x2c8] sm:$0xf0]  ;;  %1003 = vmatpush.bf16.msra.mxu1 %v6031_v17  ;;  %v5967_v33 = vor.u32 %v8472_v26, %v5964_v27  ;;  %v5971_v34 = vor.u32 %v8481_v30, %v5970_v28  ;;  %v5898_v35 = vld [vmem:[#allocation2 + $0x200] sm:$0xf]  ;;  %v8456_v37 = vld [vmem:[#allocation2 + $0x204] sm:$0xf] }
  0x35   :  { %1016 = vmatpush.bf16.msra.mxu2 %v6035_v21  ;;  %v8464_v36 = vld [vmem:[#allocation2 + $0x23c] sm:$0xf0]  ;;  %v5975_v38 = vor.u32 %v8473_v31, %v5972_v32  ;;  %v5900_v39 = vld [vmem:[#allocation2 + $0x240] sm:$0xf0]  ;;  %v5906_v40 = vld [vmem:[#allocation2 + $0x208] sm:$0xf] }
  0x36   :  { %1029 = vmatpush.bf16.msra.mxu3 %v6039_v25  ;;  %v8465_v41 = vld [vmem:[#allocation2 + $0x244] sm:$0xf0]  ;;  %v8457_v42 = vld [vmem:[#allocation2 + $0x20c] sm:$0xf]  ;;  %v5899_v44 = vor.u32 %v8464_v36, %v5898_v35  ;;  %v5903_v45 = vor.u32 %v8456_v37, %v5900_v39  ;;  %v5834_v47 = vld [vmem:[#allocation2 + $0x180] sm:$0xf] }
  0x37   :  { %v5908_v43 = vld [vmem:[#allocation2 + $0x248] sm:$0xf0]  ;;  %v5907_v46 = vor.u32 %v8465_v41, %v5906_v40  ;;  %v8448_v48 = vld [vmem:[#allocation2 + $0x1bc] sm:$0xf0]  ;;  %v8440_v49 = vld [vmem:[#allocation2 + $0x184] sm:$0xf] }
  0x38   :  { %991 = vmatpush.bf16.msra.mxu0 %v5963_v29  ;;  %1004 = vmatpush.bf16.msra.mxu1 %v5967_v33  ;;  %v5911_v50 = vor.u32 %v8457_v42, %v5908_v43  ;;  %v5836_v51 = vld [vmem:[#allocation2 + $0x1c0] sm:$0xf0]  ;;  %v5842_v52 = vld [vmem:[#allocation2 + $0x188] sm:$0xf]  ;;  %v8441_v54 = vld [vmem:[#allocation2 + $0x18c] sm:$0xf]  ;;  %v5835_v56 = vor.u32 %v8448_v48, %v5834_v47 }
  0x39   :  { %1017 = vmatpush.bf16.msra.mxu2 %v5971_v34  ;;  %v8449_v53 = vld [vmem:[#allocation2 + $0x1c4] sm:$0xf0]  ;;  %v5844_v55 = vld [vmem:[#allocation2 + $0x1c8] sm:$0xf0]  ;;  %v5839_v57 = vor.u32 %v8440_v49, %v5836_v51  ;;  %v5770_v59 = vld [vmem:[#allocation2 + $0x100] sm:$0xf] }
  0x3a   :  { %1030 = vmatpush.bf16.msra.mxu3 %v5975_v38  ;;  %v5843_v58 = vor.u32 %v8449_v53, %v5842_v52  ;;  %v8432_v60 = vld [vmem:[#allocation2 + $0x13c] sm:$0xf0]  ;;  %v8424_v61 = vld [vmem:[#allocation2 + $0x104] sm:$0xf]  ;;  %v5847_v62 = vor.u32 %v8441_v54, %v5844_v55  ;;  %v5778_v0 = vld [vmem:[#allocation2 + $0x108] sm:$0xf] }
  0x3b   :  { %v5772_v63 = vld [vmem:[#allocation2 + $0x140] sm:$0xf0]  ;;  %v8433_v1 = vld [vmem:[#allocation2 + $0x144] sm:$0xf0]  ;;  %v8425_v2 = vld [vmem:[#allocation2 + $0x10c] sm:$0xf]  ;;  %v5771_v4 = vor.u32 %v8432_v60, %v5770_v59 }
  0x3c   :  { %992 = vmatpush.bf16.msra.mxu0 %v5899_v44  ;;  %1005 = vmatpush.bf16.msra.mxu1 %v5903_v45  ;;  %v5780_v3 = vld [vmem:[#allocation2 + $0x148] sm:$0xf0]  ;;  %v5775_v5 = vor.u32 %v8424_v61, %v5772_v63  ;;  %v5779_v6 = vor.u32 %v8433_v1, %v5778_v0  ;;  %v5706_v7 = vld [vmem:[#allocation2 + $0x80] sm:$0xf]  ;;  %v8408_v9 = vld [vmem:[#allocation2 + $0x84] sm:$0xf] }
  0x3d   :  { %1018 = vmatpush.bf16.msra.mxu2 %v5907_v46  ;;  %v8416_v8 = vld [vmem:[#allocation2 + $0xbc] sm:$0xf0]  ;;  %v5783_v10 = vor.u32 %v8425_v2, %v5780_v3  ;;  %v5708_v11 = vld [vmem:[#allocation2 + $0xc0] sm:$0xf0]  ;;  %v5714_v12 = vld [vmem:[#allocation2 + $0x88] sm:$0xf] }
  0x3e   :  { %1031 = vmatpush.bf16.msra.mxu3 %v5911_v50  ;;  %v8417_v13 = vld [vmem:[#allocation2 + $0xc4] sm:$0xf0]  ;;  %v8409_v14 = vld [vmem:[#allocation2 + $0x8c] sm:$0xf]  ;;  %v5707_v16 = vor.u32 %v8416_v8, %v5706_v7  ;;  %v5642_v17 = vld [vmem:[#allocation2] sm:$0xf]  ;;  %v5711_v19 = vor.u32 %v8408_v9, %v5708_v11 }
  0x3f   :  { %v5716_v15 = vld [vmem:[#allocation2 + $0xc8] sm:$0xf0]  ;;  %v8400_v18 = vld [vmem:[#allocation2 + $0x3c] sm:$0xf0]  ;;  %v5715_v20 = vor.u32 %v8417_v13, %v5714_v12  ;;  %v8392_v21 = vld [vmem:[#allocation2 + $0x4] sm:$0xf] }
  0x40   :  { %993 = vmatpush.bf16.msra.mxu0 %v5835_v56  ;;  %1006 = vmatpush.bf16.msra.mxu1 %v5839_v57  ;;  %v5644_v22 = vld [vmem:[#allocation2 + $0x40] sm:$0xf0]  ;;  %v5650_v23 = vld [vmem:[#allocation2 + $0x8] sm:$0xf]  ;;  %v5719_v24 = vor.u32 %v8409_v14, %v5716_v15  ;;  %v8393_v26 = vld [vmem:[#allocation2 + $0xc] sm:$0xf]  ;;  %v5643_v31 = vor.u32 %v8400_v18, %v5642_v17 }
  0x41   :  { %1019 = vmatpush.bf16.msra.mxu2 %v5843_v58  ;;  %v8401_v25 = vld [vmem:[#allocation2 + $0x44] sm:$0xf0]  ;;  %v5652_v27 = vld [vmem:[#allocation2 + $0x48] sm:$0xf0]  ;;  %v6106_v28 = vld [vmem:[#allocation2 + $0x390] sm:$0xf]  ;;  %v5647_v35 = vor.u32 %v8392_v21, %v5644_v22 }
  0x42   :  { %1032 = vmatpush.bf16.msra.mxu3 %v5847_v62  ;;  %v8514_v29 = vld [vmem:[#allocation2 + $0x3cc] sm:$0xf0]  ;;  %v8506_v30 = vld [vmem:[#allocation2 + $0x394] sm:$0xf]  ;;  %v6114_v33 = vld [vmem:[#allocation2 + $0x398] sm:$0xf]  ;;  %v5651_v36 = vor.u32 %v8401_v25, %v5650_v23  ;;  %v5655_v39 = vor.u32 %v8393_v26, %v5652_v27 }
  0x43   :  { %v6108_v32 = vld [vmem:[#allocation2 + $0x3d0] sm:$0xf0]  ;;  %v8515_v34 = vld [vmem:[#allocation2 + $0x3d4] sm:$0xf0]  ;;  %v8507_v37 = vld [vmem:[#allocation2 + $0x39c] sm:$0xf]  ;;  %v6107_v40 = vor.u32 %v8514_v29, %v6106_v28 }
  0x44   :  { %994 = vmatpush.bf16.msra.mxu0 %v5771_v4  ;;  %1007 = vmatpush.bf16.msra.mxu1 %v5775_v5  ;;  %v6116_v38 = vld [vmem:[#allocation2 + $0x3d8] sm:$0xf0]  ;;  %v6111_v41 = vor.u32 %v8506_v30, %v6108_v32  ;;  %v6115_v42 = vor.u32 %v8515_v34, %v6114_v33  ;;  %v6042_v43 = vld [vmem:[#allocation2 + $0x310] sm:$0xf]  ;;  %v8490_v45 = vld [vmem:[#allocation2 + $0x314] sm:$0xf] }
  0x45   :  { %1020 = vmatpush.bf16.msra.mxu2 %v5779_v6  ;;  %v8498_v44 = vld [vmem:[#allocation2 + $0x34c] sm:$0xf0]  ;;  %v6119_v46 = vor.u32 %v8507_v37, %v6116_v38  ;;  %v6044_v47 = vld [vmem:[#allocation2 + $0x350] sm:$0xf0]  ;;  %v6050_v48 = vld [vmem:[#allocation2 + $0x318] sm:$0xf] }
  0x46   :  { %1033 = vmatpush.bf16.msra.mxu3 %v5783_v10  ;;  %v8499_v49 = vld [vmem:[#allocation2 + $0x354] sm:$0xf0]  ;;  %v9467_v50 = vld [vmem:[%s9653_s0] sm:$0xf]  ;;  %v8491_v51 = vld [vmem:[#allocation2 + $0x31c] sm:$0xf]  ;;  %v6043_v53 = vor.u32 %v8498_v44, %v6042_v43  ;;  %v6047_v54 = vor.u32 %v8490_v45, %v6044_v47 }
  0x47   :  { %v6052_v52 = vld [vmem:[#allocation2 + $0x358] sm:$0xf0]  ;;  %v6051_v55 = vor.u32 %v8499_v49, %v6050_v48  ;;  %v5978_v56 = vld [vmem:[#allocation2 + $0x290] sm:$0xf]  ;;  %v8474_v58 = vld [vmem:[#allocation2 + $0x294] sm:$0xf] }
  0x48   :  { %995 = vmatpush.bf16.msra.mxu0 %v5707_v16  ;;  %1008 = vmatpush.bf16.msra.mxu1 %v5711_v19  ;;  %v8482_v57 = vld [vmem:[#allocation2 + $0x2cc] sm:$0xf0]  ;;  %v6055_v59 = vor.u32 %v8491_v51, %v6052_v52  ;;  %v5980_v60 = vld [vmem:[#allocation2 + $0x2d0] sm:$0xf0]  ;;  %v5986_v61 = vld [vmem:[#allocation2 + $0x298] sm:$0xf] }
  0x49   :  { %1021 = vmatpush.bf16.msra.mxu2 %v5715_v20  ;;  %v8483_v62 = vld [vmem:[#allocation2 + $0x2d4] sm:$0xf0]  ;;  %v8475_v63 = vld [vmem:[#allocation2 + $0x29c] sm:$0xf]  ;;  %v5979_v1 = vor.u32 %v8482_v57, %v5978_v56  ;;  %v5983_v2 = vor.u32 %v8474_v58, %v5980_v60  ;;  %v5914_v4 = vld [vmem:[#allocation2 + $0x210] sm:$0xf] }
  0x4a   :  { %1034 = vmatpush.bf16.msra.mxu3 %v5719_v24  ;;  %v5988_v0 = vld [vmem:[#allocation2 + $0x2d8] sm:$0xf0]  ;;  %v5987_v3 = vor.u32 %v8483_v62, %v5986_v61  ;;  %v8466_v5 = vld [vmem:[#allocation2 + $0x24c] sm:$0xf0]  ;;  %v8458_v6 = vld [vmem:[#allocation2 + $0x214] sm:$0xf] }
  0x4b   :  { %v5991_v7 = vor.u32 %v8475_v63, %v5988_v0  ;;  %v5916_v8 = vld [vmem:[#allocation2 + $0x250] sm:$0xf0]  ;;  %v5922_v9 = vld [vmem:[#allocation2 + $0x218] sm:$0xf]  ;;  %v8459_v11 = vld [vmem:[#allocation2 + $0x21c] sm:$0xf]  ;;  %v5915_v13 = vor.u32 %v8466_v5, %v5914_v4 }
  0x4c   :  { %996 = vmatpush.bf16.msra.mxu0 %v5643_v31  ;;  %1009 = vmatpush.bf16.msra.mxu1 %v5647_v35  ;;  %v8467_v10 = vld [vmem:[#allocation2 + $0x254] sm:$0xf0]  ;;  %v5924_v12 = vld [vmem:[#allocation2 + $0x258] sm:$0xf0]  ;;  %v5919_v14 = vor.u32 %v8458_v6, %v5916_v8  ;;  %v5850_v16 = vld [vmem:[#allocation2 + $0x190] sm:$0xf] }
  0x4d   :  { %1022 = vmatpush.bf16.msra.mxu2 %v5651_v36  ;;  %v5923_v15 = vor.u32 %v8467_v10, %v5922_v9  ;;  %v8450_v17 = vld [vmem:[#allocation2 + $0x1cc] sm:$0xf0]  ;;  %v8442_v18 = vld [vmem:[#allocation2 + $0x194] sm:$0xf]  ;;  %v5927_v19 = vor.u32 %v8459_v11, %v5924_v12  ;;  %v5858_v21 = vld [vmem:[#allocation2 + $0x198] sm:$0xf] }
  0x4e   :  { %1035 = vmatpush.bf16.msra.mxu3 %v5655_v39  ;;  %v5852_v20 = vld [vmem:[#allocation2 + $0x1d0] sm:$0xf0]  ;;  %v8451_v22 = vld [vmem:[#allocation2 + $0x1d4] sm:$0xf0]  ;;  %v8443_v23 = vld [vmem:[#allocation2 + $0x19c] sm:$0xf]  ;;  %v5851_v25 = vor.u32 %v8450_v17, %v5850_v16 }
  0x4f   :  { %997 = vmatmul.bf16.vlgmr.msra.gmra.mxu0 %v9467_v50  ;;  %1010 = vmatmul.bf16.vlgmr.msra.gmra.mxu1 %v9467_v50  ;;  %v5860_v24 = vld [vmem:[#allocation2 + $0x1d8] sm:$0xf0]  ;;  %v5855_v26 = vor.u32 %v8442_v18, %v5852_v20  ;;  %v5859_v27 = vor.u32 %v8451_v22, %v5858_v21  ;;  %v5786_v28 = vld [vmem:[#allocation2 + $0x110] sm:$0xf]  ;;  %v8426_v30 = vld [vmem:[#allocation2 + $0x114] sm:$0xf] }
  0x50   :  { %1041 = vmatpush.bf16.msrb.mxu0 %v6107_v40  ;;  %1054 = vmatpush.bf16.msrb.mxu1 %v6111_v41  ;;  %v8434_v29 = vld [vmem:[#allocation2 + $0x14c] sm:$0xf0]  ;;  %v5863_v31 = vor.u32 %v8443_v23, %v5860_v24  ;;  %v5788_v32 = vld [vmem:[#allocation2 + $0x150] sm:$0xf0]  ;;  %v5794_v33 = vld [vmem:[#allocation2 + $0x118] sm:$0xf] }
  0x51   :  { %1067 = vmatpush.bf16.msrb.mxu2 %v6115_v42  ;;  %1036 = vmatmul.bf16.vlgmr.msra.gmra.mxu3 %v9467_v50  ;;  %v8435_v34 = vld [vmem:[#allocation2 + $0x154] sm:$0xf0]  ;;  %v8427_v35 = vld [vmem:[#allocation2 + $0x11c] sm:$0xf]  ;;  %v5787_v37 = vor.u32 %v8434_v29, %v5786_v28  ;;  %v5791_v38 = vor.u32 %v8426_v30, %v5788_v32  ;;  %v5722_v40 = vld [vmem:[#allocation2 + $0x90] sm:$0xf] }
  0x52   :  { %1080 = vmatpush.bf16.msrb.mxu3 %v6119_v46  ;;  %1023 = vmatmul.bf16.vlgmr.msra.gmra.mxu2 %v9467_v50  ;;  %v5796_v36 = vld [vmem:[#allocation2 + $0x158] sm:$0xf0]  ;;  %v5795_v39 = vor.u32 %v8435_v34, %v5794_v33  ;;  %v8418_v41 = vld [vmem:[#allocation2 + $0xcc] sm:$0xf0]  ;;  %v8410_v42 = vld [vmem:[#allocation2 + $0x94] sm:$0xf] }
  0x53   :  { %v5799_v43 = vor.u32 %v8427_v35, %v5796_v36  ;;  %v5724_v44 = vld [vmem:[#allocation2 + $0xd0] sm:$0xf0]  ;;  %v5730_v45 = vld [vmem:[#allocation2 + $0x98] sm:$0xf]  ;;  %v8411_v47 = vld [vmem:[#allocation2 + $0x9c] sm:$0xf]  ;;  %v5723_v49 = vor.u32 %v8418_v41, %v5722_v40 }
  0x54   :  { %1042 = vmatpush.bf16.msrb.mxu0 %v6043_v53  ;;  %1055 = vmatpush.bf16.msrb.mxu1 %v6047_v54  ;;  %v8419_v46 = vld [vmem:[#allocation2 + $0xd4] sm:$0xf0]  ;;  %v5732_v48 = vld [vmem:[#allocation2 + $0xd8] sm:$0xf0]  ;;  %v5658_v51 = vld [vmem:[#allocation2 + $0x10] sm:$0xf]  ;;  %v5727_v53 = vor.u32 %v8410_v42, %v5724_v44 }
  0x55   :  { %1068 = vmatpush.bf16.msrb.mxu2 %v6051_v55  ;;  %v8402_v52 = vld [vmem:[#allocation2 + $0x4c] sm:$0xf0]  ;;  %v5731_v54 = vor.u32 %v8419_v46, %v5730_v45  ;;  %v8394_v55 = vld [vmem:[#allocation2 + $0x14] sm:$0xf]  ;;  %v5666_v57 = vld [vmem:[#allocation2 + $0x18] sm:$0xf]  ;;  %v5735_v58 = vor.u32 %v8411_v47, %v5732_v48 }
  0x56   :  { %1081 = vmatpush.bf16.msrb.mxu3 %v6055_v59  ;;  %v5660_v56 = vld [vmem:[#allocation2 + $0x50] sm:$0xf0]  ;;  %v8403_v59 = vld [vmem:[#allocation2 + $0x54] sm:$0xf0]  ;;  %v8395_v60 = vld [vmem:[#allocation2 + $0x1c] sm:$0xf] }
  0x57   :  { %v5668_v61 = vld [vmem:[#allocation2 + $0x58] sm:$0xf0]  ;;  %v6122_v62 = vld [vmem:[#allocation2 + $0x3a0] sm:$0xf]  ;;  %v8508_v0 = vld [vmem:[#allocation2 + $0x3a4] sm:$0xf]  ;;  %v5663_v5 = vor.u32 %v8394_v55, %v5660_v56  ;;  %v5667_v6 = vor.u32 %v8403_v59, %v5666_v57 }
  0x58   :  { %1043 = vmatpush.bf16.msrb.mxu0 %v5979_v1  ;;  %1056 = vmatpush.bf16.msrb.mxu1 %v5983_v2  ;;  %v8516_v63 = vld [vmem:[#allocation2 + $0x3dc] sm:$0xf0]  ;;  %v5659_v1 = vor.u32 %v8402_v52, %v5658_v51  ;;  %v6124_v2 = vld [vmem:[#allocation2 + $0x3e0] sm:$0xf0]  ;;  %v8517_v4 = vld [vmem:[#allocation2 + $0x3e4] sm:$0xf0]  ;;  %v5671_v9 = vor.u32 %v8395_v60, %v5668_v61 }
  0x59   :  { %1069 = vmatpush.bf16.msrb.mxu2 %v5987_v3  ;;  %v6130_v3 = vld [vmem:[#allocation2 + $0x3a8] sm:$0xf]  ;;  %v6132_v8 = vld [vmem:[#allocation2 + $0x3e8] sm:$0xf0]  ;;  %v6123_v10 = vor.u32 %v8516_v63, %v6122_v62  ;;  %v6127_v11 = vor.u32 %v8508_v0, %v6124_v2  ;;  %v6060_v17 = vld [vmem:[#allocation2 + $0x360] sm:$0xf0] }
  0x5a   :  { %1082 = vmatpush.bf16.msrb.mxu3 %v5991_v7  ;;  %v8509_v7 = vld [vmem:[#allocation2 + $0x3ac] sm:$0xf]  ;;  %v6131_v12 = vor.u32 %v8517_v4, %v6130_v3  ;;  %v6066_v18 = vld [vmem:[#allocation2 + $0x328] sm:$0xf]  ;;  %v5996_v29 = vld [vmem:[#allocation2 + $0x2e0] sm:$0xf0] }
  0x5b   :  { %v6135_v16 = vor.u32 %v8509_v7, %v6132_v8  ;;  %v8493_v20 = vld [vmem:[#allocation2 + $0x32c] sm:$0xf]  ;;  %v6002_v30 = vld [vmem:[#allocation2 + $0x2a8] sm:$0xf]  ;;  %v5932_v41 = vld [vmem:[#allocation2 + $0x260] sm:$0xf0] }
  0x5c   :  { %1044 = vmatpush.bf16.msrb.mxu0 %v5915_v13  ;;  %1057 = vmatpush.bf16.msrb.mxu1 %v5919_v14  ;;  %v6058_v13 = vld [vmem:[#allocation2 + $0x320] sm:$0xf]  ;;  %v6068_v21 = vld [vmem:[#allocation2 + $0x368] sm:$0xf0]  ;;  %v5938_v42 = vld [vmem:[#allocation2 + $0x228] sm:$0xf] }
  0x5d   :  { %1070 = vmatpush.bf16.msrb.mxu2 %v5923_v15  ;;  %v8500_v14 = vld [vmem:[#allocation2 + $0x35c] sm:$0xf0]  ;;  %v8492_v15 = vld [vmem:[#allocation2 + $0x324] sm:$0xf]  ;;  %v6071_v28 = vor.u32 %v8493_v20, %v6068_v21  ;;  %v8477_v32 = vld [vmem:[#allocation2 + $0x2ac] sm:$0xf] }
  0x5e   :  { %1083 = vmatpush.bf16.msrb.mxu3 %v5927_v19  ;;  %v8501_v19 = vld [vmem:[#allocation2 + $0x364] sm:$0xf0]  ;;  %v6059_v22 = vor.u32 %v8500_v14, %v6058_v13  ;;  %v6063_v23 = vor.u32 %v8492_v15, %v6060_v17  ;;  %v6004_v33 = vld [vmem:[#allocation2 + $0x2e8] sm:$0xf0]  ;;  %v8452_v51 = vld [vmem:[#allocation2 + $0x1dc] sm:$0xf0] }
  0x5f   :  { %v6067_v24 = vor.u32 %v8501_v19, %v6066_v18  ;;  %v6007_v40 = vor.u32 %v8477_v32, %v6004_v33  ;;  %v8461_v44 = vld [vmem:[#allocation2 + $0x22c] sm:$0xf]  ;;  %v8444_v52 = vld [vmem:[#allocation2 + $0x1a4] sm:$0xf]  ;;  %v5874_v55 = vld [vmem:[#allocation2 + $0x1a8] sm:$0xf] }
  0x60   :  { %1045 = vmatpush.bf16.msrb.mxu0 %v5851_v25  ;;  %1058 = vmatpush.bf16.msrb.mxu1 %v5855_v26  ;;  %v5994_v25 = vld [vmem:[#allocation2 + $0x2a0] sm:$0xf]  ;;  %v5940_v45 = vld [vmem:[#allocation2 + $0x268] sm:$0xf0]  ;;  %v8453_v56 = vld [vmem:[#allocation2 + $0x1e4] sm:$0xf0] }
  0x61   :  { %1071 = vmatpush.bf16.msrb.mxu2 %v5859_v27  ;;  %v8484_v26 = vld [vmem:[#allocation2 + $0x2dc] sm:$0xf0]  ;;  %v8476_v27 = vld [vmem:[#allocation2 + $0x2a4] sm:$0xf]  ;;  %v8445_v57 = vld [vmem:[#allocation2 + $0x1ac] sm:$0xf]  ;;  %v5875_v62 = vor.u32 %v8453_v56, %v5874_v55 }
  0x62   :  { %1084 = vmatpush.bf16.msrb.mxu3 %v5863_v31  ;;  %v8485_v31 = vld [vmem:[#allocation2 + $0x2e4] sm:$0xf0]  ;;  %v5995_v34 = vor.u32 %v8484_v26, %v5994_v25  ;;  %v5999_v35 = vor.u32 %v8476_v27, %v5996_v29  ;;  %v5802_v60 = vld [vmem:[#allocation2 + $0x120] sm:$0xf]  ;;  %v8428_v0 = vld [vmem:[#allocation2 + $0x124] sm:$0xf] }
  0x63   :  { %v6003_v36 = vor.u32 %v8485_v31, %v6002_v30  ;;  %v8436_v63 = vld [vmem:[#allocation2 + $0x15c] sm:$0xf0]  ;;  %v5810_v3 = vld [vmem:[#allocation2 + $0x128] sm:$0xf]  ;;  %v5740_v14 = vld [vmem:[#allocation2 + $0xe0] sm:$0xf0] }
  0x64   :  { %1046 = vmatpush.bf16.msrb.mxu0 %v5787_v37  ;;  %1059 = vmatpush.bf16.msrb.mxu1 %v5791_v38  ;;  %v5930_v37 = vld [vmem:[#allocation2 + $0x220] sm:$0xf]  ;;  %v8437_v4 = vld [vmem:[#allocation2 + $0x164] sm:$0xf0]  ;;  %v5803_v7 = vor.u32 %v8436_v63, %v5802_v60  ;;  %v8413_v17 = vld [vmem:[#allocation2 + $0xac] sm:$0xf] }
  0x65   :  { %1072 = vmatpush.bf16.msrb.mxu2 %v5795_v39  ;;  %v8468_v38 = vld [vmem:[#allocation2 + $0x25c] sm:$0xf0]  ;;  %v8460_v39 = vld [vmem:[#allocation2 + $0x224] sm:$0xf]  ;;  %v5746_v15 = vld [vmem:[#allocation2 + $0xa8] sm:$0xf] }
  0x66   :  { %1085 = vmatpush.bf16.msrb.mxu3 %v5799_v43  ;;  %v8469_v43 = vld [vmem:[#allocation2 + $0x264] sm:$0xf0]  ;;  %v5931_v46 = vor.u32 %v8468_v38, %v5930_v37  ;;  %v5935_v47 = vor.u32 %v8460_v39, %v5932_v41  ;;  %v5748_v18 = vld [vmem:[#allocation2 + $0xe8] sm:$0xf0]  ;;  %v5674_v20 = vld [vmem:[#allocation2 + $0x20] sm:$0xf] }
  0x67   :  { %v5939_v48 = vor.u32 %v8469_v43, %v5938_v42  ;;  %v8404_v21 = vld [vmem:[#allocation2 + $0x5c] sm:$0xf0]  ;;  %v5676_v25 = vld [vmem:[#allocation2 + $0x60] sm:$0xf0]  ;;  %v5682_v26 = vld [vmem:[#allocation2 + $0x28] sm:$0xf]  ;;  %v5751_v27 = vor.u32 %v8413_v17, %v5748_v18 }
  0x68   :  { %1047 = vmatpush.bf16.msrb.mxu0 %v5723_v49  ;;  %1060 = vmatpush.bf16.msrb.mxu1 %v5727_v53  ;;  %v5866_v49 = vld [vmem:[#allocation2 + $0x1a0] sm:$0xf]  ;;  %v5943_v53 = vor.u32 %v8461_v44, %v5940_v45  ;;  %v8397_v29 = vld [vmem:[#allocation2 + $0x2c] sm:$0xf]  ;;  %v6138_v31 = vld [vmem:[#allocation2 + $0x3b0] sm:$0xf] }
  0x69   :  { %1073 = vmatpush.bf16.msrb.mxu2 %v5731_v54  ;;  %v5868_v54 = vld [vmem:[#allocation2 + $0x1e0] sm:$0xf0]  ;;  %v5867_v59 = vor.u32 %v8452_v51, %v5866_v49  ;;  %v5684_v30 = vld [vmem:[#allocation2 + $0x68] sm:$0xf0]  ;;  %v8518_v32 = vld [vmem:[#allocation2 + $0x3ec] sm:$0xf0] }
  0x6a   :  { %1086 = vmatpush.bf16.msrb.mxu3 %v5735_v58  ;;  %v5876_v58 = vld [vmem:[#allocation2 + $0x1e8] sm:$0xf0]  ;;  %v5871_v61 = vor.u32 %v8444_v52, %v5868_v54  ;;  %v8510_v33 = vld [vmem:[#allocation2 + $0x3b4] sm:$0xf]  ;;  %v8519_v37 = vld [vmem:[#allocation2 + $0x3f4] sm:$0xf0]  ;;  %v5687_v42 = vor.u32 %v8397_v29, %v5684_v30  ;;  %v6139_v43 = vor.u32 %v8518_v32, %v6138_v31 }
  0x6b   :  { %v5879_v2 = vor.u32 %v8445_v57, %v5876_v58  ;;  %v6148_v41 = vld [vmem:[#allocation2 + $0x3f8] sm:$0xf0]  ;;  %v6076_v51 = vld [vmem:[#allocation2 + $0x370] sm:$0xf0]  ;;  %v6082_v52 = vld [vmem:[#allocation2 + $0x338] sm:$0xf] }
  0x6c   :  { %1048 = vmatpush.bf16.msrb.mxu0 %v5659_v1  ;;  %1061 = vmatpush.bf16.msrb.mxu1 %v5663_v5  ;;  %v5804_v1 = vld [vmem:[#allocation2 + $0x160] sm:$0xf0]  ;;  %v8429_v5 = vld [vmem:[#allocation2 + $0x12c] sm:$0xf]  ;;  %v8495_v54 = vld [vmem:[#allocation2 + $0x33c] sm:$0xf] }
  0x6d   :  { %1074 = vmatpush.bf16.msrb.mxu2 %v5667_v6  ;;  %v5812_v6 = vld [vmem:[#allocation2 + $0x168] sm:$0xf0]  ;;  %v5807_v8 = vor.u32 %v8428_v0, %v5804_v1  ;;  %v6084_v55 = vld [vmem:[#allocation2 + $0x378] sm:$0xf0]  ;;  %v8486_v60 = vld [vmem:[#allocation2 + $0x2ec] sm:$0xf0] }
  0x6e   :  { %1087 = vmatpush.bf16.msrb.mxu3 %v5671_v9  ;;  %v5811_v9 = vor.u32 %v8437_v4, %v5810_v3  ;;  %v5815_v13 = vor.u32 %v8429_v5, %v5812_v6  ;;  %v6012_v63 = vld [vmem:[#allocation2 + $0x2f0] sm:$0xf0]  ;;  %v6018_v0 = vld [vmem:[#allocation2 + $0x2b8] sm:$0xf]  ;;  %v6020_v3 = vld [vmem:[#allocation2 + $0x2f8] sm:$0xf0] }
  0x6f   :  { %1049 = vmatmul.bf16.vlgmr.msrb.gmra.mxu0 %v9467_v50  ;;  %1062 = vmatmul.bf16.vlgmr.msrb.gmra.mxu1 %v9467_v50  ;;  %v8487_v1 = vld [vmem:[#allocation2 + $0x2f4] sm:$0xf0]  ;;  %v5818_v31 = vld [vmem:[#allocation2 + $0x130] sm:$0xf] }
  0x70   :  { %1093 = vmatpush.bf16.msra.mxu0 %v6123_v10  ;;  %1106 = vmatpush.bf16.msra.mxu1 %v6127_v11  ;;  %v5738_v10 = vld [vmem:[#allocation2 + $0xa0] sm:$0xf]  ;;  %v6019_v6 = vor.u32 %v8487_v1, %v6018_v0  ;;  %v8438_v32 = vld [vmem:[#allocation2 + $0x16c] sm:$0xf0]  ;;  %v5700_v0 = vld [vmem:[#allocation2 + $0x78] sm:$0xf0] }
  0x71   :  { %1119 = vmatpush.bf16.msra.mxu2 %v6131_v12  ;;  %1088 = vmatmul.bf16.vlgmr.msrb.gmra.mxu3 %v9467_v50  ;;  %v8420_v11 = vld [vmem:[#allocation2 + $0xdc] sm:$0xf0]  ;;  %v8412_v12 = vld [vmem:[#allocation2 + $0xa4] sm:$0xf]  ;;  %v6266_v1 = vld [vmem:[#allocation6 + $0xe0] sm:$0xf] }
  0x72   :  { %1132 = vmatpush.bf16.msra.mxu3 %v6135_v16  ;;  %1075 = vmatmul.bf16.vlgmr.msrb.gmra.mxu2 %v9467_v50  ;;  %v8421_v16 = vld [vmem:[#allocation2 + $0xe4] sm:$0xf0]  ;;  %v5739_v19 = vor.u32 %v8420_v11, %v5738_v10  ;;  %v5948_v11 = vld [vmem:[#allocation2 + $0x270] sm:$0xf0] }
  0x74   :  { %1094 = vmatpush.bf16.msra.mxu0 %v6059_v22  ;;  %1107 = vmatpush.bf16.msra.mxu1 %v6063_v23  ;;  %v5743_v22 = vor.u32 %v8412_v12, %v5740_v14  ;;  %v5747_v23 = vor.u32 %v8421_v16, %v5746_v15  ;;  %v5954_v12 = vld [vmem:[#allocation2 + $0x238] sm:$0xf]  ;;  %v8463_v14 = vld [vmem:[#allocation2 + $0x23c] sm:$0xf] }
  0x75   :  { %1120 = vmatpush.bf16.msra.mxu2 %v6067_v24  ;;  %v8396_v24 = vld [vmem:[#allocation2 + $0x24] sm:$0xf]  ;;  %v5956_v15 = vld [vmem:[#allocation2 + $0x278] sm:$0xf0] }
  0x76   :  { %1133 = vmatpush.bf16.msra.mxu3 %v6071_v28  ;;  %v8405_v28 = vld [vmem:[#allocation2 + $0x64] sm:$0xf0]  ;;  %v5679_v38 = vor.u32 %v8396_v24, %v5676_v25  ;;  %v5890_v24 = vld [vmem:[#allocation2 + $0x1b8] sm:$0xf] }
  0x77   :  { %v5683_v39 = vor.u32 %v8405_v28, %v5682_v26  ;;  %v8455_v25 = vld [vmem:[#allocation2 + $0x1f4] sm:$0xf0]  ;;  %v8447_v26 = vld [vmem:[#allocation2 + $0x1bc] sm:$0xf] }
  0x78   :  { %1095 = vmatpush.bf16.msra.mxu0 %v5995_v34  ;;  %1108 = vmatpush.bf16.msra.mxu1 %v5999_v35  ;;  %v5675_v34 = vor.u32 %v8404_v21, %v5674_v20  ;;  %v6140_v35 = vld [vmem:[#allocation2 + $0x3f0] sm:$0xf0]  ;;  %v8454_v20 = vld [vmem:[#allocation2 + $0x1ec] sm:$0xf0]  ;;  %v5891_v30 = vor.u32 %v8455_v25, %v5890_v24  ;;  %v8642_v24 = vld [vmem:[#allocation6 + $0x3cc] sm:$0xf0] }
  0x79   :  { %1121 = vmatpush.bf16.msra.mxu2 %v6003_v36  ;;  %v6146_v36 = vld [vmem:[#allocation2 + $0x3b8] sm:$0xf]  ;;  %v6143_v44 = vor.u32 %v8510_v33, %v6140_v35  ;;  %v8446_v21 = vld [vmem:[#allocation2 + $0x1b4] sm:$0xf] }
  0x7a   :  { %1134 = vmatpush.bf16.msra.mxu3 %v6007_v40  ;;  %v8511_v40 = vld [vmem:[#allocation2 + $0x3bc] sm:$0xf]  ;;  %v6147_v45 = vor.u32 %v8519_v37, %v6146_v36  ;;  %v8430_v33 = vld [vmem:[#allocation2 + $0x134] sm:$0xf]  ;;  %v5826_v36 = vld [vmem:[#allocation2 + $0x138] sm:$0xf] }
  0x7b   :  { %v6151_v49 = vor.u32 %v8511_v40, %v6148_v41  ;;  %v5820_v35 = vld [vmem:[#allocation2 + $0x170] sm:$0xf0]  ;;  %v8439_v37 = vld [vmem:[#allocation2 + $0x174] sm:$0xf0]  ;;  %v5819_v40 = vor.u32 %v8438_v32, %v5818_v31  ;;  %v8574_v32 = vld [vmem:[#allocation6 + $0x1ac] sm:$0xf0] }
  0x7c   :  { %1096 = vmatpush.bf16.msra.mxu0 %v5931_v46  ;;  %1109 = vmatpush.bf16.msra.mxu1 %v5935_v47  ;;  %v6074_v46 = vld [vmem:[#allocation2 + $0x330] sm:$0xf]  ;;  %v5823_v41 = vor.u32 %v8430_v33, %v5820_v35 }
  0x7d   :  { %1122 = vmatpush.bf16.msra.mxu2 %v5939_v48  ;;  %v8502_v47 = vld [vmem:[#allocation2 + $0x36c] sm:$0xf0]  ;;  %v8494_v48 = vld [vmem:[#allocation2 + $0x334] sm:$0xf] }
  0x7e   :  { %1135 = vmatpush.bf16.msra.mxu3 %v5943_v53  ;;  %v8503_v53 = vld [vmem:[#allocation2 + $0x374] sm:$0xf0]  ;;  %v6075_v56 = vor.u32 %v8502_v47, %v6074_v46  ;;  %v6079_v57 = vor.u32 %v8494_v48, %v6076_v51  ;;  %v5756_v47 = vld [vmem:[#allocation2 + $0xf0] sm:$0xf0]  ;;  %v8415_v51 = vld [vmem:[#allocation2 + $0xbc] sm:$0xf] }
  0x7f   :  { %v6083_v58 = vor.u32 %v8503_v53, %v6082_v52  ;;  %v5762_v48 = vld [vmem:[#allocation2 + $0xb8] sm:$0xf]  ;;  %v5764_v52 = vld [vmem:[#allocation2 + $0xf8] sm:$0xf0]  ;;  %v6490_v33 = vld [vmem:[#allocation6 + $0x2a0] sm:$0xf] }
  0x80   :  { %1097 = vmatpush.bf16.msra.mxu0 %v5867_v59  ;;  %1110 = vmatpush.bf16.msra.mxu1 %v5871_v61  ;;  %v6010_v59 = vld [vmem:[#allocation2 + $0x2b0] sm:$0xf]  ;;  %v8478_v61 = vld [vmem:[#allocation2 + $0x2b4] sm:$0xf] }
  0x81   :  { %1123 = vmatpush.bf16.msra.mxu2 %v5875_v62  ;;  %v6087_v62 = vor.u32 %v8495_v54, %v6084_v55  ;;  %v6011_v4 = vor.u32 %v8486_v60, %v6010_v59  ;;  %v6015_v5 = vor.u32 %v8478_v61, %v6012_v63  ;;  %v5690_v54 = vld [vmem:[#allocation2 + $0x30] sm:$0xf]  ;;  %v5692_v59 = vld [vmem:[#allocation2 + $0x70] sm:$0xf0]  ;;  %v5698_v60 = vld [vmem:[#allocation2 + $0x38] sm:$0xf]  ;;  %v5767_v61 = vor.u32 %v8415_v51, %v5764_v52 }
  0x82   :  { %1136 = vmatpush.bf16.msra.mxu3 %v5879_v2  ;;  %v8479_v2 = vld [vmem:[#allocation2 + $0x2bc] sm:$0xf]  ;;  %v8406_v55 = vld [vmem:[#allocation2 + $0x6c] sm:$0xf0] }
  0x83   :  { %v6023_v10 = vor.u32 %v8479_v2, %v6020_v3  ;;  %v8399_v63 = vld [vmem:[#allocation2 + $0x3c] sm:$0xf]  ;;  %v8550_v2 = vld [vmem:[#allocation6 + $0xec] sm:$0xf0]  ;;  %v6394_v3 = vld [vmem:[#allocation6 + $0x1e0] sm:$0xf] }
  0x84   :  { %1098 = vmatpush.bf16.msra.mxu0 %v5803_v7  ;;  %1111 = vmatpush.bf16.msra.mxu1 %v5807_v8  ;;  %v5946_v7 = vld [vmem:[#allocation2 + $0x230] sm:$0xf] }
  0x85   :  { %1124 = vmatpush.bf16.msra.mxu2 %v5811_v9  ;;  %v8470_v8 = vld [vmem:[#allocation2 + $0x26c] sm:$0xf0]  ;;  %v8462_v9 = vld [vmem:[#allocation2 + $0x234] sm:$0xf] }
  0x86   :  { %1137 = vmatpush.bf16.msra.mxu3 %v5815_v13  ;;  %v8471_v13 = vld [vmem:[#allocation2 + $0x274] sm:$0xf0]  ;;  %v5947_v16 = vor.u32 %v8470_v8, %v5946_v7  ;;  %v5951_v17 = vor.u32 %v8462_v9, %v5948_v11  ;;  %v8614_v7 = vld [vmem:[#allocation6 + $0x2ec] sm:$0xf0]  ;;  %v6618_v35 = vld [vmem:[#allocation6 + $0x3a0] sm:$0xf] }
  0x87   :  { %v5955_v18 = vor.u32 %v8471_v13, %v5954_v12  ;;  %v8646_v11 = vld [vmem:[#allocation6 + $0x3ec] sm:$0xf0]  ;;  %v5703_v12 = vor.u32 %v8399_v63, %v5700_v0  ;;  %v6267_v13 = vor.u32 %v8550_v2, %v6266_v1  ;;  %v6202_v52 = vld [vmem:[#allocation6 + $0x60] sm:$0xf] }
  0x88   :  { %1099 = vmatpush.bf16.msra.mxu0 %v5739_v19  ;;  %1112 = vmatpush.bf16.msra.mxu1 %v5743_v22  ;;  %v5882_v19 = vld [vmem:[#allocation2 + $0x1b0] sm:$0xf]  ;;  %v5959_v22 = vor.u32 %v8463_v14, %v5956_v15  ;;  %v8530_v1 = vld [vmem:[#allocation6 + $0x4c] sm:$0xf0] }
  0x89   :  { %1125 = vmatpush.bf16.msra.mxu2 %v5747_v23  ;;  %v5884_v23 = vld [vmem:[#allocation2 + $0x1f0] sm:$0xf0]  ;;  %v5883_v28 = vor.u32 %v8454_v20, %v5882_v19  ;;  %v8578_v20 = vld [vmem:[#allocation6 + $0x1cc] sm:$0xf0]  ;;  %v6186_v0 = vld [vmem:[#allocation6 + $0x40] sm:$0xf] }
  0x8a   :  { %1138 = vmatpush.bf16.msra.mxu3 %v5751_v27  ;;  %v5892_v27 = vld [vmem:[#allocation2 + $0x1f8] sm:$0xf0]  ;;  %v5887_v29 = vor.u32 %v8446_v21, %v5884_v23  ;;  %v6506_v21 = vld [vmem:[#allocation6 + $0x2c0] sm:$0xf] }
  0x8b   :  { %v6634_v23 = vld [vmem:[#allocation6 + $0x3c0] sm:$0xf] }
  0x8c   :  { %1100 = vmatpush.bf16.msra.mxu0 %v5675_v34  ;;  %1113 = vmatpush.bf16.msra.mxu1 %v5679_v38  ;;  %v5895_v34 = vor.u32 %v8447_v26, %v5892_v27  ;;  %v8431_v38 = vld [vmem:[#allocation2 + $0x13c] sm:$0xf]  ;;  %v6635_v31 = vor.u32 %v8642_v24, %v6634_v23  ;;  %v6314_v2 = vld [vmem:[#allocation6 + $0x140] sm:$0xf]  ;;  %v8522_v23 = vld [vmem:[#allocation6 + $0xc] sm:$0xf0] }
  0x8d   :  { %1126 = vmatpush.bf16.msra.mxu2 %v5683_v39  ;;  %v5828_v39 = vld [vmem:[#allocation2 + $0x178] sm:$0xf0] }
  0x8e   :  { %1139 = vmatpush.bf16.msra.mxu3 %v5687_v42  ;;  %v5827_v42 = vor.u32 %v8439_v37, %v5826_v36  ;;  %v5831_v46 = vor.u32 %v8431_v38, %v5828_v39  ;;  %v8638_v36 = vld [vmem:[#allocation6 + $0x3ac] sm:$0xf0] }
  0x8f   :  { %1101 = vmatmul.bf16.vlgmr.msra.gmra.mxu0 %v9467_v50  ;;  %1114 = vmatmul.bf16.vlgmr.msra.gmra.mxu1 %v9467_v50 }
  0x90   :  { %1145 = vmatpush.bf16.msrb.mxu0 %v6139_v43  ;;  %1158 = vmatpush.bf16.msrb.mxu1 %v6143_v44  ;;  %v5754_v43 = vld [vmem:[#allocation2 + $0xb0] sm:$0xf] }
  0x91   :  { %1171 = vmatpush.bf16.msrb.mxu2 %v6147_v45  ;;  %1140 = vmatmul.bf16.vlgmr.msra.gmra.mxu3 %v9467_v50  ;;  %v8422_v44 = vld [vmem:[#allocation2 + $0xec] sm:$0xf0]  ;;  %v8414_v45 = vld [vmem:[#allocation2 + $0xb4] sm:$0xf] }
  0x92   :  { %1184 = vmatpush.bf16.msrb.mxu3 %v6151_v49  ;;  %1127 = vmatmul.bf16.vlgmr.msra.gmra.mxu2 %v9467_v50  ;;  %v8423_v49 = vld [vmem:[#allocation2 + $0xf4] sm:$0xf0]  ;;  %v5755_v53 = vor.u32 %v8422_v44, %v5754_v43  ;;  %v6619_v43 = vor.u32 %v8638_v36, %v6618_v35  ;;  %v8570_v44 = vld [vmem:[#allocation6 + $0x18c] sm:$0xf0]  ;;  %v6906_v35 = vld [vmem:[#allocation6 + $0x5e0] sm:$0xf] }
  0x94   :  { %1146 = vmatpush.bf16.msrb.mxu0 %v6075_v56  ;;  %1159 = vmatpush.bf16.msrb.mxu1 %v6079_v57  ;;  %v5759_v56 = vor.u32 %v8414_v45, %v5756_v47  ;;  %v5763_v57 = vor.u32 %v8423_v49, %v5762_v48  ;;  %v6474_v45 = vld [vmem:[#allocation6 + $0x280] sm:$0xf]  ;;  %v8634_v48 = vld [vmem:[#allocation6 + $0x38c] sm:$0xf0] }
  0x95   :  { %1172 = vmatpush.bf16.msrb.mxu2 %v6083_v58  ;;  %v8398_v58 = vld [vmem:[#allocation2 + $0x34] sm:$0xf]  ;;  %v6602_v47 = vld [vmem:[#allocation6 + $0x380] sm:$0xf] }
  0x96   :  { %1185 = vmatpush.bf16.msrb.mxu3 %v6087_v62  ;;  %v8407_v62 = vld [vmem:[#allocation2 + $0x74] sm:$0xf0]  ;;  %v5695_v8 = vor.u32 %v8398_v58, %v5692_v59  ;;  %v8598_v58 = vld [vmem:[#allocation6 + $0x26c] sm:$0xf0]  ;;  %v6586_v59 = vld [vmem:[#allocation6 + $0x360] sm:$0xf] }
  0x97   :  { %v5699_v9 = vor.u32 %v8407_v62, %v5698_v60  ;;  %v8630_v60 = vld [vmem:[#allocation6 + $0x36c] sm:$0xf0] }
  0x98   :  { %1147 = vmatpush.bf16.msrb.mxu0 %v6011_v4  ;;  %1160 = vmatpush.bf16.msrb.mxu1 %v6015_v5  ;;  %v5691_v4 = vor.u32 %v8406_v55, %v5690_v54  ;;  %v8582_v5 = vld [vmem:[#allocation6 + $0x1ec] sm:$0xf0]  ;;  %v6330_v54 = vld [vmem:[#allocation6 + $0x160] sm:$0xf]  ;;  %v6603_v55 = vor.u32 %v8634_v48, %v6602_v47 }
  0x99   :  { %1173 = vmatpush.bf16.msrb.mxu2 %v6019_v6  ;;  %v6522_v6 = vld [vmem:[#allocation6 + $0x2e0] sm:$0xf]  ;;  %v6395_v14 = vor.u32 %v8582_v5, %v6394_v3  ;;  %v6587_v3 = vor.u32 %v8630_v60, %v6586_v59 }
  0x9a   :  { %1186 = vmatpush.bf16.msrb.mxu3 %v6023_v10  ;;  %v6650_v10 = vld [vmem:[#allocation6 + $0x3e0] sm:$0xf]  ;;  %v6523_v15 = vor.u32 %v8614_v7, %v6522_v6  ;;  %v8594_v6 = vld [vmem:[#allocation6 + $0x24c] sm:$0xf0] }
  0x9b   :  { %v6651_v19 = vor.u32 %v8646_v11, %v6650_v10  ;;  %v6442_v5 = vld [vmem:[#allocation6 + $0x240] sm:$0xf] }
  0x9c   :  { %1148 = vmatpush.bf16.msrb.mxu0 %v5947_v16  ;;  %1161 = vmatpush.bf16.msrb.mxu1 %v5951_v17  ;;  %v6250_v16 = vld [vmem:[#allocation6 + $0xc0] sm:$0xf]  ;;  %v8546_v17 = vld [vmem:[#allocation6 + $0xcc] sm:$0xf0]  ;;  %v6443_v11 = vor.u32 %v8594_v6, %v6442_v5 }
  0x9d   :  { %1174 = vmatpush.bf16.msrb.mxu2 %v5955_v18  ;;  %v6378_v18 = vld [vmem:[#allocation6 + $0x1c0] sm:$0xf]  ;;  %v6251_v25 = vor.u32 %v8546_v17, %v6250_v16  ;;  %v8558_v16 = vld [vmem:[#allocation6 + $0x12c] sm:$0xf0] }
  0x9e   :  { %1187 = vmatpush.bf16.msrb.mxu3 %v5959_v22  ;;  %v8610_v22 = vld [vmem:[#allocation6 + $0x2cc] sm:$0xf0]  ;;  %v6379_v26 = vor.u32 %v8578_v20, %v6378_v18  ;;  %v6570_v7 = vld [vmem:[#allocation6 + $0x340] sm:$0xf] }
  0x9f   :  { %v6507_v27 = vor.u32 %v8610_v22, %v6506_v21  ;;  %v6426_v17 = vld [vmem:[#allocation6 + $0x220] sm:$0xf]  ;;  %v8590_v18 = vld [vmem:[#allocation6 + $0x22c] sm:$0xf0] }
  0xa0   :  { %1149 = vmatpush.bf16.msrb.mxu0 %v5883_v28  ;;  %1162 = vmatpush.bf16.msrb.mxu1 %v5887_v29  ;;  %v6234_v28 = vld [vmem:[#allocation6 + $0xa0] sm:$0xf]  ;;  %v8542_v29 = vld [vmem:[#allocation6 + $0xac] sm:$0xf0] }
  0xa1   :  { %1175 = vmatpush.bf16.msrb.mxu2 %v5891_v30  ;;  %v6362_v30 = vld [vmem:[#allocation6 + $0x1a0] sm:$0xf]  ;;  %v6235_v37 = vor.u32 %v8542_v29, %v6234_v28  ;;  %v8622_v20 = vld [vmem:[#allocation6 + $0x32c] sm:$0xf0] }
  0xa2   :  { %1188 = vmatpush.bf16.msrb.mxu3 %v5895_v34  ;;  %v8606_v34 = vld [vmem:[#allocation6 + $0x2ac] sm:$0xf0]  ;;  %v6363_v38 = vor.u32 %v8574_v32, %v6362_v30  ;;  %v6154_v22 = vld [vmem:[#allocation6] sm:$0xf] }
  0xa3   :  { %v6491_v39 = vor.u32 %v8606_v34, %v6490_v33  ;;  %v6410_v28 = vld [vmem:[#allocation6 + $0x200] sm:$0xf]  ;;  %v8586_v30 = vld [vmem:[#allocation6 + $0x20c] sm:$0xf0]  ;;  %v6155_v36 = vor.u32 %v8522_v23, %v6154_v22 }
  0xa4   :  { %1150 = vmatpush.bf16.msrb.mxu0 %v5819_v40  ;;  %1163 = vmatpush.bf16.msrb.mxu1 %v5823_v41  ;;  %v6218_v40 = vld [vmem:[#allocation6 + $0x80] sm:$0xf]  ;;  %v8538_v41 = vld [vmem:[#allocation6 + $0x8c] sm:$0xf0] }
  0xa5   :  { %1176 = vmatpush.bf16.msrb.mxu2 %v5827_v42  ;;  %v6346_v42 = vld [vmem:[#allocation6 + $0x180] sm:$0xf]  ;;  %v6219_v49 = vor.u32 %v8538_v41, %v6218_v40  ;;  %v8618_v32 = vld [vmem:[#allocation6 + $0x30c] sm:$0xf0]  ;;  %v6411_v41 = vor.u32 %v8586_v30, %v6410_v28 }
  0xa6   :  { %1189 = vmatpush.bf16.msrb.mxu3 %v5831_v46  ;;  %v8602_v46 = vld [vmem:[#allocation6 + $0x28c] sm:$0xf0]  ;;  %v6778_v33 = vld [vmem:[#allocation6 + $0x4e0] sm:$0xf] }
  0xa7   :  { %v6475_v51 = vor.u32 %v8602_v46, %v6474_v45  ;;  %v8678_v34 = vld [vmem:[#allocation6 + $0x4ec] sm:$0xf0]  ;;  %v6762_v48 = vld [vmem:[#allocation6 + $0x4c0] sm:$0xf] }
  0xa8   :  { %1151 = vmatpush.bf16.msrb.mxu0 %v5755_v53  ;;  %1164 = vmatpush.bf16.msrb.mxu1 %v5759_v56  ;;  %v8534_v53 = vld [vmem:[#allocation6 + $0x6c] sm:$0xf0]  ;;  %v6779_v45 = vor.u32 %v8678_v34, %v6778_v33  ;;  %v6714_v22 = vld [vmem:[#allocation6 + $0x460] sm:$0xf] }
  0xa9   :  { %1177 = vmatpush.bf16.msrb.mxu2 %v5763_v57  ;;  %v8566_v56 = vld [vmem:[#allocation6 + $0x16c] sm:$0xf0]  ;;  %v6458_v57 = vld [vmem:[#allocation6 + $0x260] sm:$0xf] }
  0xaa   :  { %1190 = vmatpush.bf16.msrb.mxu3 %v5767_v61  ;;  %v6203_v61 = vor.u32 %v8534_v53, %v6202_v52  ;;  %v6331_v62 = vor.u32 %v8566_v56, %v6330_v54  ;;  %v6459_v63 = vor.u32 %v8598_v58, %v6458_v57  ;;  %v8706_v52 = vld [vmem:[#allocation6 + $0x5cc] sm:$0xf0]  ;;  %v7018_v53 = vld [vmem:[#allocation6 + $0x6c0] sm:$0xf] }
  0xab   :  { %v8738_v54 = vld [vmem:[#allocation6 + $0x6cc] sm:$0xf0]  ;;  %v6746_v58 = vld [vmem:[#allocation6 + $0x4a0] sm:$0xf] }
  0xac   :  { %1152 = vmatpush.bf16.msrb.mxu0 %v5691_v4  ;;  %1165 = vmatpush.bf16.msrb.mxu1 %v5695_v8  ;;  %v8562_v4 = vld [vmem:[#allocation6 + $0x14c] sm:$0xf0]  ;;  %v7019_v60 = vor.u32 %v8738_v54, %v7018_v53  ;;  %v6954_v53 = vld [vmem:[#allocation6 + $0x640] sm:$0xf] }
  0xad   :  { %1178 = vmatpush.bf16.msrb.mxu2 %v5699_v9  ;;  %v8626_v8 = vld [vmem:[#allocation6 + $0x34c] sm:$0xf0]  ;;  %v6187_v9 = vor.u32 %v8530_v1, %v6186_v0  ;;  %v6315_v10 = vor.u32 %v8562_v4, %v6314_v2  ;;  %v7002_v1 = vld [vmem:[#allocation6 + $0x6a0] sm:$0xf] }
  0xae   :  { %1191 = vmatpush.bf16.msrb.mxu3 %v5703_v12  ;;  %v6170_v12 = vld [vmem:[#allocation6 + $0x20] sm:$0xf]  ;;  %v8770_v56 = vld [vmem:[#allocation6 + $0x7cc] sm:$0xf0] }
  0xaf   :  { %1153 = vmatmul.bf16.vlgmr.msrb.gmra.mxu0 %v9467_v50  ;;  %1166 = vmatmul.bf16.vlgmr.msrb.gmra.mxu1 %v9467_v50  ;;  %v8734_v2 = vld [vmem:[#allocation6 + $0x6ac] sm:$0xf0]  ;;  %v7130_v4 = vld [vmem:[#allocation6 + $0x7a0] sm:$0xf] }
  0xb0   :  { %4311 = vmatpush.bf16.msra.mxu0 %v6267_v13  ;;  %4324 = vmatpush.bf16.msra.mxu1 %v6395_v14  ;;  %v8526_v13 = vld [vmem:[#allocation6 + $0x2c] sm:$0xf0]  ;;  %v6298_v14 = vld [vmem:[#allocation6 + $0x120] sm:$0xf] }
  0xb1   :  { %4337 = vmatpush.bf16.msra.mxu2 %v6523_v15  ;;  %1192 = vmatmul.bf16.vlgmr.msrb.gmra.mxu3 %v9467_v50  ;;  %v6571_v15 = vor.u32 %v8626_v8, %v6570_v7  ;;  %v6171_v21 = vor.u32 %v8526_v13, %v6170_v12  ;;  %v6299_v24 = vor.u32 %v8558_v16, %v6298_v14  ;;  %v8766_v5 = vld [vmem:[#allocation6 + $0x7ac] sm:$0xf0]  ;;  %v6730_v7 = vld [vmem:[#allocation6 + $0x480] sm:$0xf] }
  0xb2   :  { %4350 = vmatpush.bf16.msra.mxu3 %v6651_v19  ;;  %1179 = vmatmul.bf16.vlgmr.msrb.gmra.mxu2 %v9467_v50  ;;  %v6347_v50 = vor.u32 %v8570_v44, %v6346_v42  ;;  %v6554_v19 = vld [vmem:[#allocation6 + $0x320] sm:$0xf]  ;;  %v8666_v8 = vld [vmem:[#allocation6 + $0x48c] sm:$0xf0]  ;;  %v7131_v14 = vor.u32 %v8766_v5, %v7130_v4 }
  0xb3   :  { %v6555_v29 = vor.u32 %v8622_v20, %v6554_v19  ;;  %v7162_v42 = vld [vmem:[#allocation6 + $0x7e0] sm:$0xf]  ;;  %v8698_v12 = vld [vmem:[#allocation6 + $0x58c] sm:$0xf0]  ;;  %v6731_v20 = vor.u32 %v8666_v8, %v6730_v7 }
  0xb4   :  { %4312 = vmatpush.bf16.msra.mxu0 %v6251_v25  ;;  %4325 = vmatpush.bf16.msra.mxu1 %v6379_v26  ;;  %v6427_v25 = vor.u32 %v8590_v18, %v6426_v17  ;;  %v6282_v26 = vld [vmem:[#allocation6 + $0x100] sm:$0xf]  ;;  %v8730_v16 = vld [vmem:[#allocation6 + $0x68c] sm:$0xf0] }
  0xb5   :  { %4338 = vmatpush.bf16.msra.mxu2 %v6507_v27  ;;  %v8554_v27 = vld [vmem:[#allocation6 + $0x10c] sm:$0xf0]  ;;  %v7114_v18 = vld [vmem:[#allocation6 + $0x780] sm:$0xf] }
  0xb6   :  { %4351 = vmatpush.bf16.msra.mxu3 %v6635_v31  ;;  %v6538_v31 = vld [vmem:[#allocation6 + $0x300] sm:$0xf]  ;;  %v6283_v40 = vor.u32 %v8554_v27, %v6282_v26  ;;  %v8762_v19 = vld [vmem:[#allocation6 + $0x78c] sm:$0xf0] }
  0xb7   :  { %v6539_v44 = vor.u32 %v8618_v32, %v6538_v31  ;;  %v8662_v26 = vld [vmem:[#allocation6 + $0x46c] sm:$0xf0]  ;;  %v6842_v27 = vld [vmem:[#allocation6 + $0x560] sm:$0xf]  ;;  %v7115_v30 = vor.u32 %v8762_v19, %v7114_v18 }
  0xb8   :  { %4313 = vmatpush.bf16.msra.mxu0 %v6235_v37  ;;  %4326 = vmatpush.bf16.msra.mxu1 %v6363_v38  ;;  %v8710_v37 = vld [vmem:[#allocation6 + $0x5ec] sm:$0xf0]  ;;  %v7034_v38 = vld [vmem:[#allocation6 + $0x6e0] sm:$0xf] }
  0xb9   :  { %4339 = vmatpush.bf16.msra.mxu2 %v6491_v39  ;;  %v8742_v39 = vld [vmem:[#allocation6 + $0x6ec] sm:$0xf0]  ;;  %v6907_v46 = vor.u32 %v8710_v37, %v6906_v35  ;;  %v6970_v31 = vld [vmem:[#allocation6 + $0x660] sm:$0xf] }
  0xba   :  { %4352 = vmatpush.bf16.msra.mxu3 %v6619_v43  ;;  %v8774_v43 = vld [vmem:[#allocation6 + $0x7ec] sm:$0xf0]  ;;  %v7035_v47 = vor.u32 %v8742_v39, %v7034_v38  ;;  %v6715_v39 = vor.u32 %v8662_v26, %v6714_v22  ;;  %v6938_v8 = vld [vmem:[#allocation6 + $0x620] sm:$0xf] }
  0xbb   :  { %v8694_v28 = vld [vmem:[#allocation6 + $0x56c] sm:$0xf0]  ;;  %v6794_v19 = vld [vmem:[#allocation6 + $0x500] sm:$0xf] }
  0xbc   :  { %4314 = vmatpush.bf16.msra.mxu0 %v6219_v49  ;;  %4327 = vmatpush.bf16.msra.mxu1 %v6347_v50  ;;  %v8674_v49 = vld [vmem:[#allocation6 + $0x4cc] sm:$0xf0]  ;;  %v6890_v50 = vld [vmem:[#allocation6 + $0x5c0] sm:$0xf] }
  0xbd   :  { %4340 = vmatpush.bf16.msra.mxu2 %v6475_v51  ;;  %v7163_v51 = vor.u32 %v8774_v43, %v7162_v42  ;;  %v6763_v57 = vor.u32 %v8674_v49, %v6762_v48  ;;  %v6891_v59 = vor.u32 %v8706_v52, %v6890_v50  ;;  %v8726_v32 = vld [vmem:[#allocation6 + $0x66c] sm:$0xf0]  ;;  %v6843_v42 = vor.u32 %v8694_v28, %v6842_v27  ;;  %v7290_v27 = vld [vmem:[#allocation6 + $0x8e0] sm:$0xf] }
  0xbe   :  { %4353 = vmatpush.bf16.msra.mxu3 %v6603_v55  ;;  %v7146_v55 = vld [vmem:[#allocation6 + $0x7c0] sm:$0xf]  ;;  %v8758_v37 = vld [vmem:[#allocation6 + $0x76c] sm:$0xf0]  ;;  %v6971_v43 = vor.u32 %v8726_v32, %v6970_v31 }
  0xbf   :  { %v7147_v0 = vor.u32 %v8770_v56, %v7146_v55  ;;  %v8690_v52 = vld [vmem:[#allocation6 + $0x54c] sm:$0xf0]  ;;  %v7082_v56 = vld [vmem:[#allocation6 + $0x740] sm:$0xf] }
  0xc0   :  { %4315 = vmatpush.bf16.msra.mxu0 %v6203_v61  ;;  %4328 = vmatpush.bf16.msra.mxu1 %v6331_v62  ;;  %v8670_v61 = vld [vmem:[#allocation6 + $0x4ac] sm:$0xf0]  ;;  %v6874_v62 = vld [vmem:[#allocation6 + $0x5a0] sm:$0xf] }
  0xc1   :  { %4341 = vmatpush.bf16.msra.mxu2 %v6459_v63  ;;  %v8702_v63 = vld [vmem:[#allocation6 + $0x5ac] sm:$0xf0]  ;;  %v6747_v6 = vor.u32 %v8670_v61, %v6746_v58  ;;  %v6682_v61 = vld [vmem:[#allocation6 + $0x420] sm:$0xf] }
  0xc2   :  { %4354 = vmatpush.bf16.msra.mxu3 %v6587_v3  ;;  %v9485_v3 = vld [vmem:[#allocation4] sm:$0xff]  ;;  %v7546_v32 = vld [vmem:[#allocation6 + $0xae0] sm:$0xf] }
  0xc3   :  { %v317_v13 = vperm.slane %v9485_v3, 0  ;;  %v318_v17 = vperm.slane %v9485_v3, 1  ;;  %v319_v33 = vperm.slane %v9485_v3, 2  ;;  %v320_v38 = vperm.slane %v9485_v3, 3  ;;  %v8722_v54 = vld [vmem:[#allocation6 + $0x64c] sm:$0xf0] }
  0xc4   :  { %4316 = vmatpush.bf16.msra.mxu0 %v6187_v9  ;;  %4329 = vmatpush.bf16.msra.mxu1 %v6315_v10  ;;  %v6875_v9 = vor.u32 %v8702_v63, %v6874_v62  ;;  %v7003_v10 = vor.u32 %v8734_v2, %v7002_v1  ;;  %v8654_v1 = vld [vmem:[#allocation6 + $0x42c] sm:$0xf0]  ;;  %v6810_v2 = vld [vmem:[#allocation6 + $0x520] sm:$0xf] }
  0xc5   :  { %4342 = vmatpush.bf16.msra.mxu2 %v6443_v11  ;;  %v6858_v11 = vld [vmem:[#allocation6 + $0x580] sm:$0xf]  ;;  %v8686_v7 = vld [vmem:[#allocation6 + $0x52c] sm:$0xf0] }
  0xc6   :  { %4355 = vmatpush.bf16.msra.mxu3 %v6571_v15  ;;  %v6986_v15 = vld [vmem:[#allocation6 + $0x680] sm:$0xf]  ;;  %v6859_v23 = vor.u32 %v8698_v12, %v6858_v11  ;;  %v8750_v12 = vld [vmem:[#allocation6 + $0x72c] sm:$0xf0] }
  0xc7   :  { %v7066_v11 = vld [vmem:[#allocation6 + $0x720] sm:$0xf]  ;;  %v8746_v26 = vld [vmem:[#allocation6 + $0x70c] sm:$0xf0] }
  0xc8   :  { %4317 = vmatpush.bf16.msra.mxu0 %v6171_v21  ;;  %4330 = vmatpush.bf16.msra.mxu1 %v6299_v24  ;;  %v6987_v24 = vor.u32 %v8730_v16, %v6986_v15  ;;  %v8650_v15 = vld [vmem:[#allocation6 + $0x40c] sm:$0xf0]  ;;  %v6811_v16 = vor.u32 %v8686_v7, %v6810_v2  ;;  %v7067_v22 = vor.u32 %v8750_v12, %v7066_v11  ;;  %v321_v2 = vperm.slane %v9485_v3, 4 }
  0xc9   :  { %4343 = vmatpush.bf16.msra.mxu2 %v6427_v25  ;;  %v8806_v28 = vld [vmem:[#allocation6 + $0x8ec] sm:$0xf0] }
  0xca   :  { %4356 = vmatpush.bf16.msra.mxu3 %v6555_v29  ;;  %v8838_v31 = vld [vmem:[#allocation6 + $0x9ec] sm:$0xf0] }
  0xcb   :  { %v8826_v11 = vld [vmem:[#allocation6 + $0x98c] sm:$0xf0] }
  0xcc   :  { %4318 = vmatpush.bf16.msra.mxu0 %v6155_v36  ;;  %4331 = vmatpush.bf16.msra.mxu1 %v6283_v40  ;;  %v998_v21 = vpop.f32.mrf.mxu0  ;;  %v1011_v29 = vpop.f32.mrf.mxu1  ;;  %v7098_v36 = vld [vmem:[#allocation6 + $0x760] sm:$0xf] }
  0xcd   :  { %4344 = vmatpush.bf16.msra.mxu2 %v6411_v41  ;;  %v999_v25 = vadd.f32 %v998_v21, %v317_v13  ;;  %v1012_v34 = vadd.f32 %v1011_v29, %v318_v17  ;;  %v7099_v48 = vor.u32 %v8758_v37, %v7098_v36  ;;  %v6683_v13 = vor.u32 %v8654_v1, %v6682_v61  ;;  %v6922_v21 = vld [vmem:[#allocation6 + $0x600] sm:$0xf]  ;;  %v8902_v37 = vld [vmem:[#allocation6 + $0xbec] sm:$0xf0] }
  0xce   :  { %4357 = vmatpush.bf16.msra.mxu3 %v6539_v44  ;;  %v7418_v29 = vld [vmem:[#allocation6 + $0x9e0] sm:$0xf] }
  0xcf   :  { %v1197_v35 = vmax.f32 %v999_v25, 0.0  ;;  %v1198_v40 = vmax.f32 %v1012_v34, 0.0  ;;  %v7050_v25 = vld [vmem:[#allocation6 + $0x700] sm:$0xf] }
  0xd0   :  { %4363 = vmatpush.bf16.msrb.mxu0 %v6779_v45  ;;  %4376 = vmatpush.bf16.msrb.mxu1 %v6907_v46  ;;  %v6698_v45 = vld [vmem:[#allocation6 + $0x440] sm:$0xf]  ;;  %v8658_v46 = vld [vmem:[#allocation6 + $0x44c] sm:$0xf0] }
  0xd1   :  { %4389 = vmatpush.bf16.msrb.mxu2 %v7035_v47  ;;  %v9491_v41 = vpack.c.bf16 %v1197_v35, %v1197_v35  ;;  %v6826_v47 = vld [vmem:[#allocation6 + $0x540] sm:$0xf] }
  0xd2   :  { %4402 = vmatpush.bf16.msrb.mxu3 %v7163_v51  ;;  %v9493_v51 = vpack.c.bf16 %v1198_v40, %v1198_v40  ;;  %v6827_v63 = vor.u32 %v8690_v52, %v6826_v47  ;;  %v7674_v36 = vld [vmem:[#allocation6 + $0xbe0] sm:$0xf]  ;;  %v7419_v40 = vor.u32 %v8838_v31, %v7418_v29  ;;  %v8834_v47 = vld [vmem:[#allocation6 + $0x9cc] sm:$0xf0] }
  0xd3   :  { %4319 = vmatmul.bf16.vlgmr.msra.gmra.mxu0 %v9491_v41  ;;  %v8898_v52 = vld [vmem:[#allocation6 + $0xbcc] sm:$0xf0]  ;;  %v7514_v61 = vld [vmem:[#allocation6 + $0xaa0] sm:$0xf] }
  0xd4   :  { %4364 = vmatpush.bf16.msrb.mxu0 %v6763_v57  ;;  %4377 = vmatpush.bf16.msrb.mxu1 %v6891_v59  ;;  %v1037_v50 = vpop.f32.mrf.mxu3  ;;  %v8754_v57 = vld [vmem:[#allocation6 + $0x74c] sm:$0xf0]  ;;  %v6699_v59 = vor.u32 %v8658_v46, %v6698_v45  ;;  %v1013_v4 = vpop.f32.mrf.mxu1  ;;  %v7402_v45 = vld [vmem:[#allocation6 + $0x9c0] sm:$0xf]  ;;  %v7675_v46 = vor.u32 %v8902_v37, %v7674_v36  ;;  %v324_v36 = vperm.slane %v9485_v3, 7 }
  0xd5   :  { %4390 = vmatpush.bf16.msrb.mxu2 %v7019_v60  ;;  %v1024_v44 = vpop.f32.mrf.mxu2  ;;  %v1038_v55 = vadd.f32 %v1037_v50, %v320_v38  ;;  %v1000_v60 = vpop.f32.mrf.mxu0  ;;  %4332 = vmatmul.bf16.vlgmr.msra.gmra.mxu1 %v9493_v51  ;;  %v7051_v38 = vor.u32 %v8746_v26, %v7050_v25  ;;  %v7658_v50 = vld [vmem:[#allocation6 + $0xbc0] sm:$0xf]  ;;  %v8790_v25 = vld [vmem:[#allocation6 + $0x86c] sm:$0xf0] }
  0xd6   :  { %4403 = vmatpush.bf16.msrb.mxu3 %v7147_v0  ;;  %v1025_v49 = vadd.f32 %v1024_v44, %v319_v33  ;;  %v6955_v0 = vor.u32 %v8722_v54, %v6954_v53  ;;  %v8870_v33 = vld [vmem:[#allocation6 + $0xaec] sm:$0xf0]  ;;  %v7403_v54 = vor.u32 %v8834_v47, %v7402_v45  ;;  %v7242_v4 = vld [vmem:[#allocation6 + $0x880] sm:$0xf] }
  0xd7   :  { %v1200_v62 = vmax.f32 %v1038_v55, 0.0  ;;  %v8802_v44 = vld [vmem:[#allocation6 + $0x8cc] sm:$0xf0]  ;;  %v7354_v26 = vld [vmem:[#allocation6 + $0x960] sm:$0xf] }
  0xd8   :  { %4365 = vmatpush.bf16.msrb.mxu0 %v6747_v6  ;;  %4378 = vmatpush.bf16.msrb.mxu1 %v6875_v9  ;;  %v1199_v58 = vmax.f32 %v1025_v49, 0.0  ;;  %v7083_v6 = vor.u32 %v8754_v57, %v7082_v56  ;;  %v8718_v9 = vld [vmem:[#allocation6 + $0x62c] sm:$0xf0]  ;;  %v7258_v56 = vld [vmem:[#allocation6 + $0x8a0] sm:$0xf] }
  0xd9   :  { %4391 = vmatpush.bf16.msrb.mxu2 %v7003_v10  ;;  %v9499_v10 = vpack.c.bf16 %v1200_v62, %v1200_v62  ;;  %v6939_v17 = vor.u32 %v8718_v9, %v6938_v8  ;;  %v8866_v49 = vld [vmem:[#allocation6 + $0xacc] sm:$0xf0]  ;;  %v7370_v9 = vld [vmem:[#allocation6 + $0x980] sm:$0xf] }
  0xda   :  { %4404 = vmatpush.bf16.msrb.mxu3 %v7131_v14  ;;  %v9497_v5 = vpack.c.bf16 %v1199_v58, %v1199_v58  ;;  %v6666_v14 = vld [vmem:[#allocation6 + $0x400] sm:$0xf]  ;;  %v8798_v57 = vld [vmem:[#allocation6 + $0x8ac] sm:$0xf0] }
  0xdb   :  { %4358 = vmatmul.bf16.vlgmr.msra.gmra.mxu3 %v9499_v10  ;;  %v7386_v58 = vld [vmem:[#allocation6 + $0x9a0] sm:$0xf]  ;;  %v8830_v60 = vld [vmem:[#allocation6 + $0x9ac] sm:$0xf0]  ;;  %v7259_v1 = vor.u32 %v8798_v57, %v7258_v56 }
  0xdc   :  { %4366 = vmatpush.bf16.msrb.mxu0 %v6731_v20  ;;  %4379 = vmatpush.bf16.msrb.mxu1 %v6859_v23  ;;  %v8682_v20 = vld [vmem:[#allocation6 + $0x50c] sm:$0xf0]  ;;  %v1039_v23 = vpop.f32.mrf.mxu3  ;;  %v7482_v31 = vld [vmem:[#allocation6 + $0xa60] sm:$0xf] }
  0xdd   :  { %4392 = vmatpush.bf16.msrb.mxu2 %v6987_v24  ;;  %v1026_v18 = vpop.f32.mrf.mxu2  ;;  %v8714_v24 = vld [vmem:[#allocation6 + $0x60c] sm:$0xf0]  ;;  %v6795_v34 = vor.u32 %v8682_v20, %v6794_v19  ;;  %v7338_v45 = vld [vmem:[#allocation6 + $0x940] sm:$0xf] }
  0xde   :  { %4405 = vmatpush.bf16.msrb.mxu3 %v7115_v30  ;;  %4345 = vmatmul.bf16.vlgmr.msra.gmra.mxu2 %v9497_v5  ;;  %v6667_v30 = vor.u32 %v8650_v15, %v6666_v14  ;;  %v6923_v35 = vor.u32 %v8714_v24, %v6922_v21  ;;  %v8862_v62 = vld [vmem:[#allocation6 + $0xaac] sm:$0xf0]  ;;  %v322_v15 = vperm.slane %v9485_v3, 5  ;;  %v7226_v21 = vld [vmem:[#allocation6 + $0x860] sm:$0xf] }
  0xdf   :  { %v7515_v7 = vor.u32 %v8862_v62, %v7514_v61  ;;  %v8794_v8 = vld [vmem:[#allocation6 + $0x88c] sm:$0xf0] }
  0xe0   :  { %4367 = vmatpush.bf16.msrb.mxu0 %v6715_v39  ;;  %4380 = vmatpush.bf16.msrb.mxu1 %v6843_v42  ;;  %v7291_v39 = vor.u32 %v8806_v28, %v7290_v27  ;;  %v7547_v42 = vor.u32 %v8870_v33, %v7546_v32  ;;  %v8858_v14 = vld [vmem:[#allocation6 + $0xa8c] sm:$0xf0]  ;;  %v7243_v20 = vor.u32 %v8794_v8, %v7242_v4  ;;  %v7610_v33 = vld [vmem:[#allocation6 + $0xb60] sm:$0xf] }
  0xe1   :  { %4393 = vmatpush.bf16.msrb.mxu2 %v6971_v43  ;;  %v7274_v43 = vld [vmem:[#allocation6 + $0x8c0] sm:$0xf]  ;;  %v8890_v18 = vld [vmem:[#allocation6 + $0xb8c] sm:$0xf0] }
  0xe2   :  { %4406 = vmatpush.bf16.msrb.mxu3 %v7099_v48  ;;  %v7530_v48 = vld [vmem:[#allocation6 + $0xac0] sm:$0xf]  ;;  %v7275_v53 = vor.u32 %v8802_v44, %v7274_v43  ;;  %v8822_v27 = vld [vmem:[#allocation6 + $0x96c] sm:$0xf0] }
  0xe3   :  { %v7531_v55 = vor.u32 %v8866_v49, %v7530_v48  ;;  %v8854_v32 = vld [vmem:[#allocation6 + $0xa6c] sm:$0xf0]  ;;  %v7210_v43 = vld [vmem:[#allocation6 + $0x840] sm:$0xf] }
  0xe4   :  { %4368 = vmatpush.bf16.msrb.mxu0 %v6699_v59  ;;  %4381 = vmatpush.bf16.msrb.mxu1 %v6827_v63  ;;  %v7659_v59 = vor.u32 %v8898_v52, %v7658_v50  ;;  %v7642_v63 = vld [vmem:[#allocation6 + $0xba0] sm:$0xf]  ;;  %v8786_v44 = vld [vmem:[#allocation6 + $0x84c] sm:$0xf0] }
  0xe5   :  { %4394 = vmatpush.bf16.msrb.mxu2 %v6955_v0  ;;  %v8894_v0 = vld [vmem:[#allocation6 + $0xbac] sm:$0xf0]  ;;  %v7466_v50 = vld [vmem:[#allocation6 + $0xa40] sm:$0xf] }
  0xe6   :  { %4407 = vmatpush.bf16.msrb.mxu3 %v7083_v6  ;;  %v7387_v6 = vor.u32 %v8830_v60, %v7386_v58  ;;  %v7643_v12 = vor.u32 %v8894_v0, %v7642_v63  ;;  %v8850_v52 = vld [vmem:[#allocation6 + $0xa4c] sm:$0xf0]  ;;  %v7211_v58 = vor.u32 %v8786_v44, %v7210_v43 }
  0xe7   :  { %v8882_v56 = vld [vmem:[#allocation6 + $0xb4c] sm:$0xf0]  ;;  %v7467_v63 = vor.u32 %v8850_v52, %v7466_v50  ;;  %v8042_v50 = vld [vmem:[#allocation6 + $0xec0] sm:$0xf] }
  0xe8   :  { %4369 = vmatpush.bf16.msrb.mxu0 %v6683_v13  ;;  %4382 = vmatpush.bf16.msrb.mxu1 %v6811_v16  ;;  %v7498_v13 = vld [vmem:[#allocation6 + $0xa80] sm:$0xf]  ;;  %v8782_v0 = vld [vmem:[#allocation6 + $0x82c] sm:$0xf0] }
  0xe9   :  { %4395 = vmatpush.bf16.msrb.mxu2 %v6939_v17  ;;  %v7626_v17 = vld [vmem:[#allocation6 + $0xb80] sm:$0xf]  ;;  %v7499_v23 = vor.u32 %v8858_v14, %v7498_v13  ;;  %v8846_v8 = vld [vmem:[#allocation6 + $0xa2c] sm:$0xf0] }
  0xea   :  { %4408 = vmatpush.bf16.msrb.mxu3 %v7067_v22  ;;  %v7371_v22 = vor.u32 %v8826_v11, %v7370_v9  ;;  %v7627_v29 = vor.u32 %v8890_v18, %v7626_v17  ;;  %v8878_v13 = vld [vmem:[#allocation6 + $0xb2c] sm:$0xf0] }
  0xeb   :  { %v8994_v52 = vld [vmem:[#allocation6 + $0xecc] sm:$0xf0] }
  0xec   :  { %4370 = vmatpush.bf16.msrb.mxu0 %v6667_v30  ;;  %4383 = vmatpush.bf16.msrb.mxu1 %v6795_v34  ;;  %v1050_v16 = vpop.f32.mrf.mxu0  ;;  %v1063_v24 = vpop.f32.mrf.mxu1  ;;  %v8886_v34 = vld [vmem:[#allocation6 + $0xb6c] sm:$0xf0] }
  0xed   :  { %4396 = vmatpush.bf16.msrb.mxu2 %v6923_v35  ;;  %v1051_v19 = vadd.f32 %v1050_v16, %v321_v2  ;;  %v1064_v30 = vadd.f32 %v1063_v24, %v322_v15  ;;  %v323_v35 = vperm.slane %v9485_v3, 6  ;;  %v7611_v47 = vor.u32 %v8886_v34, %v7610_v33  ;;  %v8818_v3 = vld [vmem:[#allocation6 + $0x94c] sm:$0xf0]  ;;  %v7178_v15 = vld [vmem:[#allocation6 + $0x800] sm:$0xf] }
  0xee   :  { %4409 = vmatpush.bf16.msrb.mxu3 %v7051_v38  ;;  %v7339_v62 = vor.u32 %v8818_v3, %v7338_v45  ;;  %v8778_v16 = vld [vmem:[#allocation6 + $0x80c] sm:$0xf0]  ;;  %v8058_v33 = vld [vmem:[#allocation6 + $0xee0] sm:$0xf] }
  0xef   :  { %v1201_v28 = vmax.f32 %v1051_v19, 0.0  ;;  %v1202_v38 = vmax.f32 %v1064_v30, 0.0  ;;  %v7306_v19 = vld [vmem:[#allocation6 + $0x900] sm:$0xf]  ;;  %v8998_v34 = vld [vmem:[#allocation6 + $0xeec] sm:$0xf0] }
  0xf0   :  { %4415 = vmatpush.bf16.msra.mxu0 %v7291_v39  ;;  %4428 = vmatpush.bf16.msra.mxu1 %v7419_v40  ;;  %v7227_v39 = vor.u32 %v8790_v25, %v7226_v21  ;;  %v7355_v40 = vor.u32 %v8822_v27, %v7354_v26  ;;  %v7434_v21 = vld [vmem:[#allocation6 + $0xa00] sm:$0xf]  ;;  %v8842_v25 = vld [vmem:[#allocation6 + $0xa0c] sm:$0xf0]  ;;  %v8059_v44 = vor.u32 %v8998_v34, %v8058_v33 }
  0xf1   :  { %4441 = vmatpush.bf16.msra.mxu2 %v7547_v42  ;;  %v9507_v37 = vpack.c.bf16 %v1201_v28, %v1201_v28  ;;  %v7483_v42 = vor.u32 %v8854_v32, %v7482_v31  ;;  %v7562_v26 = vld [vmem:[#allocation6 + $0xb00] sm:$0xf]  ;;  %v8874_v27 = vld [vmem:[#allocation6 + $0xb0c] sm:$0xf0]  ;;  %v7179_v31 = vor.u32 %v8778_v16, %v7178_v15 }
  0xf2   :  { %4454 = vmatpush.bf16.msra.mxu3 %v7675_v46  ;;  %v9509_v46 = vpack.c.bf16 %v1202_v38, %v1202_v38  ;;  %v7802_v28 = vld [vmem:[#allocation6 + $0xce0] sm:$0xf]  ;;  %v8966_v32 = vld [vmem:[#allocation6 + $0xdec] sm:$0xf0] }
  0xf3   :  { %4371 = vmatmul.bf16.vlgmr.msrb.gmra.mxu0 %v9507_v37  ;;  %v7930_v30 = vld [vmem:[#allocation6 + $0xde0] sm:$0xf]  ;;  %v8962_v3 = vld [vmem:[#allocation6 + $0xdcc] sm:$0xf0] }
  0xf4   :  { %4416 = vmatpush.bf16.msra.mxu0 %v7275_v53  ;;  %4429 = vmatpush.bf16.msra.mxu1 %v7403_v54  ;;  %v1089_v49 = vpop.f32.mrf.mxu3  ;;  %v1052_v57 = vpop.f32.mrf.mxu0  ;;  %v8186_v38 = vld [vmem:[#allocation6 + $0xfe0] sm:$0xf]  ;;  %v7931_v43 = vor.u32 %v8966_v32, %v7930_v30  ;;  %v8954_v16 = vld [vmem:[#allocation6 + $0xd8c] sm:$0xf0] }
  0xf5   :  { %4442 = vmatpush.bf16.msra.mxu2 %v7531_v55  ;;  %v1076_v48 = vpop.f32.mrf.mxu2  ;;  %v1090_v54 = vadd.f32 %v1089_v49, %v324_v36  ;;  %v7594_v55 = vld [vmem:[#allocation6 + $0xb40] sm:$0xf]  ;;  %4384 = vmatmul.bf16.vlgmr.msrb.gmra.mxu1 %v9509_v46  ;;  %v1065_v2 = vpop.f32.mrf.mxu1  ;;  %v7435_v36 = vor.u32 %v8842_v25, %v7434_v21  ;;  %v8918_v30 = vld [vmem:[#allocation6 + $0xc6c] sm:$0xf0] }
  0xf6   :  { %4455 = vmatpush.bf16.msra.mxu3 %v7659_v59  ;;  %v1077_v53 = vadd.f32 %v1076_v48, %v323_v35  ;;  %v7194_v59 = vld [vmem:[#allocation6 + $0x820] sm:$0xf]  ;;  %v7595_v4 = vor.u32 %v8882_v56, %v7594_v55  ;;  %v8950_v32 = vld [vmem:[#allocation6 + $0xd6c] sm:$0xf0] }
  0xf7   :  { %v1204_v61 = vmax.f32 %v1090_v54, 0.0  ;;  %v7195_v14 = vor.u32 %v8782_v0, %v7194_v59  ;;  %v7786_v45 = vld [vmem:[#allocation6 + $0xcc0] sm:$0xf]  ;;  %v9026_v54 = vld [vmem:[#allocation6 + $0xfcc] sm:$0xf0] }
  0xf8   :  { %4417 = vmatpush.bf16.msra.mxu0 %v7259_v1  ;;  %4430 = vmatpush.bf16.msra.mxu1 %v7387_v6  ;;  %v1203_v60 = vmax.f32 %v1077_v53, 0.0  ;;  %v7322_v1 = vld [vmem:[#allocation6 + $0x920] sm:$0xf]  ;;  %v8814_v6 = vld [vmem:[#allocation6 + $0x92c] sm:$0xf0] }
  0xf9   :  { %4443 = vmatpush.bf16.msra.mxu2 %v7515_v7  ;;  %v7450_v7 = vld [vmem:[#allocation6 + $0xa20] sm:$0xf]  ;;  %v9515_v11 = vpack.c.bf16 %v1204_v61, %v1204_v61  ;;  %v7323_v17 = vor.u32 %v8814_v6, %v7322_v1  ;;  %v8926_v59 = vld [vmem:[#allocation6 + $0xcac] sm:$0xf0]  ;;  %v9519_v61 = vld [vmem:[#allocation4 + $0x8] sm:$0xff] }
  0xfa   :  { %4456 = vmatpush.bf16.msra.mxu3 %v7643_v12  ;;  %v9513_v9 = vpack.c.bf16 %v1203_v60, %v1203_v60  ;;  %v7578_v12 = vld [vmem:[#allocation6 + $0xb20] sm:$0xf]  ;;  %v7451_v18 = vor.u32 %v8846_v8, %v7450_v7  ;;  %v8990_v1 = vld [vmem:[#allocation6 + $0xeac] sm:$0xf0]  ;;  %v325_v7 = vperm.slane %v9519_v61, 0 }
  0xfb   :  { %4410 = vmatmul.bf16.vlgmr.msrb.gmra.mxu3 %v9515_v11  ;;  %v7914_v48 = vld [vmem:[#allocation6 + $0xdc0] sm:$0xf] }
  0xfc   :  { %4418 = vmatpush.bf16.msra.mxu0 %v7243_v20  ;;  %4431 = vmatpush.bf16.msra.mxu1 %v7371_v22  ;;  %v8810_v20 = vld [vmem:[#allocation6 + $0x90c] sm:$0xf0]  ;;  %v7579_v22 = vor.u32 %v8878_v13, %v7578_v12  ;;  %v1091_v24 = vpop.f32.mrf.mxu3  ;;  %v8170_v53 = vld [vmem:[#allocation6 + $0xfc0] sm:$0xf]  ;;  %v7915_v57 = vor.u32 %v8962_v3, %v7914_v48 }
  0xfd   :  { %4444 = vmatpush.bf16.msra.mxu2 %v7499_v23  ;;  %v1078_v23 = vpop.f32.mrf.mxu2  ;;  %v7307_v35 = vor.u32 %v8810_v20, %v7306_v19  ;;  %v7770_v56 = vld [vmem:[#allocation6 + $0xca0] sm:$0xf]  ;;  %v8986_v19 = vld [vmem:[#allocation6 + $0xe8c] sm:$0xf0]  ;;  %v326_v20 = vperm.slane %v9519_v61, 1 }
  0xfe   :  { %4457 = vmatpush.bf16.msra.mxu3 %v7627_v29  ;;  %4397 = vmatmul.bf16.vlgmr.msrb.gmra.mxu2 %v9513_v9  ;;  %v8934_v29 = vld [vmem:[#allocation6 + $0xcec] sm:$0xf0]  ;;  %v7898_v60 = vld [vmem:[#allocation6 + $0xda0] sm:$0xf]  ;;  %v7771_v6 = vor.u32 %v8926_v59, %v7770_v56 }
  0xff   :  { %v8026_v0 = vld [vmem:[#allocation6 + $0xea0] sm:$0xf]  ;;  %v9018_v23 = vld [vmem:[#allocation6 + $0xf8c] sm:$0xf0] }
 0x100   :  { %4419 = vmatpush.bf16.msra.mxu0 %v7227_v39  ;;  %4432 = vmatpush.bf16.msra.mxu1 %v7355_v40  ;;  %v9030_v39 = vld [vmem:[#allocation6 + $0xfec] sm:$0xf0]  ;;  %v7563_v40 = vor.u32 %v8874_v27, %v7562_v26  ;;  %v8154_v2 = vld [vmem:[#allocation6 + $0xfa0] sm:$0xf]  ;;  %v8027_v13 = vor.u32 %v8990_v1, %v8026_v0 }
 0x101   :  { %4445 = vmatpush.bf16.msra.mxu2 %v7483_v42  ;;  %v7803_v42 = vor.u32 %v8934_v29, %v7802_v28  ;;  %v8187_v49 = vor.u32 %v9030_v39, %v8186_v38  ;;  %v7754_v8 = vld [vmem:[#allocation6 + $0xc80] sm:$0xf]  ;;  %v8982_v38 = vld [vmem:[#allocation6 + $0xe6c] sm:$0xf0] }
 0x102   :  { %4458 = vmatpush.bf16.msra.mxu3 %v7611_v47  ;;  %v8930_v47 = vld [vmem:[#allocation6 + $0xccc] sm:$0xf0]  ;;  %v7882_v15 = vld [vmem:[#allocation6 + $0xd80] sm:$0xf] }
 0x103   :  { %v7787_v55 = vor.u32 %v8930_v47, %v7786_v45  ;;  %v7738_v26 = vld [vmem:[#allocation6 + $0xc60] sm:$0xf]  ;;  %v7883_v27 = vor.u32 %v8954_v16, %v7882_v15  ;;  %v8978_v59 = vld [vmem:[#allocation6 + $0xe4c] sm:$0xf0] }
 0x104   :  { %4420 = vmatpush.bf16.msra.mxu0 %v7211_v58  ;;  %4433 = vmatpush.bf16.msra.mxu1 %v7339_v62  ;;  %v8043_v58 = vor.u32 %v8994_v52, %v8042_v50  ;;  %v8171_v62 = vor.u32 %v9026_v54, %v8170_v53  ;;  %v8122_v39 = vld [vmem:[#allocation6 + $0xf60] sm:$0xf]  ;;  %v7739_v47 = vor.u32 %v8918_v30, %v7738_v26  ;;  %v8914_v50 = vld [vmem:[#allocation6 + $0xc4c] sm:$0xf0] }
 0x105   :  { %4446 = vmatpush.bf16.msra.mxu2 %v7467_v63  ;;  %v8958_v63 = vld [vmem:[#allocation6 + $0xdac] sm:$0xf0]  ;;  %v7722_v3 = vld [vmem:[#allocation6 + $0xc40] sm:$0xf] }
 0x106   :  { %4459 = vmatpush.bf16.msra.mxu3 %v7595_v4  ;;  %v9022_v4 = vld [vmem:[#allocation6 + $0xfac] sm:$0xf0]  ;;  %v7899_v12 = vor.u32 %v8958_v63, %v7898_v60  ;;  %v7850_v52 = vld [vmem:[#allocation6 + $0xd40] sm:$0xf] }
 0x107   :  { %v8106_v63 = vld [vmem:[#allocation6 + $0xf40] sm:$0xf]  ;;  %v9010_v0 = vld [vmem:[#allocation6 + $0xf4c] sm:$0xf0] }
 0x108   :  { %4421 = vmatpush.bf16.msra.mxu0 %v7195_v14  ;;  %4434 = vmatpush.bf16.msra.mxu1 %v7323_v17  ;;  %v8922_v14 = vld [vmem:[#allocation6 + $0xc8c] sm:$0xf0]  ;;  %v8155_v17 = vor.u32 %v9022_v4, %v8154_v2  ;;  %v7723_v2 = vor.u32 %v8914_v50, %v7722_v3  ;;  %v7706_v4 = vld [vmem:[#allocation6 + $0xc20] sm:$0xf]  ;;  %v8107_v16 = vor.u32 %v9010_v0, %v8106_v63  ;;  %v8644_v50 = vld [vmem:[#allocation6 + $0x3e4] sm:$0xf] }
 0x109   :  { %4447 = vmatpush.bf16.msra.mxu2 %v7451_v18  ;;  %v8010_v18 = vld [vmem:[#allocation6 + $0xe80] sm:$0xf]  ;;  %v7755_v25 = vor.u32 %v8922_v14, %v7754_v8  ;;  %v8906_v26 = vld [vmem:[#allocation6 + $0xc0c] sm:$0xf0]  ;;  %v6380_v63 = vld [vmem:[#allocation6 + $0x1d0] sm:$0xf0] }
 0x10a   :  { %4460 = vmatpush.bf16.msra.mxu3 %v7579_v22  ;;  %v8138_v22 = vld [vmem:[#allocation6 + $0xf80] sm:$0xf]  ;;  %v8011_v28 = vor.u32 %v8986_v19, %v8010_v18  ;;  %v8974_v19 = vld [vmem:[#allocation6 + $0xe2c] sm:$0xf0]  ;;  %v8608_v0 = vld [vmem:[#allocation6 + $0x2c4] sm:$0xf] }
 0x10b   :  { %v8139_v34 = vor.u32 %v9018_v23, %v8138_v22  ;;  %v7834_v14 = vld [vmem:[#allocation6 + $0xd20] sm:$0xf]  ;;  %v9006_v23 = vld [vmem:[#allocation6 + $0xf2c] sm:$0xf0] }
 0x10c   :  { %4422 = vmatpush.bf16.msra.mxu0 %v7179_v31  ;;  %4435 = vmatpush.bf16.msra.mxu1 %v7307_v35  ;;  %v1102_v21 = vpop.f32.mrf.mxu0  ;;  %v1115_v29 = vpop.f32.mrf.mxu1  ;;  %v7866_v31 = vld [vmem:[#allocation6 + $0xd60] sm:$0xf]  ;;  %v8938_v30 = vld [vmem:[#allocation6 + $0xd0c] sm:$0xf0] }
 0x10d   :  { %4448 = vmatpush.bf16.msra.mxu2 %v7435_v36  ;;  %v1103_v24 = vadd.f32 %v1102_v21, %v325_v7  ;;  %v1116_v35 = vadd.f32 %v1115_v29, %v326_v20  ;;  %v7994_v36 = vld [vmem:[#allocation6 + $0xe60] sm:$0xf]  ;;  %v7867_v48 = vor.u32 %v8950_v32, %v7866_v31 }
 0x10e   :  { %4461 = vmatpush.bf16.msra.mxu3 %v7563_v40  ;;  %v9014_v40 = vld [vmem:[#allocation6 + $0xf6c] sm:$0xf0]  ;;  %v7962_v18 = vld [vmem:[#allocation6 + $0xe20] sm:$0xf] }
 0x10f   :  { %v1205_v33 = vmax.f32 %v1103_v24, 0.0  ;;  %v1206_v45 = vmax.f32 %v1116_v35, 0.0  ;;  %v8123_v54 = vor.u32 %v9014_v40, %v8122_v39  ;;  %v8090_v22 = vld [vmem:[#allocation6 + $0xf20] sm:$0xf]  ;;  %v8970_v35 = vld [vmem:[#allocation6 + $0xe0c] sm:$0xf0] }
 0x110   :  { %4467 = vmatpush.bf16.msrb.mxu0 %v7803_v42  ;;  %4480 = vmatpush.bf16.msrb.mxu1 %v7931_v43  ;;  %v327_v42 = vperm.slane %v9519_v61, 2  ;;  %v328_v43 = vperm.slane %v9519_v61, 3  ;;  %v7818_v29 = vld [vmem:[#allocation6 + $0xd00] sm:$0xf]  ;;  %v8091_v32 = vor.u32 %v9006_v23, %v8090_v22  ;;  %v8548_v39 = vld [vmem:[#allocation6 + $0xe4] sm:$0xf] }
 0x111   :  { %4493 = vmatpush.bf16.msrb.mxu2 %v8059_v44  ;;  %v9525_v44 = vpack.c.bf16 %v1205_v33, %v1205_v33  ;;  %v9527_v53 = vpack.c.bf16 %v1206_v45, %v1206_v45  ;;  %v7946_v31 = vld [vmem:[#allocation6 + $0xe00] sm:$0xf]  ;;  %v6268_v40 = vld [vmem:[#allocation6 + $0xf0] sm:$0xf0] }
 0x112   :  { %4506 = vmatpush.bf16.msrb.mxu3 %v8187_v49  ;;  %v7995_v49 = vor.u32 %v8982_v38, %v7994_v36  ;;  %v8074_v36 = vld [vmem:[#allocation6 + $0xf00] sm:$0xf]  ;;  %v9002_v38 = vld [vmem:[#allocation6 + $0xf0c] sm:$0xf0]  ;;  %v6396_v45 = vld [vmem:[#allocation6 + $0x1f0] sm:$0xf0]  ;;  %v7947_v3 = vor.u32 %v8970_v35, %v7946_v31 }
 0x113   :  { %4423 = vmatmul.bf16.vlgmr.msra.gmra.mxu0 %v9525_v44  ;;  %4436 = vmatmul.bf16.vlgmr.msra.gmra.mxu1 %v9527_v53  ;;  %v6620_v22 = vld [vmem:[#allocation6 + $0x3b0] sm:$0xf0] }
 0x114   :  { %4468 = vmatpush.bf16.msrb.mxu0 %v7787_v55  ;;  %4481 = vmatpush.bf16.msrb.mxu1 %v7915_v57  ;;  %v1141_v56 = vpop.f32.mrf.mxu3  ;;  %v8946_v57 = vld [vmem:[#allocation6 + $0xd4c] sm:$0xf0]  ;;  %v1104_v1 = vpop.f32.mrf.mxu0 }
 0x115   :  { %4494 = vmatpush.bf16.msrb.mxu2 %v8043_v58  ;;  %v1128_v55 = vpop.f32.mrf.mxu2  ;;  %v7978_v58 = vld [vmem:[#allocation6 + $0xe40] sm:$0xf]  ;;  %v7851_v8 = vor.u32 %v8946_v57, %v7850_v52  ;;  %v1117_v15 = vpop.f32.mrf.mxu1  ;;  %v6652_v52 = vld [vmem:[#allocation6 + $0x3f0] sm:$0xf0] }
 0x116   :  { %4507 = vmatpush.bf16.msrb.mxu3 %v8171_v62  ;;  %v1129_v60 = vadd.f32 %v1128_v55, %v327_v42  ;;  %v1142_v62 = vadd.f32 %v1141_v56, %v328_v43  ;;  %v8580_v42 = vld [vmem:[#allocation6 + $0x1e4] sm:$0xf]  ;;  %v6271_v55 = vor.u32 %v8548_v39, %v6268_v40  ;;  %v6508_v1 = vld [vmem:[#allocation6 + $0x2d0] sm:$0xf0] }
 0x117   :  { %v6399_v56 = vor.u32 %v8580_v42, %v6396_v45 }
 0x118   :  { %4469 = vmatpush.bf16.msrb.mxu0 %v7771_v6  ;;  %4482 = vmatpush.bf16.msrb.mxu1 %v7899_v12  ;;  %v1207_v6 = vmax.f32 %v1129_v60, 0.0  ;;  %v1208_v7 = vmax.f32 %v1142_v62, 0.0  ;;  %v7979_v12 = vor.u32 %v8978_v59, %v7978_v58  ;;  %v8544_v58 = vld [vmem:[#allocation6 + $0xc4] sm:$0xf]  ;;  %v6252_v59 = vld [vmem:[#allocation6 + $0xd0] sm:$0xf0]  ;;  %v6655_v62 = vor.u32 %v8644_v50, %v6652_v52 }
 0x119   :  { %4495 = vmatpush.bf16.msrb.mxu2 %v8027_v13  ;;  %v8910_v13 = vld [vmem:[#allocation6 + $0xc2c] sm:$0xf0]  ;;  %v8576_v60 = vld [vmem:[#allocation6 + $0x1c4] sm:$0xf]  ;;  %v6332_v50 = vld [vmem:[#allocation6 + $0x170] sm:$0xf0] }
 0x11a   :  { %4508 = vmatpush.bf16.msrb.mxu3 %v8155_v17  ;;  %v8942_v17 = vld [vmem:[#allocation6 + $0xd2c] sm:$0xf0]  ;;  %v9531_v20 = vpack.c.bf16 %v1207_v6, %v1207_v6  ;;  %v9533_v21 = vpack.c.bf16 %v1208_v7, %v1208_v7  ;;  %v7707_v24 = vor.u32 %v8910_v13, %v7706_v4  ;;  %v6636_v4 = vld [vmem:[#allocation6 + $0x3d0] sm:$0xf0]  ;;  %v6255_v6 = vor.u32 %v8544_v58, %v6252_v59  ;;  %v8628_v58 = vld [vmem:[#allocation6 + $0x364] sm:$0xf] }
 0x11b   :  { %v6383_v7 = vor.u32 %v8576_v60, %v6380_v63  ;;  %v6236_v13 = vld [vmem:[#allocation6 + $0xb0] sm:$0xf0]  ;;  %v331_v60 = vperm.slane %v9519_v61, 6 }
 0x11c   :  { %4470 = vmatpush.bf16.msrb.mxu0 %v7755_v25  ;;  %4483 = vmatpush.bf16.msrb.mxu1 %v7883_v27  ;;  %v7690_v25 = vld [vmem:[#allocation6 + $0xc00] sm:$0xf]  ;;  %v7835_v27 = vor.u32 %v8942_v17, %v7834_v14  ;;  %v8572_v14 = vld [vmem:[#allocation6 + $0x1a4] sm:$0xf]  ;;  %v6588_v59 = vld [vmem:[#allocation6 + $0x370] sm:$0xf0] }
 0x11d   :  { %4496 = vmatpush.bf16.msrb.mxu2 %v8011_v28  ;;  %v7963_v28 = vor.u32 %v8974_v19, %v7962_v18  ;;  %v1130_v33 = vpop.f32.mrf.mxu2  ;;  %4462 = vmatmul.bf16.vlgmr.msra.gmra.mxu3 %v9533_v21  ;;  %v7691_v43 = vor.u32 %v8906_v26, %v7690_v25  ;;  %v8604_v17 = vld [vmem:[#allocation6 + $0x2a4] sm:$0xf]  ;;  %v6492_v18 = vld [vmem:[#allocation6 + $0x2b0] sm:$0xf0] }
 0x11e   :  { %4509 = vmatpush.bf16.msrb.mxu3 %v8139_v34  ;;  %4449 = vmatmul.bf16.vlgmr.msra.gmra.mxu2 %v9531_v20  ;;  %v1143_v34 = vpop.f32.mrf.mxu3  ;;  %v8636_v19 = vld [vmem:[#allocation6 + $0x3a4] sm:$0xf] }
 0x11f   :  { %v8536_v25 = vld [vmem:[#allocation6 + $0x84] sm:$0xf]  ;;  %v6623_v31 = vor.u32 %v8636_v19, %v6620_v22  ;;  %v6476_v34 = vld [vmem:[#allocation6 + $0x290] sm:$0xf0] }
 0x120   :  { %4471 = vmatpush.bf16.msrb.mxu0 %v7739_v47  ;;  %4484 = vmatpush.bf16.msrb.mxu1 %v7867_v48  ;;  %v8612_v47 = vld [vmem:[#allocation6 + $0x2e4] sm:$0xf]  ;;  %v6524_v48 = vld [vmem:[#allocation6 + $0x2f0] sm:$0xf0] }
 0x121   :  { %4497 = vmatpush.bf16.msrb.mxu2 %v7995_v49  ;;  %v7819_v49 = vor.u32 %v8938_v30, %v7818_v29  ;;  %v6527_v57 = vor.u32 %v8612_v47, %v6524_v48  ;;  %v6220_v29 = vld [vmem:[#allocation6 + $0x90] sm:$0xf0]  ;;  %v8568_v30 = vld [vmem:[#allocation6 + $0x184] sm:$0xf] }
 0x122   :  { %4510 = vmatpush.bf16.msrb.mxu3 %v8123_v54  ;;  %v8075_v54 = vor.u32 %v9002_v38, %v8074_v36  ;;  %v8600_v33 = vld [vmem:[#allocation6 + $0x284] sm:$0xf]  ;;  %v6604_v38 = vld [vmem:[#allocation6 + $0x390] sm:$0xf0]  ;;  %v6223_v42 = vor.u32 %v8536_v25, %v6220_v29 }
 0x123   :  { %v8632_v36 = vld [vmem:[#allocation6 + $0x384] sm:$0xf]  ;;  %v6479_v48 = vor.u32 %v8600_v33, %v6476_v34  ;;  %v6572_v19 = vld [vmem:[#allocation6 + $0x350] sm:$0xf0] }
 0x124   :  { %4472 = vmatpush.bf16.msrb.mxu0 %v7723_v2  ;;  %4485 = vmatpush.bf16.msrb.mxu1 %v7851_v8  ;;  %v8640_v2 = vld [vmem:[#allocation6 + $0x3c4] sm:$0xf]  ;;  %v6511_v8 = vor.u32 %v8608_v0, %v6508_v1  ;;  %v332_v0 = vperm.slane %v9519_v61, 7 }
 0x125   :  { %4498 = vmatpush.bf16.msrb.mxu2 %v7979_v12  ;;  %v8540_v12 = vld [vmem:[#allocation6 + $0xa4] sm:$0xf]  ;;  %v6639_v15 = vor.u32 %v8640_v2, %v6636_v4 }
 0x126   :  { %4511 = vmatpush.bf16.msrb.mxu3 %v8107_v16  ;;  %v6364_v16 = vld [vmem:[#allocation6 + $0x1b0] sm:$0xf0]  ;;  %v6239_v23 = vor.u32 %v8540_v12, %v6236_v13  ;;  %v6591_v12 = vor.u32 %v8628_v58, %v6588_v59  ;;  %v8524_v25 = vld [vmem:[#allocation6 + $0x24] sm:$0xf] }
 0x127   :  { %v6367_v26 = vor.u32 %v8572_v14, %v6364_v16  ;;  %v6316_v14 = vld [vmem:[#allocation6 + $0x150] sm:$0xf0] }
 0x128   :  { %4473 = vmatpush.bf16.msrb.mxu0 %v7707_v24  ;;  %4486 = vmatpush.bf16.msrb.mxu1 %v7835_v27  ;;  %v329_v24 = vperm.slane %v9519_v61, 4  ;;  %v6495_v27 = vor.u32 %v8604_v17, %v6492_v18  ;;  %v6444_v16 = vld [vmem:[#allocation6 + $0x250] sm:$0xf0] }
 0x129   :  { %4499 = vmatpush.bf16.msrb.mxu2 %v7963_v28  ;;  %v330_v28 = vperm.slane %v9519_v61, 5  ;;  %v8624_v61 = vld [vmem:[#allocation6 + $0x344] sm:$0xf]  ;;  %v6540_v58 = vld [vmem:[#allocation6 + $0x310] sm:$0xf0] }
 0x12a   :  { %4512 = vmatpush.bf16.msrb.mxu3 %v8091_v32  ;;  %v6348_v32 = vld [vmem:[#allocation6 + $0x190] sm:$0xf0]  ;;  %v6575_v34 = vor.u32 %v8624_v61, %v6572_v19  ;;  %v8672_v61 = vld [vmem:[#allocation6 + $0x4c4] sm:$0xf] }
 0x12b   :  { %v6351_v47 = vor.u32 %v8568_v30, %v6348_v32  ;;  %v6300_v32 = vld [vmem:[#allocation6 + $0x130] sm:$0xf0] }
 0x12c   :  { %4474 = vmatpush.bf16.msrb.mxu0 %v7691_v43  ;;  %4487 = vmatpush.bf16.msrb.mxu1 %v7819_v49  ;;  %v1154_v35 = vpop.f32.mrf.mxu0  ;;  %v1167_v40 = vpop.f32.mrf.mxu1  ;;  %v8532_v43 = vld [vmem:[#allocation6 + $0x64] sm:$0xf]  ;;  %v6204_v49 = vld [vmem:[#allocation6 + $0x70] sm:$0xf0] }
 0x12d   :  { %4500 = vmatpush.bf16.msrb.mxu2 %v7947_v3  ;;  %v1155_v39 = vadd.f32 %v1154_v35, %v329_v24  ;;  %v1168_v45 = vadd.f32 %v1167_v40, %v330_v28  ;;  %v8564_v3 = vld [vmem:[#allocation6 + $0x164] sm:$0xf]  ;;  %v6207_v63 = vor.u32 %v8532_v43, %v6204_v49  ;;  %v6556_v40 = vld [vmem:[#allocation6 + $0x330] sm:$0xf0] }
 0x12e   :  { %4513 = vmatpush.bf16.msrb.mxu3 %v8075_v54  ;;  %v6607_v54 = vor.u32 %v8632_v36, %v6604_v38  ;;  %v6335_v2 = vor.u32 %v8564_v3, %v6332_v50  ;;  %v8588_v35 = vld [vmem:[#allocation6 + $0x224] sm:$0xf]  ;;  %v6428_v36 = vld [vmem:[#allocation6 + $0x230] sm:$0xf0] }
 0x12f   :  { %v1209_v52 = vmax.f32 %v1155_v39, 0.0  ;;  %v8620_v39 = vld [vmem:[#allocation6 + $0x324] sm:$0xf]  ;;  %v6431_v49 = vor.u32 %v8588_v35, %v6428_v36  ;;  %v6284_v50 = vld [vmem:[#allocation6 + $0x110] sm:$0xf0] }
 0x130   :  { %4519 = vmatpush.bf16.msra.mxu0 %v6271_v55  ;;  %4532 = vmatpush.bf16.msra.mxu1 %v6399_v56  ;;  %v8596_v55 = vld [vmem:[#allocation6 + $0x264] sm:$0xf]  ;;  %v6460_v56 = vld [vmem:[#allocation6 + $0x270] sm:$0xf0] }
 0x131   :  { %4545 = vmatpush.bf16.msra.mxu2 %v6527_v57  ;;  %v1210_v57 = vmax.f32 %v1168_v45, 0.0  ;;  %v6463_v4 = vor.u32 %v8596_v55, %v6460_v56  ;;  %v8520_v45 = vld [vmem:[#allocation6 + $0x4] sm:$0xf]  ;;  %v6412_v56 = vld [vmem:[#allocation6 + $0x210] sm:$0xf0] }
 0x132   :  { %4558 = vmatpush.bf16.msra.mxu3 %v6655_v62  ;;  %v9540_v62 = vpack.c.bf16 %v1209_v52, %v1209_v52  ;;  %v8552_v3 = vld [vmem:[#allocation6 + $0x104] sm:$0xf]  ;;  %v6764_v19 = vld [vmem:[#allocation6 + $0x4d0] sm:$0xf0] }
 0x133   :  { %v9543_v1 = vpack.c.bf16 %v1210_v57, %v1210_v57  ;;  %v8584_v52 = vld [vmem:[#allocation6 + $0x204] sm:$0xf]  ;;  %v6876_v36 = vld [vmem:[#allocation6 + $0x5b0] sm:$0xf0] }
 0x134   :  { %4520 = vmatpush.bf16.msra.mxu0 %v6255_v6  ;;  %4533 = vmatpush.bf16.msra.mxu1 %v6383_v7  ;;  %v8528_v6 = vld [vmem:[#allocation6 + $0x44] sm:$0xf]  ;;  %v6188_v7 = vld [vmem:[#allocation6 + $0x50] sm:$0xf0]  ;;  %v1193_v18 = vpop.f32.mrf.mxu3  ;;  %v1156_v22 = vpop.f32.mrf.mxu0 }
 0x135   :  { %4546 = vmatpush.bf16.msra.mxu2 %v6511_v8  ;;  %v8560_v8 = vld [vmem:[#allocation6 + $0x144] sm:$0xf]  ;;  %v1180_v13 = vpop.f32.mrf.mxu2  ;;  %4475 = vmatmul.bf16.vlgmr.msrb.gmra.mxu0 %v9540_v62  ;;  %v6191_v24 = vor.u32 %v8528_v6, %v6188_v7  ;;  %v7036_v7 = vld [vmem:[#allocation6 + $0x6f0] sm:$0xf0] }
 0x136   :  { %4559 = vmatpush.bf16.msra.mxu3 %v6639_v15  ;;  %v8592_v15 = vld [vmem:[#allocation6 + $0x244] sm:$0xf]  ;;  %v1181_v17 = vadd.f32 %v1180_v13, %v331_v60  ;;  %4488 = vmatmul.bf16.vlgmr.msrb.gmra.mxu1 %v9543_v1  ;;  %v6319_v29 = vor.u32 %v8560_v8, %v6316_v14  ;;  %v6287_v8 = vor.u32 %v8552_v3, %v6284_v50  ;;  %v7164_v14 = vld [vmem:[#allocation6 + $0x7f0] sm:$0xf0] }
 0x137   :  { %v6447_v30 = vor.u32 %v8592_v15, %v6444_v16  ;;  %v8616_v57 = vld [vmem:[#allocation6 + $0x304] sm:$0xf]  ;;  %v6732_v50 = vld [vmem:[#allocation6 + $0x490] sm:$0xf0] }
 0x138   :  { %4521 = vmatpush.bf16.msra.mxu0 %v6239_v23  ;;  %4534 = vmatpush.bf16.msra.mxu1 %v6367_v26  ;;  %v1194_v23 = vadd.f32 %v1193_v18, %v332_v0  ;;  %v6172_v26 = vld [vmem:[#allocation6 + $0x30] sm:$0xf0]  ;;  %v1211_v28 = vmax.f32 %v1181_v17, 0.0  ;;  %v8676_v60 = vld [vmem:[#allocation6 + $0x4e4] sm:$0xf]  ;;  %v6543_v15 = vor.u32 %v8616_v57, %v6540_v58 }
 0x139   :  { %4547 = vmatpush.bf16.msra.mxu2 %v6495_v27  ;;  %v1169_v27 = vpop.f32.mrf.mxu1  ;;  %v6175_v43 = vor.u32 %v8524_v25, %v6172_v26  ;;  %v8708_v0 = vld [vmem:[#allocation6 + $0x5e4] sm:$0xf]  ;;  %v7020_v26 = vld [vmem:[#allocation6 + $0x6d0] sm:$0xf0] }
 0x13a   :  { %4560 = vmatpush.bf16.msra.mxu3 %v6623_v31  ;;  %v8556_v31 = vld [vmem:[#allocation6 + $0x124] sm:$0xf]  ;;  %v1212_v33 = vmax.f32 %v1194_v23, 0.0  ;;  %v9547_v38 = vpack.c.bf16 %v1211_v28, %v1211_v28  ;;  %v7148_v28 = vld [vmem:[#allocation6 + $0x7d0] sm:$0xf0] }
 0x13b   :  { %v8740_v6 = vld [vmem:[#allocation6 + $0x6e4] sm:$0xf]  ;;  %v6988_v57 = vld [vmem:[#allocation6 + $0x690] sm:$0xf0] }
 0x13c   :  { %4522 = vmatpush.bf16.msra.mxu0 %v6223_v42  ;;  %4535 = vmatpush.bf16.msra.mxu1 %v6351_v47  ;;  %v9549_v42 = vpack.c.bf16 %v1212_v33, %v1212_v33  ;;  %v6156_v47 = vld [vmem:[#allocation6 + $0x10] sm:$0xf0]  ;;  %v1195_v59 = vpop.f32.mrf.mxu3  ;;  %v8772_v13 = vld [vmem:[#allocation6 + $0x7e4] sm:$0xf]  ;;  %v7039_v18 = vor.u32 %v8740_v6, %v7036_v7 }
 0x13d   :  { %4548 = vmatpush.bf16.msra.mxu2 %v6479_v48  ;;  %v6303_v48 = vor.u32 %v8556_v31, %v6300_v32  ;;  %v1182_v55 = vpop.f32.mrf.mxu2  ;;  %v8704_v22 = vld [vmem:[#allocation6 + $0x5c4] sm:$0xf]  ;;  %v7167_v23 = vor.u32 %v8772_v13, %v7164_v14  ;;  %v6748_v33 = vld [vmem:[#allocation6 + $0x4b0] sm:$0xf0] }
 0x13e   :  { %4561 = vmatpush.bf16.msra.mxu3 %v6607_v54  ;;  %4501 = vmatmul.bf16.vlgmr.msrb.gmra.mxu2 %v9547_v38  ;;  %v6559_v54 = vor.u32 %v8620_v39, %v6556_v40  ;;  %v8736_v25 = vld [vmem:[#allocation6 + $0x6c4] sm:$0xf]  ;;  %v7004_v40 = vld [vmem:[#allocation6 + $0x6b0] sm:$0xf0] }
 0x13f   :  { %4514 = vmatmul.bf16.vlgmr.msrb.gmra.mxu3 %v9549_v42  ;;  %v8768_v27 = vld [vmem:[#allocation6 + $0x7c4] sm:$0xf]  ;;  %v7023_v31 = vor.u32 %v8736_v25, %v7020_v26  ;;  %v6860_v55 = vld [vmem:[#allocation6 + $0x590] sm:$0xf0] }
 0x140   :  { %4523 = vmatpush.bf16.msra.mxu0 %v6207_v63  ;;  %4536 = vmatpush.bf16.msra.mxu1 %v6335_v2  ;;  %v6780_v63 = vld [vmem:[#allocation6 + $0x4f0] sm:$0xf0]  ;;  %v6159_v2 = vor.u32 %v8520_v45, %v6156_v47  ;;  %v8668_v32 = vld [vmem:[#allocation6 + $0x4a4] sm:$0xf]  ;;  %v7151_v35 = vor.u32 %v8768_v27, %v7148_v28  ;;  %v1741_v27 = vld [vmem:[#allocation7] sm:$0xf] }
 0x141   :  { %4549 = vmatpush.bf16.msra.mxu2 %v6463_v4  ;;  %v6908_v4 = vld [vmem:[#allocation6 + $0x5f0] sm:$0xf0]  ;;  %v6783_v16 = vor.u32 %v8676_v60, %v6780_v63  ;;  %v8732_v39 = vld [vmem:[#allocation6 + $0x6a4] sm:$0xf]  ;;  %v6751_v47 = vor.u32 %v8668_v32, %v6748_v33 }
 0x142   :  { %4562 = vmatpush.bf16.msra.mxu3 %v6591_v12  ;;  %v6415_v12 = vor.u32 %v8584_v52, %v6412_v56  ;;  %v6911_v17 = vor.u32 %v8708_v0, %v6908_v4  ;;  %v7132_v45 = vld [vmem:[#allocation6 + $0x7b0] sm:$0xf0]  ;;  %v8664_v3 = vld [vmem:[#allocation6 + $0x484] sm:$0xf] }
 0x143   :  { %v8696_v52 = vld [vmem:[#allocation6 + $0x584] sm:$0xf]  ;;  %v7116_v59 = vld [vmem:[#allocation6 + $0x790] sm:$0xf0]  ;;  %v6735_v60 = vor.u32 %v8664_v3, %v6732_v50 }
 0x144   :  { %4524 = vmatpush.bf16.msra.mxu0 %v6191_v24  ;;  %4537 = vmatpush.bf16.msra.mxu1 %v6319_v29  ;;  %v6892_v24 = vld [vmem:[#allocation6 + $0x5d0] sm:$0xf0]  ;;  %v6767_v29 = vor.u32 %v8672_v61, %v6764_v19  ;;  %v8728_v56 = vld [vmem:[#allocation6 + $0x684] sm:$0xf]  ;;  %v6863_v63 = vor.u32 %v8696_v52, %v6860_v55 }
 0x145   :  { %4550 = vmatpush.bf16.msra.mxu2 %v6447_v30  ;;  %v6895_v30 = vor.u32 %v8704_v22, %v6892_v24  ;;  %v8760_v58 = vld [vmem:[#allocation6 + $0x784] sm:$0xf]  ;;  %v6991_v0 = vor.u32 %v8728_v56, %v6988_v57  ;;  %v6716_v4 = vld [vmem:[#allocation6 + $0x470] sm:$0xf0] }
 0x146   :  { %4563 = vmatpush.bf16.msra.mxu3 %v6575_v34  ;;  %v8700_v34 = vld [vmem:[#allocation6 + $0x5a4] sm:$0xf]  ;;  %v7119_v7 = vor.u32 %v8760_v58, %v7116_v59  ;;  %v6972_v13 = vld [vmem:[#allocation6 + $0x670] sm:$0xf0] }
 0x147   :  { %v8692_v6 = vld [vmem:[#allocation6 + $0x564] sm:$0xf]  ;;  %v6700_v19 = vld [vmem:[#allocation6 + $0x450] sm:$0xf0] }
 0x148   :  { %4525 = vmatpush.bf16.msra.mxu0 %v6175_v43  ;;  %4538 = vmatpush.bf16.msra.mxu1 %v6303_v48  ;;  %v8764_v43 = vld [vmem:[#allocation6 + $0x7a4] sm:$0xf]  ;;  %v6879_v48 = vor.u32 %v8700_v34, %v6876_v36  ;;  %v6956_v26 = vld [vmem:[#allocation6 + $0x650] sm:$0xf0]  ;;  %v1743_v36 = vperm.slane %v1741_v27, 0 }
 0x149   :  { %4551 = vmatpush.bf16.msra.mxu2 %v6431_v49  ;;  %v7007_v49 = vor.u32 %v8732_v39, %v7004_v40  ;;  %v8756_v14 = vld [vmem:[#allocation6 + $0x764] sm:$0xf]  ;;  %v6684_v34 = vld [vmem:[#allocation6 + $0x430] sm:$0xf0] }
 0x14a   :  { %4564 = vmatpush.bf16.msra.mxu3 %v6559_v54  ;;  %v7135_v54 = vor.u32 %v8764_v43, %v7132_v45  ;;  %v8688_v22 = vld [vmem:[#allocation6 + $0x544] sm:$0xf]  ;;  %v6812_v40 = vld [vmem:[#allocation6 + $0x530] sm:$0xf0] }
 0x14b   :  { %v8720_v25 = vld [vmem:[#allocation6 + $0x644] sm:$0xf]  ;;  %v6940_v45 = vld [vmem:[#allocation6 + $0x630] sm:$0xf0] }
 0x14c   :  { %4526 = vmatpush.bf16.msra.mxu0 %v6159_v2  ;;  %4539 = vmatpush.bf16.msra.mxu1 %v6287_v8  ;;  %v8660_v2 = vld [vmem:[#allocation6 + $0x464] sm:$0xf]  ;;  %v6844_v8 = vld [vmem:[#allocation6 + $0x570] sm:$0xf0]  ;;  %v6959_v33 = vor.u32 %v8720_v25, %v6956_v26 }
 0x14d   :  { %4552 = vmatpush.bf16.msra.mxu2 %v6415_v12  ;;  %v8724_v12 = vld [vmem:[#allocation6 + $0x664] sm:$0xf]  ;;  %v6668_v50 = vld [vmem:[#allocation6 + $0x410] sm:$0xf0] }
 0x14e   :  { %4565 = vmatpush.bf16.msra.mxu3 %v6543_v15  ;;  %v7100_v15 = vld [vmem:[#allocation6 + $0x770] sm:$0xf0]  ;;  %v6975_v61 = vor.u32 %v8724_v12, %v6972_v13  ;;  %v8752_v28 = vld [vmem:[#allocation6 + $0x744] sm:$0xf] }
 0x14f   :  { %4527 = vmatmul.bf16.vlgmr.msra.gmra.mxu0 %v9491_v41  ;;  %4540 = vmatmul.bf16.vlgmr.msra.gmra.mxu1 %v9493_v51  ;;  %v7103_v24 = vor.u32 %v8756_v14, %v7100_v15  ;;  %v8716_v43 = vld [vmem:[#allocation6 + $0x624] sm:$0xf]  ;;  %v6796_v57 = vld [vmem:[#allocation6 + $0x510] sm:$0xf0] }
 0x150   :  { %4571 = vmatpush.bf16.msrb.mxu0 %v6783_v16  ;;  %4584 = vmatpush.bf16.msrb.mxu1 %v6911_v17  ;;  %v6719_v16 = vor.u32 %v8660_v2, %v6716_v4  ;;  %v8656_v17 = vld [vmem:[#allocation6 + $0x444] sm:$0xf]  ;;  %v4320_v52 = vpop.f32.mrf.mxu0  ;;  %v6943_v55 = vor.u32 %v8716_v43, %v6940_v45  ;;  %v7052_v4 = vld [vmem:[#allocation6 + $0x710] sm:$0xf0] }
 0x151   :  { %4597 = vmatpush.bf16.msrb.mxu2 %v7039_v18  ;;  %4566 = vmatmul.bf16.vlgmr.msra.gmra.mxu3 %v9499_v10  ;;  %v6847_v18 = vor.u32 %v8692_v6, %v6844_v8  ;;  %v8648_v3 = vld [vmem:[#allocation6 + $0x404] sm:$0xf]  ;;  %v4321_v59 = vadd.f32 %v4320_v52, %v1743_v36  ;;  %v7420_v14 = vld [vmem:[#allocation6 + $0x9f0] sm:$0xf0] }
 0x152   :  { %4610 = vmatpush.bf16.msrb.mxu3 %v7167_v23  ;;  %4553 = vmatmul.bf16.vlgmr.msra.gmra.mxu2 %v9497_v5  ;;  %v6828_v23 = vld [vmem:[#allocation6 + $0x550] sm:$0xf0]  ;;  %v8680_v56 = vld [vmem:[#allocation6 + $0x504] sm:$0xf]  ;;  %v6671_v13 = vor.u32 %v8648_v3, %v6668_v50 }
 0x153   :  { %v6831_v32 = vor.u32 %v8688_v22, %v6828_v23  ;;  %v8712_v58 = vld [vmem:[#allocation6 + $0x604] sm:$0xf]  ;;  %v7276_v27 = vld [vmem:[#allocation6 + $0x8d0] sm:$0xf0] }
 0x154   :  { %4572 = vmatpush.bf16.msrb.mxu0 %v6767_v29  ;;  %4585 = vmatpush.bf16.msrb.mxu1 %v6895_v30  ;;  %v7084_v29 = vld [vmem:[#allocation6 + $0x750] sm:$0xf0]  ;;  %v6703_v30 = vor.u32 %v8656_v17, %v6700_v19  ;;  %v8744_v2 = vld [vmem:[#allocation6 + $0x704] sm:$0xf]  ;;  %v6799_v17 = vor.u32 %v8680_v56, %v6796_v57 }
 0x155   :  { %4598 = vmatpush.bf16.msrb.mxu2 %v7023_v31  ;;  %v8652_v31 = vld [vmem:[#allocation6 + $0x424] sm:$0xf]  ;;  %v7087_v39 = vor.u32 %v8752_v28, %v7084_v29  ;;  %v7676_v19 = vld [vmem:[#allocation6 + $0xbf0] sm:$0xf0]  ;;  %v7055_v22 = vor.u32 %v8744_v2, %v7052_v4 }
 0x156   :  { %4611 = vmatpush.bf16.msrb.mxu3 %v7151_v35  ;;  %v8684_v35 = vld [vmem:[#allocation6 + $0x524] sm:$0xf]  ;;  %v7388_v50 = vld [vmem:[#allocation6 + $0x9b0] sm:$0xf0] }
 0x157   :  { %v8804_v6 = vld [vmem:[#allocation6 + $0x8e4] sm:$0xf]  ;;  %v7644_v57 = vld [vmem:[#allocation6 + $0xbb0] sm:$0xf0] }
 0x158   :  { %4573 = vmatpush.bf16.msrb.mxu0 %v6751_v47  ;;  %4586 = vmatpush.bf16.msrb.mxu1 %v6879_v48  ;;  %v8748_v47 = vld [vmem:[#allocation6 + $0x724] sm:$0xf]  ;;  %v7068_v48 = vld [vmem:[#allocation6 + $0x730] sm:$0xf0] }
 0x159   :  { %4599 = vmatpush.bf16.msrb.mxu2 %v7007_v49  ;;  %v6687_v49 = vor.u32 %v8652_v31, %v6684_v34  ;;  %v8836_v8 = vld [vmem:[#allocation6 + $0x9e4] sm:$0xf]  ;;  %v7244_v4 = vld [vmem:[#allocation6 + $0x890] sm:$0xf0] }
 0x15a   :  { %4612 = vmatpush.bf16.msrb.mxu3 %v7135_v54  ;;  %v6815_v54 = vor.u32 %v8684_v35, %v6812_v40  ;;  %v8868_v15 = vld [vmem:[#allocation6 + $0xae4] sm:$0xf]  ;;  %v7660_v35 = vld [vmem:[#allocation6 + $0xbd0] sm:$0xf0] }
 0x15b   :  { %v8800_v26 = vld [vmem:[#allocation6 + $0x8c4] sm:$0xf] }
 0x15c   :  { %4574 = vmatpush.bf16.msrb.mxu0 %v6735_v60  ;;  %4587 = vmatpush.bf16.msrb.mxu1 %v6863_v63  ;;  %v4333_v60 = vpop.f32.mrf.mxu1  ;;  %v7071_v63 = vor.u32 %v8748_v47, %v7068_v48  ;;  %v8832_v28 = vld [vmem:[#allocation6 + $0x9c4] sm:$0xf]  ;;  %v7260_v47 = vld [vmem:[#allocation6 + $0x8b0] sm:$0xf0] }
 0x15d   :  { %4600 = vmatpush.bf16.msrb.mxu2 %v6991_v0  ;;  %v6924_v0 = vld [vmem:[#allocation6 + $0x610] sm:$0xf0]  ;;  %v4334_v12 = vadd.f32 %v4333_v60, %v4321_v59  ;;  %v8864_v31 = vld [vmem:[#allocation6 + $0xac4] sm:$0xf] }
 0x15e   :  { %4613 = vmatpush.bf16.msrb.mxu3 %v7119_v7  ;;  %v7292_v7 = vld [vmem:[#allocation6 + $0x8f0] sm:$0xf0]  ;;  %v8896_v34 = vld [vmem:[#allocation6 + $0xbc4] sm:$0xf]  ;;  %v4359_v59 = vpop.f32.mrf.mxu3 }
 0x15f   :  { %v7295_v23 = vor.u32 %v8804_v6, %v7292_v7  ;;  %v8796_v45 = vld [vmem:[#allocation6 + $0x8a4] sm:$0xf]  ;;  %v7663_v3 = vor.u32 %v8896_v34, %v7660_v35  ;;  %v7212_v35 = vld [vmem:[#allocation6 + $0x850] sm:$0xf0] }
 0x160   :  { %4575 = vmatpush.bf16.msrb.mxu0 %v6719_v16  ;;  %4588 = vmatpush.bf16.msrb.mxu1 %v6847_v18  ;;  %v7548_v16 = vld [vmem:[#allocation6 + $0xaf0] sm:$0xf0]  ;;  %v6927_v18 = vor.u32 %v8712_v58, %v6924_v0  ;;  %v8828_v48 = vld [vmem:[#allocation6 + $0x9a4] sm:$0xf]  ;;  %v7263_v58 = vor.u32 %v8796_v45, %v7260_v47 }
 0x161   :  { %4601 = vmatpush.bf16.msrb.mxu2 %v6975_v61  ;;  %v8900_v61 = vld [vmem:[#allocation6 + $0xbe4] sm:$0xf]  ;;  %v7551_v25 = vor.u32 %v8868_v15, %v7548_v16  ;;  %v7391_v60 = vor.u32 %v8828_v48, %v7388_v50  ;;  %v7628_v15 = vld [vmem:[#allocation6 + $0xb90] sm:$0xf0] }
 0x162   :  { %4614 = vmatpush.bf16.msrb.mxu3 %v7103_v24  ;;  %v7423_v24 = vor.u32 %v8836_v8, %v7420_v14  ;;  %v7679_v29 = vor.u32 %v8900_v61, %v7676_v19  ;;  %v8860_v52 = vld [vmem:[#allocation6 + $0xaa4] sm:$0xf]  ;;  %v7372_v8 = vld [vmem:[#allocation6 + $0x990] sm:$0xf0] }
 0x163   :  { %v8892_v56 = vld [vmem:[#allocation6 + $0xba4] sm:$0xf]  ;;  %v7228_v19 = vld [vmem:[#allocation6 + $0x870] sm:$0xf0] }
 0x164   :  { %4576 = vmatpush.bf16.msrb.mxu0 %v6703_v30  ;;  %4589 = vmatpush.bf16.msrb.mxu1 %v6831_v32  ;;  %v7404_v30 = vld [vmem:[#allocation6 + $0x9d0] sm:$0xf0]  ;;  %v4335_v36 = vpop.f32.mrf.mxu1  ;;  %v8792_v2 = vld [vmem:[#allocation6 + $0x884] sm:$0xf]  ;;  %v7647_v7 = vor.u32 %v8892_v56, %v7644_v57 }
 0x165   :  { %4602 = vmatpush.bf16.msrb.mxu2 %v6959_v33  ;;  %v7532_v32 = vld [vmem:[#allocation6 + $0xad0] sm:$0xf0]  ;;  %v4322_v33 = vpop.f32.mrf.mxu0  ;;  %v7407_v40 = vor.u32 %v8832_v28, %v7404_v30  ;;  %v8824_v6 = vld [vmem:[#allocation6 + $0x984] sm:$0xf]  ;;  %v7247_v16 = vor.u32 %v8792_v2, %v7244_v4 }
 0x166   :  { %4615 = vmatpush.bf16.msrb.mxu3 %v7087_v39  ;;  %v7279_v39 = vor.u32 %v8800_v26, %v7276_v27  ;;  %v7535_v43 = vor.u32 %v8864_v31, %v7532_v32  ;;  %v8888_v14 = vld [vmem:[#allocation6 + $0xb84] sm:$0xf]  ;;  %v7484_v27 = vld [vmem:[#allocation6 + $0xa70] sm:$0xf0]  ;;  %v4361_v31 = vpop.f32.mrf.mxu3 }
 0x167   :  { %v8788_v61 = vld [vmem:[#allocation6 + $0x864] sm:$0xf]  ;;  %v7468_v45 = vld [vmem:[#allocation6 + $0xa50] sm:$0xf0] }
 0x168   :  { %4577 = vmatpush.bf16.msrb.mxu0 %v6687_v49  ;;  %4590 = vmatpush.bf16.msrb.mxu1 %v6815_v54  ;;  %v4346_v49 = vpop.f32.mrf.mxu2  ;;  %v7516_v54 = vld [vmem:[#allocation6 + $0xab0] sm:$0xf0]  ;;  %v8852_v26 = vld [vmem:[#allocation6 + $0xa64] sm:$0xf]  ;;  %v7231_v30 = vor.u32 %v8788_v61, %v7228_v19 }
 0x169   :  { %4603 = vmatpush.bf16.msrb.mxu2 %v6943_v55  ;;  %v4347_v55 = vadd.f32 %v4346_v49, %v4334_v12  ;;  %v8856_v12 = vld [vmem:[#allocation6 + $0xa84] sm:$0xf]  ;;  %v7487_v33 = vor.u32 %v8852_v26, %v7484_v27  ;;  %v7596_v48 = vld [vmem:[#allocation6 + $0xb50] sm:$0xf0] }
 0x16a   :  { %4616 = vmatpush.bf16.msrb.mxu3 %v7071_v63  ;;  %v7519_v63 = vor.u32 %v8860_v52, %v7516_v54  ;;  %v8884_v28 = vld [vmem:[#allocation6 + $0xb64] sm:$0xf]  ;;  %v7196_v54 = vld [vmem:[#allocation6 + $0x830] sm:$0xf0] }
 0x16b   :  { %v9561_v0 = vadd.f32 %v4359_v59, %v4347_v55  ;;  %v8784_v34 = vld [vmem:[#allocation6 + $0x844] sm:$0xf]  ;;  %v7324_v57 = vld [vmem:[#allocation6 + $0x930] sm:$0xf0] }
 0x16c   :  { %4578 = vmatpush.bf16.msrb.mxu0 %v6671_v13  ;;  %4591 = vmatpush.bf16.msrb.mxu1 %v6799_v17  ;;  %v7500_v13 = vld [vmem:[#allocation6 + $0xa90] sm:$0xf0]  ;;  %v7375_v17 = vor.u32 %v8824_v6, %v7372_v8  ;;  %v8816_v36 = vld [vmem:[#allocation6 + $0x944] sm:$0xf]  ;;  %v7215_v49 = vor.u32 %v8784_v34, %v7212_v35 }
 0x16d   :  { %4604 = vmatpush.bf16.msrb.mxu2 %v6927_v18  ;;  %v7503_v18 = vor.u32 %v8856_v12, %v7500_v13  ;;  %v8880_v47 = vld [vmem:[#allocation6 + $0xb44] sm:$0xf]  ;;  %v7452_v59 = vld [vmem:[#allocation6 + $0xa30] sm:$0xf0] }
 0x16e   :  { %4617 = vmatpush.bf16.msrb.mxu3 %v7055_v22  ;;  %v8820_v22 = vld [vmem:[#allocation6 + $0x964] sm:$0xf]  ;;  %v7599_v56 = vor.u32 %v8880_v47, %v7596_v48  ;;  %v7180_v8 = vld [vmem:[#allocation6 + $0x810] sm:$0xf0] }
 0x16f   :  { %4579 = vmatmul.bf16.vlgmr.msrb.gmra.mxu0 %v9507_v37  ;;  %4592 = vmatmul.bf16.vlgmr.msrb.gmra.mxu1 %v9509_v46  ;;  %v8780_v52 = vld [vmem:[#allocation6 + $0x824] sm:$0xf]  ;;  %v7436_v61 = vld [vmem:[#allocation6 + $0xa10] sm:$0xf0] }
 0x170   :  { %4623 = vmatpush.bf16.msra.mxu0 %v7295_v23  ;;  %4636 = vmatpush.bf16.msra.mxu1 %v7423_v24  ;;  %v4348_v23 = vpop.f32.mrf.mxu2  ;;  %v7631_v24 = vor.u32 %v8888_v14, %v7628_v15  ;;  %v8812_v55 = vld [vmem:[#allocation6 + $0x924] sm:$0xf]  ;;  %v4372_v2 = vpop.f32.mrf.mxu0  ;;  %v7199_v4 = vor.u32 %v8780_v52, %v7196_v54  ;;  %v7308_v15 = vld [vmem:[#allocation6 + $0x910] sm:$0xf0] }
 0x171   :  { %4649 = vmatpush.bf16.msra.mxu2 %v7551_v25  ;;  %4618 = vmatmul.bf16.vlgmr.msrb.gmra.mxu3 %v9515_v11  ;;  %v7356_v25 = vld [vmem:[#allocation6 + $0x970] sm:$0xf0]  ;;  %v4373_v6 = vadd.f32 %v4372_v2, %v9561_v0  ;;  %v7327_v12 = vor.u32 %v8812_v55, %v7324_v57  ;;  %v8808_v14 = vld [vmem:[#allocation6 + $0x904] sm:$0xf] }
 0x172   :  { %4662 = vmatpush.bf16.msra.mxu3 %v7679_v29  ;;  %4605 = vmatmul.bf16.vlgmr.msrb.gmra.mxu2 %v9513_v9  ;;  %v7612_v29 = vld [vmem:[#allocation6 + $0xb70] sm:$0xf0]  ;;  %v7359_v32 = vor.u32 %v8820_v22, %v7356_v25  ;;  %v8872_v19 = vld [vmem:[#allocation6 + $0xb04] sm:$0xf] }
 0x173   :  { %v7564_v22 = vld [vmem:[#allocation6 + $0xb10] sm:$0xf0]  ;;  %v8964_v26 = vld [vmem:[#allocation6 + $0xde4] sm:$0xf] }
 0x174   :  { %4624 = vmatpush.bf16.msra.mxu0 %v7279_v39  ;;  %4637 = vmatpush.bf16.msra.mxu1 %v7407_v40  ;;  %v7615_v39 = vor.u32 %v8884_v28, %v7612_v29  ;;  %v7340_v40 = vld [vmem:[#allocation6 + $0x950] sm:$0xf0]  ;;  %v8996_v28 = vld [vmem:[#allocation6 + $0xee4] sm:$0xf]  ;;  %v7567_v34 = vor.u32 %v8872_v19, %v7564_v22 }
 0x175   :  { %4650 = vmatpush.bf16.msra.mxu2 %v7535_v43  ;;  %v8848_v43 = vld [vmem:[#allocation6 + $0xa44] sm:$0xf]  ;;  %v7804_v25 = vld [vmem:[#allocation6 + $0xcf0] sm:$0xf0] }
 0x176   :  { %4663 = vmatpush.bf16.msra.mxu3 %v7663_v3  ;;  %v7343_v3 = vor.u32 %v8816_v36, %v7340_v40  ;;  %v7471_v50 = vor.u32 %v8848_v43, %v7468_v45  ;;  %v7932_v27 = vld [vmem:[#allocation6 + $0xdf0] sm:$0xf0]  ;;  %v8928_v40 = vld [vmem:[#allocation6 + $0xcc4] sm:$0xf] }
 0x177   :  { %v8060_v29 = vld [vmem:[#allocation6 + $0xef0] sm:$0xf0]  ;;  %v7935_v36 = vor.u32 %v8964_v26, %v7932_v27  ;;  %v8960_v45 = vld [vmem:[#allocation6 + $0xdc4] sm:$0xf] }
 0x178   :  { %4625 = vmatpush.bf16.msra.mxu0 %v7263_v58  ;;  %4638 = vmatpush.bf16.msra.mxu1 %v7391_v60  ;;  %v8844_v58 = vld [vmem:[#allocation6 + $0xa24] sm:$0xf]  ;;  %v7788_v43 = vld [vmem:[#allocation6 + $0xcd0] sm:$0xf0]  ;;  %v4374_v47 = vpop.f32.mrf.mxu0 }
 0x179   :  { %4651 = vmatpush.bf16.msra.mxu2 %v7519_v63  ;;  %v8876_v60 = vld [vmem:[#allocation6 + $0xb24] sm:$0xf]  ;;  %v7580_v63 = vld [vmem:[#allocation6 + $0xb30] sm:$0xf0]  ;;  %v7455_v13 = vor.u32 %v8844_v58, %v7452_v59 }
 0x17a   :  { %4664 = vmatpush.bf16.msra.mxu3 %v7647_v7  ;;  %v8776_v7 = vld [vmem:[#allocation6 + $0x804] sm:$0xf]  ;;  %v8172_v54 = vld [vmem:[#allocation6 + $0xfd0] sm:$0xf0] }
 0x17b   :  { %v7183_v0 = vor.u32 %v8776_v7, %v7180_v8  ;;  %v9024_v52 = vld [vmem:[#allocation6 + $0xfc4] sm:$0xf]  ;;  %v8028_v7 = vld [vmem:[#allocation6 + $0xeb0] sm:$0xf0] }
 0x17c   :  { %4626 = vmatpush.bf16.msra.mxu0 %v7247_v16  ;;  %4639 = vmatpush.bf16.msra.mxu1 %v7375_v17  ;;  %v8840_v16 = vld [vmem:[#allocation6 + $0xa04] sm:$0xf]  ;;  %v4385_v17 = vpop.f32.mrf.mxu1  ;;  %v8175_v2 = vor.u32 %v9024_v52, %v8172_v54  ;;  %v7756_v19 = vld [vmem:[#allocation6 + $0xc90] sm:$0xf0] }
 0x17d   :  { %4652 = vmatpush.bf16.msra.mxu2 %v7503_v18  ;;  %v7583_v18 = vor.u32 %v8876_v60, %v7580_v63  ;;  %v4386_v23 = vadd.f32 %v4385_v17, %v4373_v6  ;;  %v7439_v31 = vor.u32 %v8840_v16, %v7436_v61  ;;  %v8924_v59 = vld [vmem:[#allocation6 + $0xca4] sm:$0xf]  ;;  %v7772_v60 = vld [vmem:[#allocation6 + $0xcb0] sm:$0xf0] }
 0x17e   :  { %4665 = vmatpush.bf16.msra.mxu3 %v7631_v24  ;;  %v8932_v24 = vld [vmem:[#allocation6 + $0xce4] sm:$0xf]  ;;  %v4411_v16 = vpop.f32.mrf.mxu3  ;;  %v7884_v26 = vld [vmem:[#allocation6 + $0xd90] sm:$0xf0] }
 0x17f   :  { %v7807_v35 = vor.u32 %v8932_v24, %v7804_v25  ;;  %v8956_v63 = vld [vmem:[#allocation6 + $0xda4] sm:$0xf]  ;;  %v8012_v27 = vld [vmem:[#allocation6 + $0xe90] sm:$0xf0] }
 0x180   :  { %4627 = vmatpush.bf16.msra.mxu0 %v7231_v30  ;;  %4640 = vmatpush.bf16.msra.mxu1 %v7359_v32  ;;  %v7311_v30 = vor.u32 %v8808_v14, %v7308_v15  ;;  %v9028_v32 = vld [vmem:[#allocation6 + $0xfe4] sm:$0xf]  ;;  %v7775_v14 = vor.u32 %v8924_v59, %v7772_v60  ;;  %v7724_v54 = vld [vmem:[#allocation6 + $0xc50] sm:$0xf0] }
 0x181   :  { %4653 = vmatpush.bf16.msra.mxu2 %v7487_v33  ;;  %v8188_v33 = vld [vmem:[#allocation6 + $0xff0] sm:$0xf0]  ;;  %v8988_v6 = vld [vmem:[#allocation6 + $0xea4] sm:$0xf] }
 0x182   :  { %4666 = vmatpush.bf16.msra.mxu3 %v7615_v39  ;;  %v8063_v39 = vor.u32 %v8996_v28, %v8060_v29  ;;  %v8191_v48 = vor.u32 %v9028_v32, %v8188_v33  ;;  %v9020_v8 = vld [vmem:[#allocation6 + $0xfa4] sm:$0xf]  ;;  %v8140_v29 = vld [vmem:[#allocation6 + $0xf90] sm:$0xf0] }
 0x183   :  { %v8920_v61 = vld [vmem:[#allocation6 + $0xc84] sm:$0xf]  ;;  %v7740_v33 = vld [vmem:[#allocation6 + $0xc70] sm:$0xf0] }
 0x184   :  { %4628 = vmatpush.bf16.msra.mxu0 %v7215_v49  ;;  %4641 = vmatpush.bf16.msra.mxu1 %v7343_v3  ;;  %v7916_v49 = vld [vmem:[#allocation6 + $0xdd0] sm:$0xf0]  ;;  %v8992_v3 = vld [vmem:[#allocation6 + $0xec4] sm:$0xf]  ;;  %v4387_v55 = vpop.f32.mrf.mxu1 }
 0x185   :  { %4654 = vmatpush.bf16.msra.mxu2 %v7471_v50  ;;  %v8044_v50 = vld [vmem:[#allocation6 + $0xed0] sm:$0xf0]  ;;  %v7919_v57 = vor.u32 %v8960_v45, %v7916_v49  ;;  %v8952_v22 = vld [vmem:[#allocation6 + $0xd84] sm:$0xf] }
 0x186   :  { %4667 = vmatpush.bf16.msra.mxu3 %v7599_v56  ;;  %v7791_v56 = vor.u32 %v8928_v40, %v7788_v43  ;;  %v8047_v58 = vor.u32 %v8992_v3, %v8044_v50  ;;  %v9016_v28 = vld [vmem:[#allocation6 + $0xf84] sm:$0xf]  ;;  %v7996_v40 = vld [vmem:[#allocation6 + $0xe70] sm:$0xf0]  ;;  %v4413_v49 = vpop.f32.mrf.mxu3 }
 0x187   :  { %v8916_v32 = vld [vmem:[#allocation6 + $0xc64] sm:$0xf]  ;;  %v8124_v45 = vld [vmem:[#allocation6 + $0xf70] sm:$0xf0] }
 0x188   :  { %4629 = vmatpush.bf16.msra.mxu0 %v7199_v4  ;;  %4642 = vmatpush.bf16.msra.mxu1 %v7327_v12  ;;  %v7900_v4 = vld [vmem:[#allocation6 + $0xdb0] sm:$0xf0]  ;;  %v9012_v43 = vld [vmem:[#allocation6 + $0xf64] sm:$0xf] }
 0x189   :  { %4655 = vmatpush.bf16.msra.mxu2 %v7455_v13  ;;  %v8156_v12 = vld [vmem:[#allocation6 + $0xfb0] sm:$0xf0]  ;;  %v4398_v13 = vpop.f32.mrf.mxu2  ;;  %v7903_v17 = vor.u32 %v8956_v63, %v7900_v4  ;;  %v8912_v52 = vld [vmem:[#allocation6 + $0xc44] sm:$0xf] }
 0x18a   :  { %4668 = vmatpush.bf16.msra.mxu3 %v7583_v18  ;;  %v4399_v15 = vadd.f32 %v4398_v13, %v4386_v23  ;;  %v8031_v18 = vor.u32 %v8988_v6, %v8028_v7  ;;  %v8159_v24 = vor.u32 %v9020_v8, %v8156_v12  ;;  %v7887_v23 = vor.u32 %v8952_v22, %v7884_v26  ;;  %v8944_v55 = vld [vmem:[#allocation6 + $0xd44] sm:$0xf]  ;;  %v7980_v59 = vld [vmem:[#allocation6 + $0xe50] sm:$0xf0] }
 0x18b   :  { %v9008_v60 = vld [vmem:[#allocation6 + $0xf44] sm:$0xf]  ;;  %v8108_v63 = vld [vmem:[#allocation6 + $0xf50] sm:$0xf0] }
 0x18c   :  { %4630 = vmatpush.bf16.msra.mxu0 %v7183_v0  ;;  %4643 = vmatpush.bf16.msra.mxu1 %v7311_v30  ;;  %v4412_v25 = vadd.f32 %v4411_v16, %v4399_v15  ;;  %v8984_v0 = vld [vmem:[#allocation6 + $0xe84] sm:$0xf]  ;;  %v7759_v30 = vor.u32 %v8920_v61, %v7756_v19  ;;  %v7708_v8 = vld [vmem:[#allocation6 + $0xc30] sm:$0xf0]  ;;  %v8111_v13 = vor.u32 %v9008_v60, %v8108_v63 }
 0x18d   :  { %4656 = vmatpush.bf16.msra.mxu2 %v7439_v31  ;;  %v8015_v31 = vor.u32 %v8984_v0, %v8012_v27  ;;  %v8908_v7 = vld [vmem:[#allocation6 + $0xc24] sm:$0xf]  ;;  %v7964_v16 = vld [vmem:[#allocation6 + $0xe30] sm:$0xf0] }
 0x18e   :  { %4669 = vmatpush.bf16.msra.mxu3 %v7567_v34  ;;  %v8948_v34 = vld [vmem:[#allocation6 + $0xd64] sm:$0xf]  ;;  %v7711_v19 = vor.u32 %v8908_v7, %v7708_v8  ;;  %v7692_v26 = vld [vmem:[#allocation6 + $0xc10] sm:$0xf0]  ;;  %v6642_v7 = vld [vmem:[#allocation6 + $0x3c8] sm:$0xf] }
 0x18f   :  { %4631 = vmatmul.bf16.vlgmr.msra.gmra.mxu0 %v9525_v44  ;;  %4644 = vmatmul.bf16.vlgmr.msra.gmra.mxu1 %v9527_v53  ;;  %v8940_v12 = vld [vmem:[#allocation6 + $0xd24] sm:$0xf]  ;;  %v8643_v8 = vld [vmem:[#allocation6 + $0x3d4] sm:$0xf0] }
 0x190   :  { %4675 = vmatpush.bf16.msrb.mxu0 %v7807_v35  ;;  %4688 = vmatpush.bf16.msrb.mxu1 %v7935_v36  ;;  %v8143_v35 = vor.u32 %v9016_v28, %v8140_v29  ;;  %v7868_v36 = vld [vmem:[#allocation6 + $0xd70] sm:$0xf0]  ;;  %v8972_v15 = vld [vmem:[#allocation6 + $0xe24] sm:$0xf]  ;;  %v4424_v61 = vpop.f32.mrf.mxu0 }
 0x191   :  { %4701 = vmatpush.bf16.msrb.mxu2 %v8063_v39  ;;  %4670 = vmatmul.bf16.vlgmr.msra.gmra.mxu3 %v9533_v21  ;;  %v8980_v39 = vld [vmem:[#allocation6 + $0xe64] sm:$0xf]  ;;  %v4400_v47 = vpop.f32.mrf.mxu2  ;;  %v7871_v3 = vor.u32 %v8948_v34, %v7868_v36  ;;  %v4425_v22 = vadd.f32 %v4424_v61, %v4412_v25  ;;  %v7967_v27 = vor.u32 %v8972_v15, %v7964_v16  ;;  %v7820_v29 = vld [vmem:[#allocation6 + $0xd10] sm:$0xf0]  ;;  %v6274_v36 = vld [vmem:[#allocation6 + $0xe8] sm:$0xf] }
 0x192   :  { %4714 = vmatpush.bf16.msrb.mxu3 %v8191_v48  ;;  %4657 = vmatmul.bf16.vlgmr.msra.gmra.mxu2 %v9531_v20  ;;  %v7743_v48 = vor.u32 %v8916_v32, %v7740_v33  ;;  %v7999_v50 = vor.u32 %v8980_v39, %v7996_v40  ;;  %v8936_v28 = vld [vmem:[#allocation6 + $0xd04] sm:$0xf]  ;;  %v7948_v32 = vld [vmem:[#allocation6 + $0xe10] sm:$0xf0]  ;;  %v8551_v39 = vld [vmem:[#allocation6 + $0xf4] sm:$0xf0]  ;;  %v6643_v61 = vor.u32 %v8643_v8, %v6642_v7 }
 0x193   :  { %v9000_v33 = vld [vmem:[#allocation6 + $0xf04] sm:$0xf]  ;;  %v8076_v34 = vld [vmem:[#allocation6 + $0xf10] sm:$0xf0]  ;;  %v6402_v40 = vld [vmem:[#allocation6 + $0x1e8] sm:$0xf] }
 0x194   :  { %4676 = vmatpush.bf16.msrb.mxu0 %v7791_v56  ;;  %4689 = vmatpush.bf16.msrb.mxu1 %v7919_v57  ;;  %v8127_v56 = vor.u32 %v9012_v43, %v8124_v45  ;;  %v7852_v57 = vld [vmem:[#allocation6 + $0xd50] sm:$0xf0]  ;;  %v8583_v43 = vld [vmem:[#allocation6 + $0x1f4] sm:$0xf0]  ;;  %v6530_v45 = vld [vmem:[#allocation6 + $0x2e8] sm:$0xf] }
 0x195   :  { %4702 = vmatpush.bf16.msrb.mxu2 %v8047_v58  ;;  %v8976_v58 = vld [vmem:[#allocation6 + $0xe44] sm:$0xf]  ;;  %v7855_v4 = vor.u32 %v8944_v55, %v7852_v57  ;;  %v8615_v47 = vld [vmem:[#allocation6 + $0x2f4] sm:$0xf0]  ;;  %v6403_v55 = vor.u32 %v8583_v43, %v6402_v40  ;;  %v6258_v57 = vld [vmem:[#allocation6 + $0xc8] sm:$0xf] }
 0x196   :  { %4715 = vmatpush.bf16.msrb.mxu3 %v8175_v2  ;;  %v7727_v2 = vor.u32 %v8912_v52, %v7724_v54  ;;  %v7983_v6 = vor.u32 %v8976_v58, %v7980_v59  ;;  %v8079_v52 = vor.u32 %v9000_v33, %v8076_v34  ;;  %v6275_v54 = vor.u32 %v8551_v39, %v6274_v36  ;;  %v8547_v58 = vld [vmem:[#allocation6 + $0xd4] sm:$0xf0]  ;;  %v6386_v59 = vld [vmem:[#allocation6 + $0x1c8] sm:$0xf] }
 0x197   :  { %v6242_v16 = vld [vmem:[#allocation6 + $0xa8] sm:$0xf]  ;;  %v8539_v33 = vld [vmem:[#allocation6 + $0x94] sm:$0xf0] }
 0x198   :  { %4677 = vmatpush.bf16.msrb.mxu0 %v7775_v14  ;;  %4690 = vmatpush.bf16.msrb.mxu1 %v7903_v17  ;;  %v7836_v14 = vld [vmem:[#allocation6 + $0xd30] sm:$0xf0]  ;;  %v9004_v17 = vld [vmem:[#allocation6 + $0xf24] sm:$0xf]  ;;  %v4426_v60 = vpop.f32.mrf.mxu0  ;;  %v6354_v34 = vld [vmem:[#allocation6 + $0x188] sm:$0xf] }
 0x199   :  { %4703 = vmatpush.bf16.msrb.mxu2 %v8031_v18  ;;  %v8092_v18 = vld [vmem:[#allocation6 + $0xf30] sm:$0xf0]  ;;  %v7839_v0 = vor.u32 %v8940_v12, %v7836_v14  ;;  %v8571_v40 = vld [vmem:[#allocation6 + $0x194] sm:$0xf0]  ;;  %v6194_v7 = vld [vmem:[#allocation6 + $0x48] sm:$0xf] }
 0x19a   :  { %4716 = vmatpush.bf16.msrb.mxu3 %v8159_v24  ;;  %v8904_v24 = vld [vmem:[#allocation6 + $0xc04] sm:$0xf]  ;;  %v8603_v43 = vld [vmem:[#allocation6 + $0x294] sm:$0xf0] }
 0x19b   :  { %v7695_v25 = vor.u32 %v8904_v24, %v7692_v26  ;;  %v8607_v24 = vld [vmem:[#allocation6 + $0x2b4] sm:$0xf0]  ;;  %v6626_v26 = vld [vmem:[#allocation6 + $0x3a8] sm:$0xf] }
 0x19c   :  { %4678 = vmatpush.bf16.msrb.mxu0 %v7759_v30  ;;  %4691 = vmatpush.bf16.msrb.mxu1 %v7887_v23  ;;  %v8968_v30 = vld [vmem:[#allocation6 + $0xe04] sm:$0xf]  ;;  %v4437_v23 = vpop.f32.mrf.mxu1  ;;  %v8531_v8 = vld [vmem:[#allocation6 + $0x54] sm:$0xf0] }
 0x19d   :  { %4704 = vmatpush.bf16.msrb.mxu2 %v8015_v31  ;;  %v8095_v31 = vor.u32 %v9004_v17, %v8092_v18  ;;  %v7951_v49 = vor.u32 %v8968_v30, %v7948_v32  ;;  %v8543_v17 = vld [vmem:[#allocation6 + $0xb4] sm:$0xf0]  ;;  %v6370_v18 = vld [vmem:[#allocation6 + $0x1a8] sm:$0xf] }
 0x19e   :  { %4717 = vmatpush.bf16.msrb.mxu3 %v8143_v35  ;;  %v4438_v35 = vadd.f32 %v4437_v23, %v4425_v22  ;;  %v6498_v22 = vld [vmem:[#allocation6 + $0x2a8] sm:$0xf] }
 0x19f   :  { %v6226_v32 = vld [vmem:[#allocation6 + $0x88] sm:$0xf] }
 0x1a0   :  { %4679 = vmatpush.bf16.msrb.mxu0 %v7743_v48  ;;  %4692 = vmatpush.bf16.msrb.mxu1 %v7871_v3  ;;  %v7823_v48 = vor.u32 %v8936_v28, %v7820_v29  ;;  %v6658_v3 = vld [vmem:[#allocation6 + $0x3e8] sm:$0xf]  ;;  %v6243_v28 = vor.u32 %v8543_v17, %v6242_v16  ;;  %v4463_v30 = vpop.f32.mrf.mxu3  ;;  %v8595_v16 = vld [vmem:[#allocation6 + $0x254] sm:$0xf0] }
 0x1a1   :  { %4705 = vmatpush.bf16.msrb.mxu2 %v7999_v50  ;;  %v8647_v50 = vld [vmem:[#allocation6 + $0x3f4] sm:$0xf0]  ;;  %v6578_v17 = vld [vmem:[#allocation6 + $0x348] sm:$0xf] }
 0x1a2   :  { %4718 = vmatpush.bf16.msrb.mxu3 %v8127_v56  ;;  %v6531_v56 = vor.u32 %v8615_v47, %v6530_v45  ;;  %v6659_v63 = vor.u32 %v8647_v50, %v6658_v3  ;;  %v6610_v45 = vld [vmem:[#allocation6 + $0x388] sm:$0xf]  ;;  %v8635_v47 = vld [vmem:[#allocation6 + $0x394] sm:$0xf0] }
 0x1a3   :  { %v6210_v3 = vld [vmem:[#allocation6 + $0x68] sm:$0xf]  ;;  %v8535_v50 = vld [vmem:[#allocation6 + $0x74] sm:$0xf0] }
 0x1a4   :  { %4680 = vmatpush.bf16.msrb.mxu0 %v7727_v2  ;;  %4693 = vmatpush.bf16.msrb.mxu1 %v7855_v4  ;;  %v8579_v2 = vld [vmem:[#allocation6 + $0x1d4] sm:$0xf0]  ;;  %v6514_v4 = vld [vmem:[#allocation6 + $0x2c8] sm:$0xf]  ;;  %v4439_v12 = vpop.f32.mrf.mxu1 }
 0x1a5   :  { %4706 = vmatpush.bf16.msrb.mxu2 %v7983_v6  ;;  %v8611_v6 = vld [vmem:[#allocation6 + $0x2d4] sm:$0xf0]  ;;  %v6387_v14 = vor.u32 %v8579_v2, %v6386_v59  ;;  %v6322_v12 = vld [vmem:[#allocation6 + $0x148] sm:$0xf] }
 0x1a6   :  { %4719 = vmatpush.bf16.msrb.mxu3 %v8111_v13  ;;  %v6259_v13 = vor.u32 %v8547_v58, %v6258_v57  ;;  %v6515_v15 = vor.u32 %v8611_v6, %v6514_v4  ;;  %v8599_v57 = vld [vmem:[#allocation6 + $0x274] sm:$0xf0]  ;;  %v6594_v58 = vld [vmem:[#allocation6 + $0x368] sm:$0xf] }
 0x1a7   :  { %v8631_v59 = vld [vmem:[#allocation6 + $0x374] sm:$0xf0] }
 0x1a8   :  { %4681 = vmatpush.bf16.msrb.mxu0 %v7711_v19  ;;  %4694 = vmatpush.bf16.msrb.mxu1 %v7839_v0  ;;  %v8575_v19 = vld [vmem:[#allocation6 + $0x1b4] sm:$0xf0]  ;;  %v4465_v2 = vpop.f32.mrf.mxu3 }
 0x1a9   :  { %4707 = vmatpush.bf16.msrb.mxu2 %v7967_v27  ;;  %v8639_v0 = vld [vmem:[#allocation6 + $0x3b4] sm:$0xf0]  ;;  %v4450_v27 = vpop.f32.mrf.mxu2  ;;  %v6371_v23 = vor.u32 %v8575_v19, %v6370_v18 }
 0x1aa   :  { %4720 = vmatpush.bf16.msrb.mxu3 %v8095_v31  ;;  %v4451_v29 = vadd.f32 %v4450_v27, %v4438_v35  ;;  %v6499_v31 = vor.u32 %v8607_v24, %v6498_v22  ;;  %v6627_v36 = vor.u32 %v8639_v0, %v6626_v26  ;;  %v6355_v35 = vor.u32 %v8571_v40, %v6354_v34  ;;  %v8627_v18 = vld [vmem:[#allocation6 + $0x354] sm:$0xf0]  ;;  %v6178_v24 = vld [vmem:[#allocation6 + $0x28] sm:$0xf] }
 0x1ab   :  { %v8527_v26 = vld [vmem:[#allocation6 + $0x34] sm:$0xf0]  ;;  %v6306_v0 = vld [vmem:[#allocation6 + $0x128] sm:$0xf]  ;;  %v6579_v27 = vor.u32 %v8627_v18, %v6578_v17 }
 0x1ac   :  { %4682 = vmatpush.bf16.msrb.mxu0 %v7695_v25  ;;  %4695 = vmatpush.bf16.msrb.mxu1 %v7823_v48  ;;  %v4464_v39 = vadd.f32 %v4463_v30, %v4451_v29  ;;  %v6482_v25 = vld [vmem:[#allocation6 + $0x288] sm:$0xf]  ;;  %v6227_v48 = vor.u32 %v8539_v33, %v6226_v32  ;;  %v8591_v30 = vld [vmem:[#allocation6 + $0x234] sm:$0xf0]  ;;  %v6179_v33 = vor.u32 %v8527_v26, %v6178_v24 }
 0x1ad   :  { %4708 = vmatpush.bf16.msrb.mxu2 %v7951_v49  ;;  %v6483_v49 = vor.u32 %v8603_v43, %v6482_v25  ;;  %v6434_v29 = vld [vmem:[#allocation6 + $0x228] sm:$0xf]  ;;  %v8523_v25 = vld [vmem:[#allocation6 + $0x14] sm:$0xf0] }
 0x1ae   :  { %4721 = vmatpush.bf16.msrb.mxu3 %v8079_v52  ;;  %v6338_v52 = vld [vmem:[#allocation6 + $0x168] sm:$0xf] }
 0x1af   :  { %4683 = vmatmul.bf16.vlgmr.msrb.gmra.mxu0 %v9540_v62  ;;  %4696 = vmatmul.bf16.vlgmr.msrb.gmra.mxu1 %v9543_v1  ;;  %v6162_v40 = vld [vmem:[#allocation6 + $0x8] sm:$0xf] }
 0x1b0   :  { %4727 = vmatpush.bf16.msra.mxu0 %v6275_v54  ;;  %4740 = vmatpush.bf16.msra.mxu1 %v6403_v55  ;;  %v6611_v54 = vor.u32 %v8635_v47, %v6610_v45  ;;  %v8567_v55 = vld [vmem:[#allocation6 + $0x174] sm:$0xf0]  ;;  %v6435_v45 = vor.u32 %v8591_v30, %v6434_v29  ;;  %v6290_v47 = vld [vmem:[#allocation6 + $0x108] sm:$0xf] }
 0x1b1   :  { %4753 = vmatpush.bf16.msra.mxu2 %v6531_v56  ;;  %4722 = vmatmul.bf16.vlgmr.msrb.gmra.mxu3 %v9549_v42  ;;  %v6466_v56 = vld [vmem:[#allocation6 + $0x268] sm:$0xf]  ;;  %v4452_v60 = vpop.f32.mrf.mxu2  ;;  %v6339_v4 = vor.u32 %v8567_v55, %v6338_v52 }
 0x1b2   :  { %4766 = vmatpush.bf16.msra.mxu3 %v6659_v63  ;;  %4709 = vmatmul.bf16.vlgmr.msrb.gmra.mxu2 %v9547_v38  ;;  %v6211_v63 = vor.u32 %v8535_v50, %v6210_v3  ;;  %v6467_v6 = vor.u32 %v8599_v57, %v6466_v56  ;;  %v4476_v32 = vpop.f32.mrf.mxu0  ;;  %v8587_v50 = vld [vmem:[#allocation6 + $0x214] sm:$0xf0]  ;;  %v6546_v52 = vld [vmem:[#allocation6 + $0x308] sm:$0xf] }
 0x1b3   :  { %v4477_v34 = vadd.f32 %v4476_v32, %v4464_v39  ;;  %v6786_v55 = vld [vmem:[#allocation6 + $0x4e8] sm:$0xf]  ;;  %v8679_v56 = vld [vmem:[#allocation6 + $0x4f4] sm:$0xf0]  ;;  %v6163_v39 = vor.u32 %v8523_v25, %v6162_v40 }
 0x1b4   :  { %4728 = vmatpush.bf16.msra.mxu0 %v6259_v13  ;;  %4741 = vmatpush.bf16.msra.mxu1 %v6387_v14  ;;  %v6595_v13 = vor.u32 %v8631_v59, %v6594_v58  ;;  %v8563_v14 = vld [vmem:[#allocation6 + $0x154] sm:$0xf0]  ;;  %v6914_v57 = vld [vmem:[#allocation6 + $0x5e8] sm:$0xf] }
 0x1b5   :  { %4754 = vmatpush.bf16.msra.mxu2 %v6515_v15  ;;  %v6450_v15 = vld [vmem:[#allocation6 + $0x248] sm:$0xf]  ;;  %v6323_v19 = vor.u32 %v8563_v14, %v6322_v12  ;;  %v8711_v58 = vld [vmem:[#allocation6 + $0x5f4] sm:$0xf0] }
 0x1b6   :  { %4767 = vmatpush.bf16.msra.mxu3 %v6643_v61  ;;  %v6195_v61 = vor.u32 %v8531_v8, %v6194_v7  ;;  %v6451_v22 = vor.u32 %v8595_v16, %v6450_v15  ;;  %v7042_v59 = vld [vmem:[#allocation6 + $0x6e8] sm:$0xf]  ;;  %v8743_v60 = vld [vmem:[#allocation6 + $0x6f4] sm:$0xf0]  ;;  %v6787_v8 = vor.u32 %v8679_v56, %v6786_v55  ;;  %v6915_v12 = vor.u32 %v8711_v58, %v6914_v57 }
 0x1b7   :  { %v6770_v14 = vld [vmem:[#allocation6 + $0x4c8] sm:$0xf]  ;;  %v8675_v15 = vld [vmem:[#allocation6 + $0x4d4] sm:$0xf0] }
 0x1b8   :  { %4729 = vmatpush.bf16.msra.mxu0 %v6243_v28  ;;  %4742 = vmatpush.bf16.msra.mxu1 %v6371_v23  ;;  %v8559_v28 = vld [vmem:[#allocation6 + $0x134] sm:$0xf0]  ;;  %v6562_v23 = vld [vmem:[#allocation6 + $0x328] sm:$0xf] }
 0x1b9   :  { %4755 = vmatpush.bf16.msra.mxu2 %v6499_v31  ;;  %v8623_v31 = vld [vmem:[#allocation6 + $0x334] sm:$0xf0]  ;;  %v6307_v43 = vor.u32 %v8559_v28, %v6306_v0  ;;  %v6898_v16 = vld [vmem:[#allocation6 + $0x5c8] sm:$0xf] }
 0x1ba   :  { %4768 = vmatpush.bf16.msra.mxu3 %v6627_v36  ;;  %v4489_v36 = vpop.f32.mrf.mxu1  ;;  %v4478_v17 = vpop.f32.mrf.mxu0  ;;  %v7154_v26 = vld [vmem:[#allocation6 + $0x7c8] sm:$0xf]  ;;  %v8771_v0 = vld [vmem:[#allocation6 + $0x7d4] sm:$0xf0] }
 0x1bb   :  { %v4490_v3 = vadd.f32 %v4489_v36, %v4477_v34  ;;  %v6754_v30 = vld [vmem:[#allocation6 + $0x4a8] sm:$0xf]  ;;  %v7155_v32 = vor.u32 %v8771_v0, %v7154_v26  ;;  %v8735_v36 = vld [vmem:[#allocation6 + $0x6b4] sm:$0xf0] }
 0x1bc   :  { %4730 = vmatpush.bf16.msra.mxu0 %v6227_v48  ;;  %4743 = vmatpush.bf16.msra.mxu1 %v6355_v35  ;;  %v8555_v48 = vld [vmem:[#allocation6 + $0x114] sm:$0xf0]  ;;  %v6418_v35 = vld [vmem:[#allocation6 + $0x208] sm:$0xf] }
 0x1bd   :  { %4756 = vmatpush.bf16.msra.mxu2 %v6483_v49  ;;  %v6563_v49 = vor.u32 %v8623_v31, %v6562_v23  ;;  %v6419_v2 = vor.u32 %v8587_v50, %v6418_v35  ;;  %v8671_v23 = vld [vmem:[#allocation6 + $0x4b4] sm:$0xf0]  ;;  %v6882_v31 = vld [vmem:[#allocation6 + $0x5a8] sm:$0xf]  ;;  %v9098_v35 = vld [vmem:[#allocation7] sm:$0xf] }
 0x1be   :  { %4769 = vmatpush.bf16.msra.mxu3 %v6611_v54  ;;  %v8619_v54 = vld [vmem:[#allocation6 + $0x314] sm:$0xf0]  ;;  %v7010_v34 = vld [vmem:[#allocation6 + $0x6a8] sm:$0xf] }
 0x1bf   :  { %v6547_v7 = vor.u32 %v8619_v54, %v6546_v52  ;;  %v7138_v40 = vld [vmem:[#allocation6 + $0x7a8] sm:$0xf]  ;;  %v8767_v25 = vld [vmem:[#allocation6 + $0x7b4] sm:$0xf0]  ;;  %v7011_v52 = vor.u32 %v8735_v36, %v7010_v34 }
 0x1c0   :  { %4731 = vmatpush.bf16.msra.mxu0 %v6211_v63  ;;  %4744 = vmatpush.bf16.msra.mxu1 %v6339_v4  ;;  %v6291_v63 = vor.u32 %v8555_v48, %v6290_v47  ;;  %v7170_v4 = vld [vmem:[#allocation6 + $0x7e8] sm:$0xf]  ;;  %v8667_v55 = vld [vmem:[#allocation6 + $0x494] sm:$0xf0]  ;;  %v7139_v57 = vor.u32 %v8767_v25, %v7138_v40 }
 0x1c1   :  { %4757 = vmatpush.bf16.msra.mxu2 %v6467_v6  ;;  %v8775_v6 = vld [vmem:[#allocation6 + $0x7f4] sm:$0xf0]  ;;  %v6738_v54 = vld [vmem:[#allocation6 + $0x488] sm:$0xf] }
 0x1c2   :  { %4770 = vmatpush.bf16.msra.mxu3 %v6595_v13  ;;  %v7043_v13 = vor.u32 %v8743_v60, %v7042_v59  ;;  %v7171_v18 = vor.u32 %v8775_v6, %v7170_v4  ;;  %v4491_v24 = vpop.f32.mrf.mxu1  ;;  %v4515_v48 = vpop.f32.mrf.mxu3  ;;  %v6866_v56 = vld [vmem:[#allocation6 + $0x588] sm:$0xf]  ;;  %v8699_v58 = vld [vmem:[#allocation6 + $0x594] sm:$0xf0]  ;;  %v6739_v4 = vor.u32 %v8667_v55, %v6738_v54 }
 0x1c3   :  { %v6994_v59 = vld [vmem:[#allocation6 + $0x688] sm:$0xf]  ;;  %v8731_v60 = vld [vmem:[#allocation6 + $0x694] sm:$0xf0] }
 0x1c4   :  { %4732 = vmatpush.bf16.msra.mxu0 %v6195_v61  ;;  %4745 = vmatpush.bf16.msra.mxu1 %v6323_v19  ;;  %v8707_v61 = vld [vmem:[#allocation6 + $0x5d4] sm:$0xf0]  ;;  %v7026_v19 = vld [vmem:[#allocation6 + $0x6c8] sm:$0xf] }
 0x1c5   :  { %4758 = vmatpush.bf16.msra.mxu2 %v6451_v22  ;;  %v8739_v22 = vld [vmem:[#allocation6 + $0x6d4] sm:$0xf0]  ;;  %v6899_v28 = vor.u32 %v8707_v61, %v6898_v16  ;;  %v6978_v61 = vld [vmem:[#allocation6 + $0x668] sm:$0xf] }
 0x1c6   :  { %4771 = vmatpush.bf16.msra.mxu3 %v6579_v27  ;;  %v6771_v27 = vor.u32 %v8675_v15, %v6770_v14  ;;  %v7027_v29 = vor.u32 %v8739_v22, %v7026_v19  ;;  %v8663_v14 = vld [vmem:[#allocation6 + $0x474] sm:$0xf0]  ;;  %v6850_v15 = vld [vmem:[#allocation6 + $0x568] sm:$0xf] }
 0x1c7   :  { %v8727_v19 = vld [vmem:[#allocation6 + $0x674] sm:$0xf0]  ;;  %v7106_v22 = vld [vmem:[#allocation6 + $0x768] sm:$0xf] }
 0x1c8   :  { %4733 = vmatpush.bf16.msra.mxu0 %v6179_v33  ;;  %4746 = vmatpush.bf16.msra.mxu1 %v6307_v43  ;;  %v8703_v33 = vld [vmem:[#allocation6 + $0x5b4] sm:$0xf0]  ;;  %v4502_v43 = vpop.f32.mrf.mxu2  ;;  %v6962_v34 = vld [vmem:[#allocation6 + $0x648] sm:$0xf] }
 0x1c9   :  { %4759 = vmatpush.bf16.msra.mxu2 %v6435_v45  ;;  %v6755_v45 = vor.u32 %v8671_v23, %v6754_v30  ;;  %v4503_v47 = vadd.f32 %v4502_v43, %v4490_v3  ;;  %v6883_v50 = vor.u32 %v8703_v33, %v6882_v31  ;;  %v8759_v24 = vld [vmem:[#allocation6 + $0x774] sm:$0xf0]  ;;  %v6706_v30 = vld [vmem:[#allocation6 + $0x448] sm:$0xf] }
 0x1ca   :  { %4772 = vmatpush.bf16.msra.mxu3 %v6563_v49  ;;  %v1744_v49 = vperm.slane %v9098_v35, 1  ;;  %v8659_v23 = vld [vmem:[#allocation6 + $0x454] sm:$0xf0]  ;;  %v6834_v31 = vld [vmem:[#allocation6 + $0x548] sm:$0xf] }
 0x1cb   :  { %v8691_v33 = vld [vmem:[#allocation6 + $0x554] sm:$0xf0]  ;;  %v7090_v40 = vld [vmem:[#allocation6 + $0x748] sm:$0xf] }
 0x1cc   :  { %4734 = vmatpush.bf16.msra.mxu0 %v6163_v39  ;;  %4747 = vmatpush.bf16.msra.mxu1 %v6291_v63  ;;  %v9576_v39 = vadd.f32 %v4515_v48, %v4503_v47  ;;  %v7122_v63 = vld [vmem:[#allocation6 + $0x788] sm:$0xf]  ;;  %v4528_v3 = vpop.f32.mrf.mxu0  ;;  %v8723_v36 = vld [vmem:[#allocation6 + $0x654] sm:$0xf0]  ;;  %v6835_v48 = vor.u32 %v8691_v33, %v6834_v31 }
 0x1cd   :  { %4760 = vmatpush.bf16.msra.mxu2 %v6419_v2  ;;  %v8763_v2 = vld [vmem:[#allocation6 + $0x794] sm:$0xf0]  ;;  %v4529_v6 = vadd.f32 %v4528_v3, %v1744_v49  ;;  %v6963_v35 = vor.u32 %v8723_v36, %v6962_v34  ;;  %v6690_v49 = vld [vmem:[#allocation6 + $0x428] sm:$0xf] }
 0x1ce   :  { %4773 = vmatpush.bf16.msra.mxu3 %v6547_v7  ;;  %v4541_v7 = vpop.f32.mrf.mxu1  ;;  %v7123_v16 = vor.u32 %v8763_v2, %v7122_v63  ;;  %v8755_v25 = vld [vmem:[#allocation6 + $0x754] sm:$0xf0]  ;;  %v6674_v3 = vld [vmem:[#allocation6 + $0x408] sm:$0xf] }
 0x1cf   :  { %4735 = vmatmul.bf16.vlgmr.msra.gmra.mxu0 %v9491_v41  ;;  %4748 = vmatmul.bf16.vlgmr.msra.gmra.mxu1 %v9493_v51  ;;  %v4542_v17 = vadd.f32 %v4541_v7, %v4529_v6  ;;  %v7091_v54 = vor.u32 %v8755_v25, %v7090_v40  ;;  %v8687_v55 = vld [vmem:[#allocation6 + $0x534] sm:$0xf0]  ;;  %v7282_v40 = vld [vmem:[#allocation6 + $0x8c8] sm:$0xf] }
 0x1d0   :  { %4779 = vmatpush.bf16.msrb.mxu0 %v6787_v8  ;;  %4792 = vmatpush.bf16.msrb.mxu1 %v6915_v12  ;;  %v6867_v8 = vor.u32 %v8699_v58, %v6866_v56  ;;  %v6995_v12 = vor.u32 %v8731_v60, %v6994_v59  ;;  %v4504_v26 = vpop.f32.mrf.mxu2  ;;  %v6946_v56 = vld [vmem:[#allocation6 + $0x628] sm:$0xf]  ;;  %v8751_v59 = vld [vmem:[#allocation6 + $0x734] sm:$0xf0] }
 0x1d1   :  { %4805 = vmatpush.bf16.msrb.mxu2 %v7043_v13  ;;  %4774 = vmatmul.bf16.vlgmr.msra.gmra.mxu3 %v9499_v10  ;;  %v6722_v13 = vld [vmem:[#allocation6 + $0x468] sm:$0xf]  ;;  %v8903_v31 = vld [vmem:[#allocation6 + $0xbf4] sm:$0xf0] }
 0x1d2   :  { %4818 = vmatpush.bf16.msrb.mxu3 %v7171_v18  ;;  %4761 = vmatmul.bf16.vlgmr.msra.gmra.mxu2 %v9497_v5  ;;  %v8695_v18 = vld [vmem:[#allocation6 + $0x574] sm:$0xf0]  ;;  %v6723_v0 = vor.u32 %v8663_v14, %v6722_v13  ;;  %v7074_v58 = vld [vmem:[#allocation6 + $0x728] sm:$0xf] }
 0x1d3   :  { %v6930_v13 = vld [vmem:[#allocation6 + $0x608] sm:$0xf]  ;;  %v7075_v14 = vor.u32 %v8751_v59, %v7074_v58  ;;  %v8803_v25 = vld [vmem:[#allocation6 + $0x8d4] sm:$0xf0] }
 0x1d4   :  { %4780 = vmatpush.bf16.msrb.mxu0 %v6771_v27  ;;  %4793 = vmatpush.bf16.msrb.mxu1 %v6899_v28  ;;  %v4517_v27 = vpop.f32.mrf.mxu3  ;;  %v6851_v28 = vor.u32 %v8695_v18, %v6850_v15  ;;  %v4530_v43 = vpop.f32.mrf.mxu0  ;;  %v7058_v18 = vld [vmem:[#allocation6 + $0x708] sm:$0xf]  ;;  %v8799_v59 = vld [vmem:[#allocation6 + $0x8b4] sm:$0xf0] }
 0x1d5   :  { %4806 = vmatpush.bf16.msrb.mxu2 %v7027_v29  ;;  %v6979_v29 = vor.u32 %v8727_v19, %v6978_v61  ;;  %v8747_v61 = vld [vmem:[#allocation6 + $0x714] sm:$0xf0]  ;;  %v7554_v27 = vld [vmem:[#allocation6 + $0xae8] sm:$0xf] }
 0x1d6   :  { %4819 = vmatpush.bf16.msrb.mxu3 %v7155_v32  ;;  %v7107_v32 = vor.u32 %v8759_v24, %v7106_v22  ;;  %v4543_v47 = vpop.f32.mrf.mxu1  ;;  %v7298_v22 = vld [vmem:[#allocation6 + $0x8e8] sm:$0xf]  ;;  %v8807_v24 = vld [vmem:[#allocation6 + $0x8f4] sm:$0xf0] }
 0x1d7   :  { %v7299_v33 = vor.u32 %v8807_v24, %v7298_v22  ;;  %v7410_v43 = vld [vmem:[#allocation6 + $0x9c8] sm:$0xf]  ;;  %v8859_v24 = vld [vmem:[#allocation6 + $0xa94] sm:$0xf0] }
 0x1d8   :  { %4781 = vmatpush.bf16.msrb.mxu0 %v6755_v45  ;;  %4794 = vmatpush.bf16.msrb.mxu1 %v6883_v50  ;;  %v6707_v45 = vor.u32 %v8659_v23, %v6706_v30  ;;  %v8655_v50 = vld [vmem:[#allocation6 + $0x434] sm:$0xf0]  ;;  %v4554_v60 = vpop.f32.mrf.mxu2  ;;  %v7682_v23 = vld [vmem:[#allocation6 + $0xbe8] sm:$0xf] }
 0x1d9   :  { %4807 = vmatpush.bf16.msrb.mxu2 %v7011_v52  ;;  %v6818_v52 = vld [vmem:[#allocation6 + $0x528] sm:$0xf]  ;;  %v6691_v63 = vor.u32 %v8655_v50, %v6690_v49  ;;  %v4555_v2 = vadd.f32 %v4554_v60, %v4542_v17  ;;  %v7683_v47 = vor.u32 %v8903_v31, %v7682_v23  ;;  %v8867_v49 = vld [vmem:[#allocation6 + $0xad4] sm:$0xf0] }
 0x1da   :  { %4820 = vmatpush.bf16.msrb.mxu3 %v7139_v57  ;;  %v8719_v57 = vld [vmem:[#allocation6 + $0x634] sm:$0xf0]  ;;  %v6819_v6 = vor.u32 %v8687_v55, %v6818_v52  ;;  %v7426_v17 = vld [vmem:[#allocation6 + $0x9e8] sm:$0xf] }
 0x1db   :  { %v6947_v7 = vor.u32 %v8719_v57, %v6946_v56  ;;  %v7666_v50 = vld [vmem:[#allocation6 + $0xbc8] sm:$0xf]  ;;  %v8899_v52 = vld [vmem:[#allocation6 + $0xbd4] sm:$0xf0] }
 0x1dc   :  { %4782 = vmatpush.bf16.msrb.mxu0 %v6739_v4  ;;  %4795 = vmatpush.bf16.msrb.mxu1 %v6867_v8  ;;  %v8651_v4 = vld [vmem:[#allocation6 + $0x414] sm:$0xf0]  ;;  %v6802_v8 = vld [vmem:[#allocation6 + $0x508] sm:$0xf]  ;;  %v4567_v15 = vpop.f32.mrf.mxu3 }
 0x1dd   :  { %4808 = vmatpush.bf16.msrb.mxu2 %v6995_v12  ;;  %v8683_v12 = vld [vmem:[#allocation6 + $0x514] sm:$0xf0]  ;;  %v9578_v19 = vadd.f32 %v4567_v15, %v4555_v2  ;;  %v6675_v26 = vor.u32 %v8651_v4, %v6674_v3  ;;  %v7266_v58 = vld [vmem:[#allocation6 + $0x8a8] sm:$0xf] }
 0x1de   :  { %4821 = vmatpush.bf16.msrb.mxu3 %v7123_v16  ;;  %v8715_v16 = vld [vmem:[#allocation6 + $0x614] sm:$0xf0]  ;;  %v7394_v60 = vld [vmem:[#allocation6 + $0x9a8] sm:$0xf] }
 0x1df   :  { %v6931_v30 = vor.u32 %v8715_v16, %v6930_v13  ;;  %v8831_v2 = vld [vmem:[#allocation6 + $0x9b4] sm:$0xf0]  ;;  %v7522_v3 = vld [vmem:[#allocation6 + $0xaa8] sm:$0xf] }
 0x1e0   :  { %4783 = vmatpush.bf16.msrb.mxu0 %v6723_v0  ;;  %4796 = vmatpush.bf16.msrb.mxu1 %v6851_v28  ;;  %v8839_v0 = vld [vmem:[#allocation6 + $0x9f4] sm:$0xf0]  ;;  %v7378_v16 = vld [vmem:[#allocation6 + $0x988] sm:$0xf] }
 0x1e1   :  { %4809 = vmatpush.bf16.msrb.mxu2 %v6979_v29  ;;  %v8871_v28 = vld [vmem:[#allocation6 + $0xaf4] sm:$0xf0]  ;;  %v6803_v29 = vor.u32 %v8683_v12, %v6802_v8  ;;  %v7427_v34 = vor.u32 %v8839_v0, %v7426_v17  ;;  %v7267_v8 = vor.u32 %v8799_v59, %v7266_v58  ;;  %v7395_v12 = vor.u32 %v8831_v2, %v7394_v60  ;;  %v7506_v22 = vld [vmem:[#allocation6 + $0xa88] sm:$0xf] }
 0x1e2   :  { %4822 = vmatpush.bf16.msrb.mxu3 %v7107_v32  ;;  %v7059_v32 = vor.u32 %v8747_v61, %v7058_v18  ;;  %v7555_v36 = vor.u32 %v8871_v28, %v7554_v27  ;;  %v8863_v4 = vld [vmem:[#allocation6 + $0xab4] sm:$0xf0]  ;;  %v7507_v23 = vor.u32 %v8859_v24, %v7506_v22  ;;  %v7234_v31 = vld [vmem:[#allocation6 + $0x868] sm:$0xf] }
 0x1e3   :  { %v7523_v13 = vor.u32 %v8863_v4, %v7522_v3  ;;  %v8795_v15 = vld [vmem:[#allocation6 + $0x894] sm:$0xf0]  ;;  %v7602_v2 = vld [vmem:[#allocation6 + $0xb48] sm:$0xf] }
 0x1e4   :  { %4784 = vmatpush.bf16.msrb.mxu0 %v6707_v45  ;;  %4797 = vmatpush.bf16.msrb.mxu1 %v6835_v48  ;;  %v4556_v45 = vpop.f32.mrf.mxu2  ;;  %v8835_v48 = vld [vmem:[#allocation6 + $0x9d4] sm:$0xf0]  ;;  %v4569_v55 = vpop.f32.mrf.mxu3  ;;  %v7586_v24 = vld [vmem:[#allocation6 + $0xb28] sm:$0xf] }
 0x1e5   :  { %4810 = vmatpush.bf16.msrb.mxu2 %v6963_v35  ;;  %v7538_v35 = vld [vmem:[#allocation6 + $0xac8] sm:$0xf]  ;;  %v7411_v56 = vor.u32 %v8835_v48, %v7410_v43  ;;  %v8827_v61 = vld [vmem:[#allocation6 + $0x994] sm:$0xf0] }
 0x1e6   :  { %4823 = vmatpush.bf16.msrb.mxu3 %v7091_v54  ;;  %v7283_v54 = vor.u32 %v8803_v25, %v7282_v40  ;;  %v7539_v57 = vor.u32 %v8867_v49, %v7538_v35  ;;  %v8891_v0 = vld [vmem:[#allocation6 + $0xb94] sm:$0xf0]  ;;  %v7490_v25 = vld [vmem:[#allocation6 + $0xa68] sm:$0xf] }
 0x1e7   :  { %v8823_v40 = vld [vmem:[#allocation6 + $0x974] sm:$0xf0]  ;;  %v7618_v45 = vld [vmem:[#allocation6 + $0xb68] sm:$0xf] }
 0x1e8   :  { %4785 = vmatpush.bf16.msrb.mxu0 %v6691_v63  ;;  %4798 = vmatpush.bf16.msrb.mxu1 %v6819_v6  ;;  %v7667_v63 = vor.u32 %v8899_v52, %v7666_v50  ;;  %v7650_v6 = vld [vmem:[#allocation6 + $0xba8] sm:$0xf]  ;;  %v8855_v43 = vld [vmem:[#allocation6 + $0xa74] sm:$0xf0] }
 0x1e9   :  { %4811 = vmatpush.bf16.msrb.mxu2 %v6947_v7  ;;  %v8895_v7 = vld [vmem:[#allocation6 + $0xbb4] sm:$0xf0]  ;;  %v7491_v35 = vor.u32 %v8855_v43, %v7490_v25  ;;  %v7218_v49 = vld [vmem:[#allocation6 + $0x848] sm:$0xf] }
 0x1ea   :  { %4824 = vmatpush.bf16.msrb.mxu3 %v7075_v14  ;;  %v7250_v14 = vld [vmem:[#allocation6 + $0x888] sm:$0xf]  ;;  %v7651_v18 = vor.u32 %v8895_v7, %v7650_v6  ;;  %v8787_v50 = vld [vmem:[#allocation6 + $0x854] sm:$0xf0] }
 0x1eb   :  { %v7346_v52 = vld [vmem:[#allocation6 + $0x948] sm:$0xf]  ;;  %v8851_v58 = vld [vmem:[#allocation6 + $0xa54] sm:$0xf0]  ;;  %v7219_v6 = vor.u32 %v8787_v50, %v7218_v49 }
 0x1ec   :  { %4786 = vmatpush.bf16.msrb.mxu0 %v6675_v26  ;;  %4799 = vmatpush.bf16.msrb.mxu1 %v6803_v29  ;;  %v4580_v17 = vpop.f32.mrf.mxu0  ;;  %v7634_v26 = vld [vmem:[#allocation6 + $0xb88] sm:$0xf]  ;;  %v4593_v28 = vpop.f32.mrf.mxu1  ;;  %v7251_v29 = vor.u32 %v8795_v15, %v7250_v14  ;;  %v8883_v3 = vld [vmem:[#allocation6 + $0xb54] sm:$0xf0] }
 0x1ed   :  { %4812 = vmatpush.bf16.msrb.mxu2 %v6931_v30  ;;  %v4581_v27 = vadd.f32 %v4580_v17, %v9578_v19  ;;  %v7379_v30 = vor.u32 %v8827_v61, %v7378_v16  ;;  %v8783_v14 = vld [vmem:[#allocation6 + $0x834] sm:$0xf0]  ;;  %v7330_v15 = vld [vmem:[#allocation6 + $0x928] sm:$0xf]  ;;  %v7603_v16 = vor.u32 %v8883_v3, %v7602_v2 }
 0x1ee   :  { %4825 = vmatpush.bf16.msrb.mxu3 %v7059_v32  ;;  %v8791_v32 = vld [vmem:[#allocation6 + $0x874] sm:$0xf0]  ;;  %v7458_v61 = vld [vmem:[#allocation6 + $0xa28] sm:$0xf] }
 0x1ef   :  { %4787 = vmatmul.bf16.vlgmr.msrb.gmra.mxu0 %v9507_v37  ;;  %4800 = vmatmul.bf16.vlgmr.msrb.gmra.mxu1 %v9509_v46  ;;  %v7235_v48 = vor.u32 %v8791_v32, %v7234_v31  ;;  %v8847_v22 = vld [vmem:[#allocation6 + $0xa34] sm:$0xf0]  ;;  %v7442_v31 = vld [vmem:[#allocation6 + $0xa08] sm:$0xf] }
 0x1f0   :  { %4831 = vmatpush.bf16.msra.mxu0 %v7299_v33  ;;  %4844 = vmatpush.bf16.msra.mxu1 %v7427_v34  ;;  %v7362_v33 = vld [vmem:[#allocation6 + $0x968] sm:$0xf]  ;;  %v4594_v34 = vadd.f32 %v4593_v28, %v4581_v27  ;;  %v8879_v17 = vld [vmem:[#allocation6 + $0xb34] sm:$0xf0] }
 0x1f1   :  { %4857 = vmatpush.bf16.msra.mxu2 %v7555_v36  ;;  %4826 = vmatmul.bf16.vlgmr.msrb.gmra.mxu3 %v9515_v11  ;;  %v7635_v36 = vor.u32 %v8891_v0, %v7634_v26  ;;  %v7363_v19 = vor.u32 %v8823_v40, %v7362_v33  ;;  %v7186_v0 = vld [vmem:[#allocation6 + $0x808] sm:$0xf]  ;;  %v8779_v27 = vld [vmem:[#allocation6 + $0x814] sm:$0xf0]  ;;  %v7587_v32 = vor.u32 %v8879_v17, %v7586_v24 }
 0x1f2   :  { %4870 = vmatpush.bf16.msra.mxu3 %v7683_v47  ;;  %4813 = vmatmul.bf16.vlgmr.msrb.gmra.mxu2 %v9513_v9  ;;  %v8887_v47 = vld [vmem:[#allocation6 + $0xb74] sm:$0xf0]  ;;  %v7810_v43 = vld [vmem:[#allocation6 + $0xce8] sm:$0xf] }
 0x1f3   :  { %v8875_v40 = vld [vmem:[#allocation6 + $0xb14] sm:$0xf0]  ;;  %v7922_v2 = vld [vmem:[#allocation6 + $0xdc8] sm:$0xf] }
 0x1f4   :  { %4832 = vmatpush.bf16.msra.mxu0 %v7283_v54  ;;  %4845 = vmatpush.bf16.msra.mxu1 %v7411_v56  ;;  %v7619_v54 = vor.u32 %v8887_v47, %v7618_v45  ;;  %v8819_v56 = vld [vmem:[#allocation6 + $0x954] sm:$0xf0]  ;;  %v4619_v60 = vpop.f32.mrf.mxu3  ;;  %v4595_v4 = vpop.f32.mrf.mxu1  ;;  %v7938_v47 = vld [vmem:[#allocation6 + $0xde8] sm:$0xf] }
 0x1f5   :  { %4858 = vmatpush.bf16.msra.mxu2 %v7539_v57  ;;  %v4606_v55 = vpop.f32.mrf.mxu2  ;;  %v7474_v57 = vld [vmem:[#allocation6 + $0xa48] sm:$0xf]  ;;  %v8935_v45 = vld [vmem:[#allocation6 + $0xcf4] sm:$0xf0] }
 0x1f6   :  { %4871 = vmatpush.bf16.msra.mxu3 %v7667_v63  ;;  %v4607_v59 = vadd.f32 %v4606_v55, %v4594_v34  ;;  %v4582_v63 = vpop.f32.mrf.mxu0  ;;  %v8843_v34 = vld [vmem:[#allocation6 + $0xa14] sm:$0xf0] }
 0x1f7   :  { %v8999_v49 = vld [vmem:[#allocation6 + $0xef4] sm:$0xf0] }
 0x1f8   :  { %4833 = vmatpush.bf16.msra.mxu0 %v7267_v8  ;;  %4846 = vmatpush.bf16.msra.mxu1 %v7395_v12  ;;  %v9585_v7 = vadd.f32 %v4619_v60, %v4607_v59  ;;  %v7347_v8 = vor.u32 %v8819_v56, %v7346_v52  ;;  %v7475_v12 = vor.u32 %v8851_v58, %v7474_v57  ;;  %v9031_v55 = vld [vmem:[#allocation6 + $0xff4] sm:$0xf0]  ;;  %v7794_v60 = vld [vmem:[#allocation6 + $0xcc8] sm:$0xf] }
 0x1f9   :  { %4859 = vmatpush.bf16.msra.mxu2 %v7523_v13  ;;  %v7202_v13 = vld [vmem:[#allocation6 + $0x828] sm:$0xf]  ;;  %v7443_v52 = vor.u32 %v8843_v34, %v7442_v31  ;;  %v7811_v57 = vor.u32 %v8935_v45, %v7810_v43  ;;  %v8931_v63 = vld [vmem:[#allocation6 + $0xcd4] sm:$0xf0] }
 0x1fa   :  { %4872 = vmatpush.bf16.msra.mxu3 %v7651_v18  ;;  %v8815_v18 = vld [vmem:[#allocation6 + $0x934] sm:$0xf0]  ;;  %v7203_v26 = vor.u32 %v8783_v14, %v7202_v13  ;;  %v7795_v14 = vor.u32 %v8931_v63, %v7794_v60  ;;  %v7762_v31 = vld [vmem:[#allocation6 + $0xc88] sm:$0xf] }
 0x1fb   :  { %v7331_v28 = vor.u32 %v8815_v18, %v7330_v15  ;;  %v8963_v4 = vld [vmem:[#allocation6 + $0xdd4] sm:$0xf0]  ;;  %v7778_v18 = vld [vmem:[#allocation6 + $0xca8] sm:$0xf] }
 0x1fc   :  { %4834 = vmatpush.bf16.msra.mxu0 %v7251_v29  ;;  %4847 = vmatpush.bf16.msra.mxu1 %v7379_v30  ;;  %v7459_v29 = vor.u32 %v8847_v22, %v7458_v61  ;;  %v7314_v30 = vld [vmem:[#allocation6 + $0x908] sm:$0xf]  ;;  %v4621_v25 = vpop.f32.mrf.mxu3  ;;  %v9027_v13 = vld [vmem:[#allocation6 + $0xfd4] sm:$0xf0]  ;;  %v7923_v15 = vor.u32 %v8963_v4, %v7922_v2 }
 0x1fd   :  { %4860 = vmatpush.bf16.msra.mxu2 %v7507_v23  ;;  %v8811_v23 = vld [vmem:[#allocation6 + $0x914] sm:$0xf0]  ;;  %v4608_v33 = vpop.f32.mrf.mxu2  ;;  %v7906_v22 = vld [vmem:[#allocation6 + $0xda8] sm:$0xf] }
 0x1fe   :  { %4873 = vmatpush.bf16.msra.mxu3 %v7635_v36  ;;  %v7570_v36 = vld [vmem:[#allocation6 + $0xb08] sm:$0xf]  ;;  %v7315_v50 = vor.u32 %v8811_v23, %v7314_v30  ;;  %v8927_v61 = vld [vmem:[#allocation6 + $0xcb4] sm:$0xf0] }
 0x1ff   :  { %v7571_v56 = vor.u32 %v8875_v40, %v7570_v36  ;;  %v8959_v17 = vld [vmem:[#allocation6 + $0xdb4] sm:$0xf0]  ;;  %v7890_v33 = vld [vmem:[#allocation6 + $0xd88] sm:$0xf] }
 0x200   :  { %4835 = vmatpush.bf16.msra.mxu0 %v7235_v48  ;;  %4848 = vmatpush.bf16.msra.mxu1 %v7363_v19  ;;  %v7187_v48 = vor.u32 %v8779_v27, %v7186_v0  ;;  %v8967_v19 = vld [vmem:[#allocation6 + $0xdf4] sm:$0xf0]  ;;  %v8162_v27 = vld [vmem:[#allocation6 + $0xfa8] sm:$0xf]  ;;  %v7907_v30 = vor.u32 %v8959_v17, %v7906_v22 }
 0x201   :  { %4861 = vmatpush.bf16.msra.mxu2 %v7491_v35  ;;  %v8066_v35 = vld [vmem:[#allocation6 + $0xee8] sm:$0xf]  ;;  %v7939_v58 = vor.u32 %v8967_v19, %v7938_v47  ;;  %v8991_v0 = vld [vmem:[#allocation6 + $0xeb4] sm:$0xf0] }
 0x202   :  { %4874 = vmatpush.bf16.msra.mxu3 %v7619_v54  ;;  %v8194_v54 = vld [vmem:[#allocation6 + $0xfe8] sm:$0xf]  ;;  %v8067_v59 = vor.u32 %v8999_v49, %v8066_v35  ;;  %v8955_v36 = vld [vmem:[#allocation6 + $0xd94] sm:$0xf0] }
 0x203   :  { %v8195_v3 = vor.u32 %v9031_v55, %v8194_v54  ;;  %v8018_v40 = vld [vmem:[#allocation6 + $0xe88] sm:$0xf]  ;;  %v8987_v25 = vld [vmem:[#allocation6 + $0xe94] sm:$0xf0]  ;;  %v7891_v49 = vor.u32 %v8955_v36, %v7890_v33 }
 0x204   :  { %4836 = vmatpush.bf16.msra.mxu0 %v7219_v6  ;;  %4849 = vmatpush.bf16.msra.mxu1 %v7347_v8  ;;  %v8050_v6 = vld [vmem:[#allocation6 + $0xec8] sm:$0xf]  ;;  %v8995_v8 = vld [vmem:[#allocation6 + $0xed4] sm:$0xf0] }
 0x205   :  { %4862 = vmatpush.bf16.msra.mxu2 %v7475_v12  ;;  %v8178_v12 = vld [vmem:[#allocation6 + $0xfc8] sm:$0xf]  ;;  %v9019_v47 = vld [vmem:[#allocation6 + $0xf94] sm:$0xf0] }
 0x206   :  { %4875 = vmatpush.bf16.msra.mxu3 %v7603_v16  ;;  %v8051_v16 = vor.u32 %v8995_v8, %v8050_v6  ;;  %v8179_v24 = vor.u32 %v9027_v13, %v8178_v12  ;;  %v8146_v45 = vld [vmem:[#allocation6 + $0xf88] sm:$0xf]  ;;  %v8919_v54 = vld [vmem:[#allocation6 + $0xc74] sm:$0xf0] }
 0x207   :  { %v7874_v55 = vld [vmem:[#allocation6 + $0xd68] sm:$0xf]  ;;  %v8983_v60 = vld [vmem:[#allocation6 + $0xe74] sm:$0xf0] }
 0x208   :  { %4837 = vmatpush.bf16.msra.mxu0 %v7203_v26  ;;  %4850 = vmatpush.bf16.msra.mxu1 %v7331_v28  ;;  %v8034_v26 = vld [vmem:[#allocation6 + $0xea8] sm:$0xf]  ;;  %v9023_v28 = vld [vmem:[#allocation6 + $0xfb4] sm:$0xf0] }
 0x209   :  { %4863 = vmatpush.bf16.msra.mxu2 %v7459_v29  ;;  %v7779_v29 = vor.u32 %v8927_v61, %v7778_v18  ;;  %v8035_v23 = vor.u32 %v8991_v0, %v8034_v26  ;;  %v8163_v34 = vor.u32 %v9023_v28, %v8162_v27  ;;  %v8130_v63 = vld [vmem:[#allocation6 + $0xf68] sm:$0xf]  ;;  %v9015_v2 = vld [vmem:[#allocation6 + $0xf74] sm:$0xf0] }
 0x20a   :  { %4876 = vmatpush.bf16.msra.mxu3 %v7587_v32  ;;  %v8923_v32 = vld [vmem:[#allocation6 + $0xc94] sm:$0xf0]  ;;  %v7730_v6 = vld [vmem:[#allocation6 + $0xc48] sm:$0xf]  ;;  %v8131_v13 = vor.u32 %v9015_v2, %v8130_v63  ;;  %v6276_v63 = vld [vmem:[#allocation6 + $0xf8] sm:$0xf0] }
 0x20b   :  { %v7763_v35 = vor.u32 %v8923_v32, %v7762_v31  ;;  %v8915_v8 = vld [vmem:[#allocation6 + $0xc54] sm:$0xf0]  ;;  %v7858_v12 = vld [vmem:[#allocation6 + $0xd48] sm:$0xf]  ;;  %v8581_v2 = vld [vmem:[#allocation6 + $0x1ec] sm:$0xf] }
 0x20c   :  { %4838 = vmatpush.bf16.msra.mxu0 %v7187_v48  ;;  %4851 = vmatpush.bf16.msra.mxu1 %v7315_v50  ;;  %v4632_v43 = vpop.f32.mrf.mxu0  ;;  %v4645_v19 = vpop.f32.mrf.mxu1  ;;  %v8019_v50 = vor.u32 %v8987_v25, %v8018_v40  ;;  %v8979_v18 = vld [vmem:[#allocation6 + $0xe54] sm:$0xf0]  ;;  %v8114_v17 = vld [vmem:[#allocation6 + $0xf48] sm:$0xf]  ;;  %v7731_v27 = vor.u32 %v8915_v8, %v7730_v6  ;;  %v6532_v6 = vld [vmem:[#allocation6 + $0x2f8] sm:$0xf0] }
 0x20d   :  { %4864 = vmatpush.bf16.msra.mxu2 %v7443_v52  ;;  %v4633_v48 = vadd.f32 %v4632_v43, %v9585_v7  ;;  %v7746_v52 = vld [vmem:[#allocation6 + $0xc68] sm:$0xf]  ;;  %v9011_v26 = vld [vmem:[#allocation6 + $0xf54] sm:$0xf0] }
 0x20e   :  { %4877 = vmatpush.bf16.msra.mxu3 %v7571_v56  ;;  %v8911_v31 = vld [vmem:[#allocation6 + $0xc34] sm:$0xf0]  ;;  %v7842_v32 = vld [vmem:[#allocation6 + $0xd28] sm:$0xf]  ;;  %v8115_v33 = vor.u32 %v9011_v26, %v8114_v17  ;;  %v8577_v17 = vld [vmem:[#allocation6 + $0x1cc] sm:$0xf] }
 0x20f   :  { %4839 = vmatmul.bf16.vlgmr.msra.gmra.mxu0 %v9525_v44  ;;  %4852 = vmatmul.bf16.vlgmr.msra.gmra.mxu1 %v9527_v53  ;;  %v4646_v56 = vadd.f32 %v4645_v19, %v4633_v48  ;;  %v7970_v36 = vld [vmem:[#allocation6 + $0xe28] sm:$0xf]  ;;  %v8975_v40 = vld [vmem:[#allocation6 + $0xe34] sm:$0xf0] }
 0x210   :  { %4883 = vmatpush.bf16.msrb.mxu0 %v7811_v57  ;;  %4896 = vmatpush.bf16.msrb.mxu1 %v7939_v58  ;;  %v8147_v57 = vor.u32 %v9019_v47, %v8146_v45  ;;  %v8951_v58 = vld [vmem:[#allocation6 + $0xd74] sm:$0xf0]  ;;  %v8098_v25 = vld [vmem:[#allocation6 + $0xf28] sm:$0xf] }
 0x211   :  { %4909 = vmatpush.bf16.msrb.mxu2 %v8067_v59  ;;  %4878 = vmatmul.bf16.vlgmr.msra.gmra.mxu3 %v9533_v21  ;;  %v8002_v59 = vld [vmem:[#allocation6 + $0xe68] sm:$0xf]  ;;  %v7875_v7 = vor.u32 %v8951_v58, %v7874_v55  ;;  %v9007_v43 = vld [vmem:[#allocation6 + $0xf34] sm:$0xf0] }
 0x212   :  { %4922 = vmatpush.bf16.msrb.mxu3 %v8195_v3  ;;  %4865 = vmatmul.bf16.vlgmr.msra.gmra.mxu2 %v9531_v20  ;;  %v7747_v3 = vor.u32 %v8919_v54, %v7746_v52  ;;  %v8003_v4 = vor.u32 %v8983_v60, %v8002_v59  ;;  %v7698_v47 = vld [vmem:[#allocation6 + $0xc08] sm:$0xf]  ;;  %v8907_v48 = vld [vmem:[#allocation6 + $0xc14] sm:$0xf0]  ;;  %v8099_v54 = vor.u32 %v9007_v43, %v8098_v25  ;;  %v8549_v60 = vld [vmem:[#allocation6 + $0xec] sm:$0xf] }
 0x213   :  { %v7954_v52 = vld [vmem:[#allocation6 + $0xe08] sm:$0xf]  ;;  %v9003_v58 = vld [vmem:[#allocation6 + $0xf14] sm:$0xf0]  ;;  %v6372_v43 = vld [vmem:[#allocation6 + $0x1b8] sm:$0xf0] }
 0x214   :  { %4884 = vmatpush.bf16.msrb.mxu0 %v7795_v14  ;;  %4897 = vmatpush.bf16.msrb.mxu1 %v7923_v15  ;;  %v8947_v15 = vld [vmem:[#allocation6 + $0xd54] sm:$0xf0]  ;;  %v4671_v22 = vpop.f32.mrf.mxu3  ;;  %v4647_v0 = vpop.f32.mrf.mxu1 }
 0x215   :  { %4910 = vmatpush.bf16.msrb.mxu2 %v8051_v16  ;;  %v4658_v14 = vpop.f32.mrf.mxu2  ;;  %v7986_v16 = vld [vmem:[#allocation6 + $0xe48] sm:$0xf]  ;;  %v6388_v0 = vld [vmem:[#allocation6 + $0x1d8] sm:$0xf0] }
 0x216   :  { %4923 = vmatpush.bf16.msrb.mxu3 %v8179_v24  ;;  %v4659_v61 = vadd.f32 %v4658_v14, %v4646_v56  ;;  %v4634_v24 = vpop.f32.mrf.mxu0  ;;  %v8971_v56 = vld [vmem:[#allocation6 + $0xe14] sm:$0xf0]  ;;  %v6660_v14 = vld [vmem:[#allocation6 + $0x3f8] sm:$0xf0] }
 0x217   :  { %v6260_v24 = vld [vmem:[#allocation6 + $0xd8] sm:$0xf0] }
 0x218   :  { %4885 = vmatpush.bf16.msrb.mxu0 %v7779_v29  ;;  %4898 = vmatpush.bf16.msrb.mxu1 %v7907_v30  ;;  %v9592_v28 = vadd.f32 %v4671_v22, %v4659_v61  ;;  %v7859_v29 = vor.u32 %v8947_v15, %v7858_v12  ;;  %v7987_v30 = vor.u32 %v8979_v18, %v7986_v16  ;;  %v8545_v22 = vld [vmem:[#allocation6 + $0xcc] sm:$0xf] }
 0x219   :  { %4911 = vmatpush.bf16.msrb.mxu2 %v8035_v23  ;;  %v7714_v23 = vld [vmem:[#allocation6 + $0xc28] sm:$0xf]  ;;  %v7955_v12 = vor.u32 %v8971_v56, %v7954_v52  ;;  %v6279_v16 = vor.u32 %v8549_v60, %v6276_v63  ;;  %v8537_v52 = vld [vmem:[#allocation6 + $0x8c] sm:$0xf] }
 0x21a   :  { %4924 = vmatpush.bf16.msrb.mxu3 %v8163_v34  ;;  %v8943_v34 = vld [vmem:[#allocation6 + $0xd34] sm:$0xf0]  ;;  %v7715_v45 = vor.u32 %v8911_v31, %v7714_v23  ;;  %v6644_v23 = vld [vmem:[#allocation6 + $0x3d8] sm:$0xf0]  ;;  %v6263_v31 = vor.u32 %v8545_v22, %v6260_v24  ;;  %v8633_v63 = vld [vmem:[#allocation6 + $0x38c] sm:$0xf] }
 0x21b   :  { %v7843_v19 = vor.u32 %v8943_v34, %v7842_v32  ;;  %v6391_v32 = vor.u32 %v8577_v17, %v6388_v0  ;;  %v8541_v34 = vld [vmem:[#allocation6 + $0xac] sm:$0xf]  ;;  %v6468_v22 = vld [vmem:[#allocation6 + $0x278] sm:$0xf0] }
 0x21c   :  { %4886 = vmatpush.bf16.msrb.mxu0 %v7763_v35  ;;  %4899 = vmatpush.bf16.msrb.mxu1 %v7891_v49  ;;  %v7971_v35 = vor.u32 %v8975_v40, %v7970_v36  ;;  %v7826_v49 = vld [vmem:[#allocation6 + $0xd08] sm:$0xf]  ;;  %v4673_v59 = vpop.f32.mrf.mxu3  ;;  %v6244_v36 = vld [vmem:[#allocation6 + $0xb8] sm:$0xf0]  ;;  %v8573_v40 = vld [vmem:[#allocation6 + $0x1ac] sm:$0xf] }
 0x21d   :  { %4912 = vmatpush.bf16.msrb.mxu2 %v8019_v50  ;;  %v8939_v50 = vld [vmem:[#allocation6 + $0xd14] sm:$0xf0]  ;;  %v4660_v55 = vpop.f32.mrf.mxu2  ;;  %v6484_v59 = vld [vmem:[#allocation6 + $0x298] sm:$0xf0]  ;;  %v8629_v24 = vld [vmem:[#allocation6 + $0x36c] sm:$0xf] }
 0x21e   :  { %4925 = vmatpush.bf16.msrb.mxu3 %v8147_v57  ;;  %v8082_v57 = vld [vmem:[#allocation6 + $0xf08] sm:$0xf]  ;;  %v7827_v8 = vor.u32 %v8939_v50, %v7826_v49  ;;  %v6375_v49 = vor.u32 %v8573_v40, %v6372_v43  ;;  %v8569_v55 = vld [vmem:[#allocation6 + $0x18c] sm:$0xf]  ;;  %v6596_v17 = vld [vmem:[#allocation6 + $0x378] sm:$0xf0] }
 0x21f   :  { %v8083_v15 = vor.u32 %v9003_v58, %v8082_v57  ;;  %v6356_v57 = vld [vmem:[#allocation6 + $0x198] sm:$0xf0]  ;;  %v8601_v58 = vld [vmem:[#allocation6 + $0x28c] sm:$0xf] }
 0x220   :  { %4887 = vmatpush.bf16.msrb.mxu0 %v7747_v3  ;;  %4900 = vmatpush.bf16.msrb.mxu1 %v7875_v7  ;;  %v7699_v3 = vor.u32 %v8907_v48, %v7698_v47  ;;  %v6404_v7 = vld [vmem:[#allocation6 + $0x1f8] sm:$0xf0]  ;;  %v8637_v48 = vld [vmem:[#allocation6 + $0x3ac] sm:$0xf] }
 0x221   :  { %4913 = vmatpush.bf16.msrb.mxu2 %v8003_v4  ;;  %v8613_v4 = vld [vmem:[#allocation6 + $0x2ec] sm:$0xf]  ;;  %v6407_v18 = vor.u32 %v8581_v2, %v6404_v7  ;;  %v6500_v47 = vld [vmem:[#allocation6 + $0x2b8] sm:$0xf0] }
 0x222   :  { %4926 = vmatpush.bf16.msrb.mxu3 %v8131_v13  ;;  %v8645_v13 = vld [vmem:[#allocation6 + $0x3ec] sm:$0xf]  ;;  %v6535_v61 = vor.u32 %v8613_v4, %v6532_v6  ;;  %v6612_v2 = vld [vmem:[#allocation6 + $0x398] sm:$0xf0]  ;;  %v6359_v6 = vor.u32 %v8569_v55, %v6356_v57 }
 0x223   :  { %v6663_v26 = vor.u32 %v8645_v13, %v6660_v14  ;;  %v6212_v13 = vld [vmem:[#allocation6 + $0x78] sm:$0xf0]  ;;  %v8565_v14 = vld [vmem:[#allocation6 + $0x16c] sm:$0xf] }
 0x224   :  { %4888 = vmatpush.bf16.msrb.mxu0 %v7731_v27  ;;  %4901 = vmatpush.bf16.msrb.mxu1 %v7859_v29  ;;  %v8609_v27 = vld [vmem:[#allocation6 + $0x2cc] sm:$0xf]  ;;  %v6516_v29 = vld [vmem:[#allocation6 + $0x2d8] sm:$0xf0] }
 0x225   :  { %4914 = vmatpush.bf16.msrb.mxu2 %v7987_v30  ;;  %v8641_v30 = vld [vmem:[#allocation6 + $0x3cc] sm:$0xf] }
 0x226   :  { %4927 = vmatpush.bf16.msrb.mxu3 %v8115_v33  ;;  %v6519_v33 = vor.u32 %v8609_v27, %v6516_v29  ;;  %v6647_v25 = vor.u32 %v8641_v30, %v6644_v23  ;;  %v8529_v27 = vld [vmem:[#allocation6 + $0x4c] sm:$0xf]  ;;  %v6196_v29 = vld [vmem:[#allocation6 + $0x58] sm:$0xf0]  ;;  %v6599_v23 = vor.u32 %v8629_v24, %v6596_v17 }
 0x227   :  { %v8561_v30 = vld [vmem:[#allocation6 + $0x14c] sm:$0xf]  ;;  %v6788_v24 = vld [vmem:[#allocation6 + $0x4f8] sm:$0xf0] }
 0x228   :  { %4889 = vmatpush.bf16.msrb.mxu0 %v7715_v45  ;;  %4902 = vmatpush.bf16.msrb.mxu1 %v7843_v19  ;;  %v8605_v45 = vld [vmem:[#allocation6 + $0x2ac] sm:$0xf]  ;;  %v6628_v19 = vld [vmem:[#allocation6 + $0x3b8] sm:$0xf0] }
 0x229   :  { %4915 = vmatpush.bf16.msrb.mxu2 %v7971_v35  ;;  %v6247_v35 = vor.u32 %v8541_v34, %v6244_v36  ;;  %v6503_v50 = vor.u32 %v8605_v45, %v6500_v47  ;;  %v6631_v56 = vor.u32 %v8637_v48, %v6628_v19  ;;  %v6452_v34 = vld [vmem:[#allocation6 + $0x258] sm:$0xf0]  ;;  %v8625_v43 = vld [vmem:[#allocation6 + $0x34c] sm:$0xf]  ;;  %v6199_v48 = vor.u32 %v8529_v27, %v6196_v29 }
 0x22a   :  { %4928 = vmatpush.bf16.msrb.mxu3 %v8099_v54  ;;  %v6228_v54 = vld [vmem:[#allocation6 + $0x98] sm:$0xf0]  ;;  %v8589_v57 = vld [vmem:[#allocation6 + $0x22c] sm:$0xf] }
 0x22b   :  { %v6231_v4 = vor.u32 %v8537_v52, %v6228_v54  ;;  %v6580_v45 = vld [vmem:[#allocation6 + $0x358] sm:$0xf0]  ;;  %v8557_v54 = vld [vmem:[#allocation6 + $0x12c] sm:$0xf] }
 0x22c   :  { %4890 = vmatpush.bf16.msrb.mxu0 %v7699_v3  ;;  %4903 = vmatpush.bf16.msrb.mxu1 %v7827_v8  ;;  %v4684_v60 = vpop.f32.mrf.mxu0  ;;  %v4697_v7 = vpop.f32.mrf.mxu1  ;;  %v6487_v8 = vor.u32 %v8601_v58, %v6484_v59  ;;  %v6180_v52 = vld [vmem:[#allocation6 + $0x38] sm:$0xf0]  ;;  %v6583_v55 = vor.u32 %v8625_v43, %v6580_v45  ;;  %v8621_v59 = vld [vmem:[#allocation6 + $0x32c] sm:$0xf] }
 0x22d   :  { %4916 = vmatpush.bf16.msrb.mxu2 %v7955_v12  ;;  %v4685_v3 = vadd.f32 %v4684_v60, %v9592_v28  ;;  %v8533_v12 = vld [vmem:[#allocation6 + $0x6c] sm:$0xf]  ;;  %v6436_v58 = vld [vmem:[#allocation6 + $0x238] sm:$0xf0] }
 0x22e   :  { %4929 = vmatpush.bf16.msrb.mxu3 %v8083_v15  ;;  %v6564_v60 = vld [vmem:[#allocation6 + $0x338] sm:$0xf0]  ;;  %v8709_v17 = vld [vmem:[#allocation6 + $0x5ec] sm:$0xf] }
 0x22f   :  { %4891 = vmatmul.bf16.vlgmr.msrb.gmra.mxu0 %v9540_v62  ;;  %4904 = vmatmul.bf16.vlgmr.msrb.gmra.mxu1 %v9543_v1  ;;  %v4698_v15 = vadd.f32 %v4697_v7, %v4685_v3  ;;  %v6164_v3 = vld [vmem:[#allocation6 + $0x18] sm:$0xf0]  ;;  %v8705_v43 = vld [vmem:[#allocation6 + $0x5cc] sm:$0xf] }
 0x230   :  { %4935 = vmatpush.bf16.msra.mxu0 %v6279_v16  ;;  %4948 = vmatpush.bf16.msra.mxu1 %v6407_v18  ;;  %v6615_v16 = vor.u32 %v8633_v63, %v6612_v2  ;;  %v6340_v18 = vld [vmem:[#allocation6 + $0x178] sm:$0xf0]  ;;  %v8521_v2 = vld [vmem:[#allocation6 + $0xc] sm:$0xf] }
 0x231   :  { %4961 = vmatpush.bf16.msra.mxu2 %v6535_v61  ;;  %4930 = vmatmul.bf16.vlgmr.msrb.gmra.mxu3 %v9549_v42  ;;  %v8597_v61 = vld [vmem:[#allocation6 + $0x26c] sm:$0xf]  ;;  %v6343_v28 = vor.u32 %v8565_v14, %v6340_v18  ;;  %v6548_v18 = vld [vmem:[#allocation6 + $0x318] sm:$0xf0] }
 0x232   :  { %4974 = vmatpush.bf16.msra.mxu3 %v6663_v26  ;;  %4917 = vmatmul.bf16.vlgmr.msrb.gmra.mxu2 %v9547_v38  ;;  %v6215_v26 = vor.u32 %v8533_v12, %v6212_v13  ;;  %v6471_v0 = vor.u32 %v8597_v61, %v6468_v22  ;;  %v8585_v12 = vld [vmem:[#allocation6 + $0x20c] sm:$0xf]  ;;  %v6567_v13 = vor.u32 %v8621_v59, %v6564_v60  ;;  %v7044_v27 = vld [vmem:[#allocation6 + $0x6f8] sm:$0xf0] }
 0x233   :  { %v8677_v22 = vld [vmem:[#allocation6 + $0x4ec] sm:$0xf]  ;;  %v6884_v60 = vld [vmem:[#allocation6 + $0x5b8] sm:$0xf0] }
 0x234   :  { %4936 = vmatpush.bf16.msra.mxu0 %v6263_v31  ;;  %4949 = vmatpush.bf16.msra.mxu1 %v6391_v32  ;;  %v6324_v32 = vld [vmem:[#allocation6 + $0x158] sm:$0xf0]  ;;  %v4723_v40 = vpop.f32.mrf.mxu3  ;;  %v4699_v47 = vpop.f32.mrf.mxu1 }
 0x235   :  { %4962 = vmatpush.bf16.msra.mxu2 %v6519_v33  ;;  %v4710_v31 = vpop.f32.mrf.mxu2  ;;  %v8593_v33 = vld [vmem:[#allocation6 + $0x24c] sm:$0xf]  ;;  %v6900_v47 = vld [vmem:[#allocation6 + $0x5d8] sm:$0xf0] }
 0x236   :  { %4975 = vmatpush.bf16.msra.mxu3 %v6647_v25  ;;  %v4711_v36 = vadd.f32 %v4710_v31, %v4698_v15  ;;  %v4686_v25 = vpop.f32.mrf.mxu0  ;;  %v6420_v15 = vld [vmem:[#allocation6 + $0x218] sm:$0xf0] }
 0x237   :  { %v7172_v31 = vld [vmem:[#allocation6 + $0x7f8] sm:$0xf0] }
 0x238   :  { %4937 = vmatpush.bf16.msra.mxu0 %v6247_v35  ;;  %4950 = vmatpush.bf16.msra.mxu1 %v6375_v49  ;;  %v9599_v19 = vadd.f32 %v4723_v40, %v4711_v36  ;;  %v6327_v35 = vor.u32 %v8561_v30, %v6324_v32  ;;  %v6455_v49 = vor.u32 %v8593_v33, %v6452_v34  ;;  %v8673_v40 = vld [vmem:[#allocation6 + $0x4cc] sm:$0xf]  ;;  %v6772_v25 = vld [vmem:[#allocation6 + $0x4d8] sm:$0xf0] }
 0x239   :  { %4963 = vmatpush.bf16.msra.mxu2 %v6503_v50  ;;  %v8525_v50 = vld [vmem:[#allocation6 + $0x2c] sm:$0xf]  ;;  %v6423_v30 = vor.u32 %v8585_v12, %v6420_v15  ;;  %v6791_v33 = vor.u32 %v8677_v22, %v6788_v24  ;;  %v7124_v22 = vld [vmem:[#allocation6 + $0x798] sm:$0xf0] }
 0x23a   :  { %4976 = vmatpush.bf16.msra.mxu3 %v6631_v56  ;;  %v6308_v56 = vld [vmem:[#allocation6 + $0x138] sm:$0xf0]  ;;  %v6183_v63 = vor.u32 %v8525_v50, %v6180_v52  ;;  %v6775_v52 = vor.u32 %v8673_v40, %v6772_v25  ;;  %v8697_v15 = vld [vmem:[#allocation6 + $0x58c] sm:$0xf] }
 0x23b   :  { %v6311_v7 = vor.u32 %v8557_v54, %v6308_v56  ;;  %v7156_v50 = vld [vmem:[#allocation6 + $0x7d8] sm:$0xf0]  ;;  %v6903_v54 = vor.u32 %v8705_v43, %v6900_v47  ;;  %v8669_v56 = vld [vmem:[#allocation6 + $0x4ac] sm:$0xf] }
 0x23c   :  { %4938 = vmatpush.bf16.msra.mxu0 %v6231_v4  ;;  %4951 = vmatpush.bf16.msra.mxu1 %v6359_v6  ;;  %v6439_v4 = vor.u32 %v8589_v57, %v6436_v58  ;;  %v8553_v6 = vld [vmem:[#allocation6 + $0x10c] sm:$0xf]  ;;  %v4725_v61 = vpop.f32.mrf.mxu3  ;;  %v6756_v57 = vld [vmem:[#allocation6 + $0x4b8] sm:$0xf0] }
 0x23d   :  { %4964 = vmatpush.bf16.msra.mxu2 %v6487_v8  ;;  %v6292_v8 = vld [vmem:[#allocation6 + $0x118] sm:$0xf0]  ;;  %v4712_v14 = vpop.f32.mrf.mxu2  ;;  %v8701_v58 = vld [vmem:[#allocation6 + $0x5ac] sm:$0xf] }
 0x23e   :  { %4977 = vmatpush.bf16.msra.mxu3 %v6615_v16  ;;  %v8617_v16 = vld [vmem:[#allocation6 + $0x30c] sm:$0xf]  ;;  %v6295_v29 = vor.u32 %v8553_v6, %v6292_v8  ;;  %v9605_v6 = vld [vmem:[#allocation7] sm:$0xf]  ;;  %v6740_v14 = vld [vmem:[#allocation6 + $0x498] sm:$0xf0] }
 0x23f   :  { %v6551_v32 = vor.u32 %v8617_v16, %v6548_v18  ;;  %v1745_v8 = vperm.slane %v9605_v6, 2  ;;  %v8729_v16 = vld [vmem:[#allocation6 + $0x68c] sm:$0xf]  ;;  %v6996_v18 = vld [vmem:[#allocation6 + $0x698] sm:$0xf0] }
 0x240   :  { %4939 = vmatpush.bf16.msra.mxu0 %v6215_v26  ;;  %4952 = vmatpush.bf16.msra.mxu1 %v6343_v28  ;;  %v6167_v26 = vor.u32 %v8521_v2, %v6164_v3  ;;  %v6916_v28 = vld [vmem:[#allocation6 + $0x5f8] sm:$0xf0]  ;;  %v8765_v3 = vld [vmem:[#allocation6 + $0x7ac] sm:$0xf] }
 0x241   :  { %4965 = vmatpush.bf16.msra.mxu2 %v6471_v0  ;;  %v8741_v0 = vld [vmem:[#allocation6 + $0x6ec] sm:$0xf]  ;;  %v6919_v34 = vor.u32 %v8709_v17, %v6916_v28  ;;  %v7012_v2 = vld [vmem:[#allocation6 + $0x6b8] sm:$0xf0] }
 0x242   :  { %4978 = vmatpush.bf16.msra.mxu3 %v6599_v23  ;;  %v8773_v23 = vld [vmem:[#allocation6 + $0x7ec] sm:$0xf]  ;;  %v7047_v36 = vor.u32 %v8741_v0, %v7044_v27  ;;  %v6999_v0 = vor.u32 %v8729_v16, %v6996_v18  ;;  %v7108_v40 = vld [vmem:[#allocation6 + $0x778] sm:$0xf0] }
 0x243   :  { %v7175_v45 = vor.u32 %v8773_v23, %v7172_v31  ;;  %v8661_v27 = vld [vmem:[#allocation6 + $0x46c] sm:$0xf]  ;;  %v7076_v16 = vld [vmem:[#allocation6 + $0x738] sm:$0xf0] }
 0x244   :  { %4940 = vmatpush.bf16.msra.mxu0 %v6199_v48  ;;  %4953 = vmatpush.bf16.msra.mxu1 %v6327_v35  ;;  %v8737_v48 = vld [vmem:[#allocation6 + $0x6cc] sm:$0xf]  ;;  %v7028_v35 = vld [vmem:[#allocation6 + $0x6d8] sm:$0xf0] }
 0x245   :  { %4966 = vmatpush.bf16.msra.mxu2 %v6455_v49  ;;  %v8769_v49 = vld [vmem:[#allocation6 + $0x7cc] sm:$0xf] }
 0x246   :  { %4979 = vmatpush.bf16.msra.mxu3 %v6583_v55  ;;  %v7031_v55 = vor.u32 %v8737_v48, %v7028_v35  ;;  %v7159_v59 = vor.u32 %v8769_v49, %v7156_v50  ;;  %v8657_v47 = vld [vmem:[#allocation6 + $0x44c] sm:$0xf]  ;;  %v6708_v48 = vld [vmem:[#allocation6 + $0x458] sm:$0xf0] }
 0x247   :  { %v8689_v35 = vld [vmem:[#allocation6 + $0x54c] sm:$0xf] }
 0x248   :  { %4941 = vmatpush.bf16.msra.mxu0 %v6183_v63  ;;  %4954 = vmatpush.bf16.msra.mxu1 %v6311_v7  ;;  %v8733_v63 = vld [vmem:[#allocation6 + $0x6ac] sm:$0xf]  ;;  %v7140_v7 = vld [vmem:[#allocation6 + $0x7b8] sm:$0xf0] }
 0x249   :  { %4967 = vmatpush.bf16.msra.mxu2 %v6439_v4  ;;  %v6759_v4 = vor.u32 %v8669_v56, %v6756_v57  ;;  %v7015_v12 = vor.u32 %v8733_v63, %v7012_v2  ;;  %v6711_v2 = vor.u32 %v8657_v47, %v6708_v48  ;;  %v8901_v48 = vld [vmem:[#allocation6 + $0xbec] sm:$0xf] }
 0x24a   :  { %4980 = vmatpush.bf16.msra.mxu3 %v6567_v13  ;;  %v8665_v13 = vld [vmem:[#allocation6 + $0x48c] sm:$0xf] }
 0x24c   :  { %4942 = vmatpush.bf16.msra.mxu0 %v6167_v26  ;;  %4955 = vmatpush.bf16.msra.mxu1 %v6295_v29  ;;  %v4736_v61 = vpop.f32.mrf.mxu0  ;;  %v4749_v17 = vpop.f32.mrf.mxu1  ;;  %v6743_v26 = vor.u32 %v8665_v13, %v6740_v14  ;;  %v6724_v29 = vld [vmem:[#allocation6 + $0x478] sm:$0xf0] }
 0x24d   :  { %4968 = vmatpush.bf16.msra.mxu2 %v6423_v30  ;;  %v4737_v24 = vadd.f32 %v4736_v61, %v1745_v8  ;;  %v8693_v30 = vld [vmem:[#allocation6 + $0x56c] sm:$0xf]  ;;  %v6727_v25 = vor.u32 %v8661_v27, %v6724_v29  ;;  %v6820_v14 = vld [vmem:[#allocation6 + $0x538] sm:$0xf0] }
 0x24e   :  { %4981 = vmatpush.bf16.msra.mxu3 %v6551_v32  ;;  %v6852_v32 = vld [vmem:[#allocation6 + $0x578] sm:$0xf0]  ;;  %v8653_v8 = vld [vmem:[#allocation6 + $0x42c] sm:$0xf] }
 0x24f   :  { %4943 = vmatmul.bf16.vlgmr.msra.gmra.mxu0 %v9491_v41  ;;  %4956 = vmatmul.bf16.vlgmr.msra.gmra.mxu1 %v9493_v51  ;;  %v6887_v41 = vor.u32 %v8701_v58, %v6884_v60  ;;  %v7143_v51 = vor.u32 %v8765_v3, %v7140_v7  ;;  %v4750_v23 = vadd.f32 %v4749_v17, %v4737_v24  ;;  %v7092_v60 = vld [vmem:[#allocation6 + $0x758] sm:$0xf0]  ;;  %v8649_v61 = vld [vmem:[#allocation6 + $0x40c] sm:$0xf] }
 0x250   :  { %4987 = vmatpush.bf16.msrb.mxu0 %v6791_v33  ;;  %5000 = vmatpush.bf16.msrb.mxu1 %v6919_v34  ;;  %v8725_v33 = vld [vmem:[#allocation6 + $0x66c] sm:$0xf]  ;;  %v6980_v34 = vld [vmem:[#allocation6 + $0x678] sm:$0xf0]  ;;  %v6855_v43 = vor.u32 %v8693_v30, %v6852_v32 }
 0x251   :  { %5013 = vmatpush.bf16.msrb.mxu2 %v7047_v36  ;;  %4982 = vmatmul.bf16.vlgmr.msra.gmra.mxu3 %v9499_v10  ;;  %v8761_v10 = vld [vmem:[#allocation6 + $0x78c] sm:$0xf]  ;;  %v6932_v29 = vld [vmem:[#allocation6 + $0x618] sm:$0xf0] }
 0x252   :  { %5026 = vmatpush.bf16.msrb.mxu3 %v7175_v45  ;;  %4969 = vmatmul.bf16.vlgmr.msra.gmra.mxu2 %v9497_v5  ;;  %v6868_v5 = vld [vmem:[#allocation6 + $0x598] sm:$0xf0]  ;;  %v7127_v31 = vor.u32 %v8761_v10, %v7124_v22  ;;  %v8757_v36 = vld [vmem:[#allocation6 + $0x76c] sm:$0xf]  ;;  %v6983_v45 = vor.u32 %v8725_v33, %v6980_v34 }
 0x253   :  { %v6871_v28 = vor.u32 %v8697_v15, %v6868_v5  ;;  %v7111_v49 = vor.u32 %v8757_v36, %v7108_v40  ;;  %v8717_v15 = vld [vmem:[#allocation6 + $0x62c] sm:$0xf]  ;;  %v6676_v10 = vld [vmem:[#allocation6 + $0x418] sm:$0xf0] }
 0x254   :  { %4988 = vmatpush.bf16.msrb.mxu0 %v6775_v52  ;;  %5001 = vmatpush.bf16.msrb.mxu1 %v6903_v54  ;;  %v6836_v52 = vld [vmem:[#allocation6 + $0x558] sm:$0xf0]  ;;  %v8721_v54 = vld [vmem:[#allocation6 + $0x64c] sm:$0xf]  ;;  %v4775_v57 = vpop.f32.mrf.mxu3  ;;  %v4738_v58 = vpop.f32.mrf.mxu0  ;;  %v6679_v36 = vor.u32 %v8649_v61, %v6676_v10 }
 0x255   :  { %5014 = vmatpush.bf16.msrb.mxu2 %v7031_v55  ;;  %v4762_v50 = vpop.f32.mrf.mxu2  ;;  %v6964_v55 = vld [vmem:[#allocation6 + $0x658] sm:$0xf0]  ;;  %v4751_v63 = vpop.f32.mrf.mxu1  ;;  %v6839_v7 = vor.u32 %v8689_v35, %v6836_v52  ;;  %v8749_v5 = vld [vmem:[#allocation6 + $0x72c] sm:$0xf] }
 0x256   :  { %5027 = vmatpush.bf16.msrb.mxu3 %v7159_v59  ;;  %v4763_v56 = vadd.f32 %v4762_v50, %v4750_v23  ;;  %v8753_v59 = vld [vmem:[#allocation6 + $0x74c] sm:$0xf]  ;;  %v7060_v23 = vld [vmem:[#allocation6 + $0x718] sm:$0xf0] }
 0x257   :  { %v7095_v13 = vor.u32 %v8753_v59, %v7092_v60  ;;  %v8681_v17 = vld [vmem:[#allocation6 + $0x50c] sm:$0xf]  ;;  %v7300_v33 = vld [vmem:[#allocation6 + $0x8f8] sm:$0xf0] }
 0x258   :  { %4989 = vmatpush.bf16.msrb.mxu0 %v6759_v4  ;;  %5002 = vmatpush.bf16.msrb.mxu1 %v6887_v41  ;;  %v9608_v3 = vadd.f32 %v4775_v57, %v4763_v56  ;;  %v6967_v4 = vor.u32 %v8721_v54, %v6964_v55  ;;  %v6692_v41 = vld [vmem:[#allocation6 + $0x438] sm:$0xf0]  ;;  %v8745_v30 = vld [vmem:[#allocation6 + $0x70c] sm:$0xf] }
 0x259   :  { %5015 = vmatpush.bf16.msrb.mxu2 %v7015_v12  ;;  %v8685_v12 = vld [vmem:[#allocation6 + $0x52c] sm:$0xf]  ;;  %v6695_v18 = vor.u32 %v8653_v8, %v6692_v41  ;;  %v7428_v40 = vld [vmem:[#allocation6 + $0x9f8] sm:$0xf0] }
 0x25a   :  { %5028 = vmatpush.bf16.msrb.mxu3 %v7143_v51  ;;  %v6948_v51 = vld [vmem:[#allocation6 + $0x638] sm:$0xf0]  ;;  %v6823_v22 = vor.u32 %v8685_v12, %v6820_v14  ;;  %v8805_v32 = vld [vmem:[#allocation6 + $0x8ec] sm:$0xf] }
 0x25b   :  { %v6951_v24 = vor.u32 %v8717_v15, %v6948_v51  ;;  %v8837_v34 = vld [vmem:[#allocation6 + $0x9ec] sm:$0xf]  ;;  %v7684_v35 = vld [vmem:[#allocation6 + $0xbf8] sm:$0xf0]  ;;  %v7303_v50 = vor.u32 %v8805_v32, %v7300_v33 }
 0x25c   :  { %4990 = vmatpush.bf16.msrb.mxu0 %v6743_v26  ;;  %5003 = vmatpush.bf16.msrb.mxu1 %v6871_v28  ;;  %v6804_v26 = vld [vmem:[#allocation6 + $0x518] sm:$0xf0]  ;;  %v8713_v28 = vld [vmem:[#allocation6 + $0x60c] sm:$0xf]  ;;  %v7431_v52 = vor.u32 %v8837_v34, %v7428_v40  ;;  %v7687_v58 = vor.u32 %v8901_v48, %v7684_v35 }
 0x25d   :  { %5016 = vmatpush.bf16.msrb.mxu2 %v6999_v0  ;;  %v7079_v0 = vor.u32 %v8749_v5, %v7076_v16  ;;  %v4764_v27 = vpop.f32.mrf.mxu2  ;;  %v6935_v47 = vor.u32 %v8713_v28, %v6932_v29  ;;  %v8801_v55 = vld [vmem:[#allocation6 + $0x8cc] sm:$0xf]  ;;  %v7284_v56 = vld [vmem:[#allocation6 + $0x8d8] sm:$0xf0] }
 0x25e   :  { %5029 = vmatpush.bf16.msrb.mxu3 %v7127_v31  ;;  %v4777_v31 = vpop.f32.mrf.mxu3  ;;  %v8833_v57 = vld [vmem:[#allocation6 + $0x9cc] sm:$0xf]  ;;  %v7412_v59 = vld [vmem:[#allocation6 + $0x9d8] sm:$0xf0] }
 0x25f   :  { %v8865_v60 = vld [vmem:[#allocation6 + $0xacc] sm:$0xf]  ;;  %v7540_v63 = vld [vmem:[#allocation6 + $0xad8] sm:$0xf0]  ;;  %v7415_v8 = vor.u32 %v8833_v57, %v7412_v59 }
 0x260   :  { %4991 = vmatpush.bf16.msrb.mxu0 %v6727_v25  ;;  %5004 = vmatpush.bf16.msrb.mxu1 %v6855_v43  ;;  %v8869_v25 = vld [vmem:[#allocation6 + $0xaec] sm:$0xf]  ;;  %v7556_v43 = vld [vmem:[#allocation6 + $0xaf8] sm:$0xf0]  ;;  %v7543_v41 = vor.u32 %v8865_v60, %v7540_v63 }
 0x261   :  { %5017 = vmatpush.bf16.msrb.mxu2 %v6983_v45  ;;  %v6807_v45 = vor.u32 %v8681_v17, %v6804_v26  ;;  %v7559_v54 = vor.u32 %v8869_v25, %v7556_v43  ;;  %v8797_v12 = vld [vmem:[#allocation6 + $0x8ac] sm:$0xf]  ;;  %v7396_v51 = vld [vmem:[#allocation6 + $0x9b8] sm:$0xf0] }
 0x262   :  { %5030 = vmatpush.bf16.msrb.mxu3 %v7111_v49  ;;  %v7063_v49 = vor.u32 %v8745_v30, %v7060_v23  ;;  %v8829_v14 = vld [vmem:[#allocation6 + $0x9ac] sm:$0xf]  ;;  %v7524_v16 = vld [vmem:[#allocation6 + $0xab8] sm:$0xf0] }
 0x263   :  { %v8861_v5 = vld [vmem:[#allocation6 + $0xaac] sm:$0xf]  ;;  %v7652_v61 = vld [vmem:[#allocation6 + $0xbb8] sm:$0xf0] }
 0x264   :  { %4992 = vmatpush.bf16.msrb.mxu0 %v6711_v2  ;;  %5005 = vmatpush.bf16.msrb.mxu1 %v6839_v7  ;;  %v8897_v2 = vld [vmem:[#allocation6 + $0xbcc] sm:$0xf]  ;;  %v7668_v7 = vld [vmem:[#allocation6 + $0xbd8] sm:$0xf0] }
 0x265   :  { %5018 = vmatpush.bf16.msrb.mxu2 %v6967_v4  ;;  %v7287_v4 = vor.u32 %v8801_v55, %v7284_v56  ;;  %v7671_v15 = vor.u32 %v8897_v2, %v7668_v7  ;;  %v8793_v17 = vld [vmem:[#allocation6 + $0x88c] sm:$0xf]  ;;  %v7636_v30 = vld [vmem:[#allocation6 + $0xb98] sm:$0xf0] }
 0x266   :  { %5031 = vmatpush.bf16.msrb.mxu3 %v7095_v13  ;;  %v7268_v13 = vld [vmem:[#allocation6 + $0x8b8] sm:$0xf0]  ;;  %v8825_v26 = vld [vmem:[#allocation6 + $0x98c] sm:$0xf] }
 0x267   :  { %v7271_v10 = vor.u32 %v8797_v12, %v7268_v13  ;;  %v8857_v27 = vld [vmem:[#allocation6 + $0xa8c] sm:$0xf]  ;;  %v7236_v34 = vld [vmem:[#allocation6 + $0x878] sm:$0xf0] }
 0x268   :  { %4993 = vmatpush.bf16.msrb.mxu0 %v6695_v18  ;;  %5006 = vmatpush.bf16.msrb.mxu1 %v6823_v22  ;;  %v8893_v18 = vld [vmem:[#allocation6 + $0xbac] sm:$0xf]  ;;  %v7399_v22 = vor.u32 %v8829_v14, %v7396_v51  ;;  %v7364_v25 = vld [vmem:[#allocation6 + $0x978] sm:$0xf0] }
 0x269   :  { %5019 = vmatpush.bf16.msrb.mxu2 %v6951_v24  ;;  %v7527_v24 = vor.u32 %v8861_v5, %v7524_v16  ;;  %v7655_v28 = vor.u32 %v8893_v18, %v7652_v61  ;;  %v8789_v33 = vld [vmem:[#allocation6 + $0x86c] sm:$0xf]  ;;  %v7620_v48 = vld [vmem:[#allocation6 + $0xb78] sm:$0xf0] }
 0x26a   :  { %5032 = vmatpush.bf16.msrb.mxu3 %v7079_v0  ;;  %v7380_v0 = vld [vmem:[#allocation6 + $0x998] sm:$0xf0]  ;;  %v8853_v43 = vld [vmem:[#allocation6 + $0xa6c] sm:$0xf]  ;;  %v7239_v35 = vor.u32 %v8789_v33, %v7236_v34 }
 0x26b   :  { %v7383_v31 = vor.u32 %v8825_v26, %v7380_v0  ;;  %v8817_v55 = vld [vmem:[#allocation6 + $0x94c] sm:$0xf]  ;;  %v7476_v60 = vld [vmem:[#allocation6 + $0xa58] sm:$0xf0] }
 0x26c   :  { %4994 = vmatpush.bf16.msrb.mxu0 %v6679_v36  ;;  %5007 = vmatpush.bf16.msrb.mxu1 %v6807_v45  ;;  %v9614_v29 = vpop.f32.mrf.mxu0  ;;  %v8821_v36 = vld [vmem:[#allocation6 + $0x96c] sm:$0xf]  ;;  %v7492_v45 = vld [vmem:[#allocation6 + $0xa78] sm:$0xf0] }
 0x26d   :  { %5020 = vmatpush.bf16.msrb.mxu2 %v6935_v47  ;;  %v8885_v47 = vld [vmem:[#allocation6 + $0xb6c] sm:$0xf]  ;;  %v7332_v16 = vld [vmem:[#allocation6 + $0x938] sm:$0xf0] }
 0x26e   :  { %5033 = vmatpush.bf16.msrb.mxu3 %v7063_v49  ;;  %v7367_v49 = vor.u32 %v8821_v36, %v7364_v25  ;;  %v7623_v56 = vor.u32 %v8885_v47, %v7620_v48  ;;  %v8849_v59 = vld [vmem:[#allocation6 + $0xa4c] sm:$0xf]  ;;  %v7460_v61 = vld [vmem:[#allocation6 + $0xa38] sm:$0xf0] }
 0x26f   :  { %4995 = vmatmul.bf16.vlgmr.msrb.gmra.mxu0 %v9507_v37  ;;  %5008 = vmatmul.bf16.vlgmr.msrb.gmra.mxu1 %v9509_v46  ;;  %v7252_v37 = vld [vmem:[#allocation6 + $0x898] sm:$0xf0]  ;;  %v8881_v7 = vld [vmem:[#allocation6 + $0xb4c] sm:$0xf]  ;;  %v7479_v13 = vor.u32 %v8849_v59, %v7476_v60 }
 0x270   :  { %5039 = vmatpush.bf16.msra.mxu0 %v7303_v50  ;;  %5052 = vmatpush.bf16.msra.mxu1 %v7431_v52  ;;  %v7508_v46 = vld [vmem:[#allocation6 + $0xa98] sm:$0xf0]  ;;  %v7255_v23 = vor.u32 %v8793_v17, %v7252_v37  ;;  %v7495_v50 = vor.u32 %v8853_v43, %v7492_v45  ;;  %v8785_v52 = vld [vmem:[#allocation6 + $0x84c] sm:$0xf] }
 0x271   :  { %5065 = vmatpush.bf16.msra.mxu2 %v7559_v54  ;;  %5034 = vmatmul.bf16.vlgmr.msrb.gmra.mxu3 %v9515_v11  ;;  %v9616_v11 = vpop.f32.mrf.mxu1  ;;  %v7511_v32 = vor.u32 %v8857_v27, %v7508_v46  ;;  %v7220_v54 = vld [vmem:[#allocation6 + $0x858] sm:$0xf0]  ;;  %v8781_v14 = vld [vmem:[#allocation6 + $0x82c] sm:$0xf] }
 0x272   :  { %5078 = vmatpush.bf16.msra.mxu3 %v7687_v58  ;;  %5021 = vmatmul.bf16.vlgmr.msrb.gmra.mxu2 %v9513_v9  ;;  %v8889_v9 = vld [vmem:[#allocation6 + $0xb8c] sm:$0xf]  ;;  %v7348_v58 = vld [vmem:[#allocation6 + $0x958] sm:$0xf0] }
 0x273   :  { %v7639_v40 = vor.u32 %v8889_v9, %v7636_v30  ;;  %v7351_v12 = vor.u32 %v8817_v55, %v7348_v58  ;;  %v8813_v51 = vld [vmem:[#allocation6 + $0x92c] sm:$0xf]  ;;  %v7188_v37 = vld [vmem:[#allocation6 + $0x818] sm:$0xf0] }
 0x274   :  { %5040 = vmatpush.bf16.msra.mxu0 %v7287_v4  ;;  %5053 = vmatpush.bf16.msra.mxu1 %v7415_v8  ;;  %v9620_v63 = vpop.f32.mrf.mxu3  ;;  %v4790_v2 = vpop.f32.mrf.mxu0  ;;  %v7604_v4 = vld [vmem:[#allocation6 + $0xb58] sm:$0xf0]  ;;  %v8845_v18 = vld [vmem:[#allocation6 + $0xa2c] sm:$0xf]  ;;  %v7335_v26 = vor.u32 %v8813_v51, %v7332_v16 }
 0x275   :  { %5066 = vmatpush.bf16.msra.mxu2 %v7543_v41  ;;  %v9618_v57 = vpop.f32.mrf.mxu2  ;;  %v7223_v41 = vor.u32 %v8785_v52, %v7220_v54  ;;  %v7607_v5 = vor.u32 %v8881_v7, %v7604_v4  ;;  %v8777_v17 = vld [vmem:[#allocation6 + $0x80c] sm:$0xf]  ;;  %v7316_v27 = vld [vmem:[#allocation6 + $0x918] sm:$0xf0] }
 0x276   :  { %5079 = vmatpush.bf16.msra.mxu3 %v7671_v15  ;;  %v7204_v15 = vld [vmem:[#allocation6 + $0x838] sm:$0xf0]  ;;  %v8809_v0 = vld [vmem:[#allocation6 + $0x90c] sm:$0xf]  ;;  %v7191_v25 = vor.u32 %v8777_v17, %v7188_v37 }
 0x277   :  { %v8841_v46 = vld [vmem:[#allocation6 + $0xa0c] sm:$0xf]  ;;  %v7812_v36 = vld [vmem:[#allocation6 + $0xcf8] sm:$0xf0]  ;;  %v7319_v48 = vor.u32 %v8809_v0, %v7316_v27 }
 0x278   :  { %5041 = vmatpush.bf16.msra.mxu0 %v7271_v10  ;;  %5054 = vmatpush.bf16.msra.mxu1 %v7399_v22  ;;  %v8877_v10 = vld [vmem:[#allocation6 + $0xb2c] sm:$0xf]  ;;  %v7588_v22 = vld [vmem:[#allocation6 + $0xb38] sm:$0xf0] }
 0x279   :  { %5067 = vmatpush.bf16.msra.mxu2 %v7527_v24  ;;  %v4803_v8 = vpop.f32.mrf.mxu1  ;;  %v7207_v24 = vor.u32 %v8781_v14, %v7204_v15  ;;  %v7591_v9 = vor.u32 %v8877_v10, %v7588_v22  ;;  %v8933_v34 = vld [vmem:[#allocation6 + $0xcec] sm:$0xf]  ;;  %v7940_v43 = vld [vmem:[#allocation6 + $0xdf8] sm:$0xf0] }
 0x27a   :  { %5080 = vmatpush.bf16.msra.mxu3 %v7655_v28  ;;  %v7463_v28 = vor.u32 %v8845_v18, %v7460_v61  ;;  %v8997_v45 = vld [vmem:[#allocation6 + $0xeec] sm:$0xf]  ;;  %v8068_v47 = vld [vmem:[#allocation6 + $0xef8] sm:$0xf0]  ;;  %v7815_v54 = vor.u32 %v8933_v34, %v7812_v36 }
 0x27b   :  { %v8929_v58 = vld [vmem:[#allocation6 + $0xccc] sm:$0xf]  ;;  %v7796_v59 = vld [vmem:[#allocation6 + $0xcd8] sm:$0xf0] }
 0x27c   :  { %5042 = vmatpush.bf16.msra.mxu0 %v7255_v23  ;;  %5055 = vmatpush.bf16.msra.mxu1 %v7383_v31  ;;  %v7444_v23 = vld [vmem:[#allocation6 + $0xa18] sm:$0xf0]  ;;  %v8873_v31 = vld [vmem:[#allocation6 + $0xb0c] sm:$0xf]  ;;  %v4829_v33 = vpop.f32.mrf.mxu3 }
 0x27d   :  { %5068 = vmatpush.bf16.msra.mxu2 %v7511_v32  ;;  %v4816_v30 = vpop.f32.mrf.mxu2  ;;  %v7572_v32 = vld [vmem:[#allocation6 + $0xb18] sm:$0xf0]  ;;  %v8961_v60 = vld [vmem:[#allocation6 + $0xdcc] sm:$0xf] }
 0x27e   :  { %5081 = vmatpush.bf16.msra.mxu3 %v7639_v40  ;;  %v8965_v40 = vld [vmem:[#allocation6 + $0xdec] sm:$0xf]  ;;  %v7575_v52 = vor.u32 %v8873_v31, %v7572_v32  ;;  %v7924_v7 = vld [vmem:[#allocation6 + $0xdd8] sm:$0xf0] }
 0x27f   :  { %v7943_v55 = vor.u32 %v8965_v40, %v7940_v43  ;;  %v8993_v4 = vld [vmem:[#allocation6 + $0xecc] sm:$0xf]  ;;  %v8052_v8 = vld [vmem:[#allocation6 + $0xed8] sm:$0xf0]  ;;  %v7927_v14 = vor.u32 %v8961_v60, %v7924_v7 }
 0x280   :  { %5043 = vmatpush.bf16.msra.mxu0 %v7239_v35  ;;  %5056 = vmatpush.bf16.msra.mxu1 %v7367_v49  ;;  %v7447_v35 = vor.u32 %v8841_v46, %v7444_v23  ;;  %v9029_v49 = vld [vmem:[#allocation6 + $0xfec] sm:$0xf]  ;;  %v8055_v15 = vor.u32 %v8993_v4, %v8052_v8  ;;  %v7908_v61 = vld [vmem:[#allocation6 + $0xdb8] sm:$0xf0] }
 0x281   :  { %5069 = vmatpush.bf16.msra.mxu2 %v7495_v50  ;;  %v8196_v50 = vld [vmem:[#allocation6 + $0xff8] sm:$0xf0]  ;;  %v8925_v51 = vld [vmem:[#allocation6 + $0xcac] sm:$0xf] }
 0x282   :  { %5082 = vmatpush.bf16.msra.mxu3 %v7623_v56  ;;  %v8071_v56 = vor.u32 %v8997_v45, %v8068_v47  ;;  %v8199_v2 = vor.u32 %v9029_v49, %v8196_v50  ;;  %v8957_v16 = vld [vmem:[#allocation6 + $0xdac] sm:$0xf]  ;;  %v8036_v22 = vld [vmem:[#allocation6 + $0xeb8] sm:$0xf0] }
 0x283   :  { %v8989_v10 = vld [vmem:[#allocation6 + $0xeac] sm:$0xf]  ;;  %v8164_v17 = vld [vmem:[#allocation6 + $0xfb8] sm:$0xf0] }
 0x284   :  { %5044 = vmatpush.bf16.msra.mxu0 %v7223_v41  ;;  %5057 = vmatpush.bf16.msra.mxu1 %v7351_v12  ;;  %v9025_v41 = vld [vmem:[#allocation6 + $0xfcc] sm:$0xf]  ;;  %v8180_v12 = vld [vmem:[#allocation6 + $0xfd8] sm:$0xf0] }
 0x285   :  { %5070 = vmatpush.bf16.msra.mxu2 %v7479_v13  ;;  %v7799_v13 = vor.u32 %v8929_v58, %v7796_v59  ;;  %v8183_v18 = vor.u32 %v9025_v41, %v8180_v12  ;;  %v8921_v0 = vld [vmem:[#allocation6 + $0xc8c] sm:$0xf]  ;;  %v8148_v31 = vld [vmem:[#allocation6 + $0xf98] sm:$0xf0] }
 0x286   :  { %5083 = vmatpush.bf16.msra.mxu3 %v7607_v5  ;;  %v7780_v5 = vld [vmem:[#allocation6 + $0xcb8] sm:$0xf0]  ;;  %v8953_v27 = vld [vmem:[#allocation6 + $0xd8c] sm:$0xf] }
 0x287   :  { %v7783_v37 = vor.u32 %v8925_v51, %v7780_v5  ;;  %v8985_v30 = vld [vmem:[#allocation6 + $0xe8c] sm:$0xf]  ;;  %v7748_v40 = vld [vmem:[#allocation6 + $0xc78] sm:$0xf0] }
 0x288   :  { %5045 = vmatpush.bf16.msra.mxu0 %v7207_v24  ;;  %5058 = vmatpush.bf16.msra.mxu1 %v7335_v26  ;;  %v9021_v24 = vld [vmem:[#allocation6 + $0xfac] sm:$0xf]  ;;  %v7911_v26 = vor.u32 %v8957_v16, %v7908_v61  ;;  %v7876_v45 = vld [vmem:[#allocation6 + $0xd78] sm:$0xf0] }
 0x289   :  { %5071 = vmatpush.bf16.msra.mxu2 %v7463_v28  ;;  %v8039_v28 = vor.u32 %v8989_v10, %v8036_v22  ;;  %v8167_v46 = vor.u32 %v9021_v24, %v8164_v17  ;;  %v8917_v36 = vld [vmem:[#allocation6 + $0xc6c] sm:$0xf]  ;;  %v8132_v49 = vld [vmem:[#allocation6 + $0xf78] sm:$0xf0]  ;;  %v4789_v10 = vadd.f32 %v9614_v29, %v9608_v3 }
 0x28a   :  { %5084 = vmatpush.bf16.msra.mxu3 %v7591_v9  ;;  %v7892_v9 = vld [vmem:[#allocation6 + $0xd98] sm:$0xf0]  ;;  %v8981_v47 = vld [vmem:[#allocation6 + $0xe6c] sm:$0xf]  ;;  %v7751_v50 = vor.u32 %v8917_v36, %v7748_v40 }
 0x28b   :  { %v7895_v33 = vor.u32 %v8953_v27, %v7892_v9  ;;  %v8945_v58 = vld [vmem:[#allocation6 + $0xd4c] sm:$0xf]  ;;  %v7988_v4 = vld [vmem:[#allocation6 + $0xe58] sm:$0xf0] }
 0x28c   :  { %5046 = vmatpush.bf16.msra.mxu0 %v7191_v25  ;;  %5059 = vmatpush.bf16.msra.mxu1 %v7319_v48  ;;  %v9626_v23 = vpop.f32.mrf.mxu0  ;;  %v8949_v25 = vld [vmem:[#allocation6 + $0xd6c] sm:$0xf]  ;;  %v8004_v48 = vld [vmem:[#allocation6 + $0xe78] sm:$0xf0] }
 0x28d   :  { %5072 = vmatpush.bf16.msra.mxu2 %v7447_v35  ;;  %v9013_v35 = vld [vmem:[#allocation6 + $0xf6c] sm:$0xf]  ;;  %v7844_v24 = vld [vmem:[#allocation6 + $0xd38] sm:$0xf0] }
 0x28e   :  { %5085 = vmatpush.bf16.msra.mxu3 %v7575_v52  ;;  %v7879_v52 = vor.u32 %v8949_v25, %v7876_v45  ;;  %v8135_v59 = vor.u32 %v9013_v35, %v8132_v49  ;;  %v8977_v7 = vld [vmem:[#allocation6 + $0xe4c] sm:$0xf]  ;;  %v7700_v9 = vld [vmem:[#allocation6 + $0xc18] sm:$0xf0] }
 0x28f   :  { %5047 = vmatmul.bf16.vlgmr.msra.gmra.mxu0 %v9525_v44  ;;  %5060 = vmatmul.bf16.vlgmr.msra.gmra.mxu1 %v9527_v53  ;;  %v7764_v44 = vld [vmem:[#allocation6 + $0xc98] sm:$0xf0]  ;;  %v9009_v12 = vld [vmem:[#allocation6 + $0xf4c] sm:$0xf]  ;;  %v7991_v5 = vor.u32 %v8977_v7, %v7988_v4 }
 0x290   :  { %5091 = vmatpush.bf16.msrb.mxu0 %v7815_v54  ;;  %5104 = vmatpush.bf16.msrb.mxu1 %v7943_v55  ;;  %v8020_v53 = vld [vmem:[#allocation6 + $0xe98] sm:$0xf0]  ;;  %v7767_v32 = vor.u32 %v8921_v0, %v7764_v44  ;;  %v8007_v54 = vor.u32 %v8981_v47, %v8004_v48  ;;  %v8913_v55 = vld [vmem:[#allocation6 + $0xc4c] sm:$0xf] }
 0x291   :  { %5117 = vmatpush.bf16.msrb.mxu2 %v8071_v56  ;;  %5086 = vmatmul.bf16.vlgmr.msra.gmra.mxu3 %v9533_v21  ;;  %v9628_v21 = vpop.f32.mrf.mxu1  ;;  %v8023_v34 = vor.u32 %v8985_v30, %v8020_v53  ;;  %v7732_v56 = vld [vmem:[#allocation6 + $0xc58] sm:$0xf0]  ;;  %v8909_v16 = vld [vmem:[#allocation6 + $0xc2c] sm:$0xf]  ;;  %v4802_v53 = vadd.f32 %v9616_v11, %v4789_v10 }
 0x292   :  { %5130 = vmatpush.bf16.msrb.mxu3 %v8199_v2  ;;  %5073 = vmatmul.bf16.vlgmr.msra.gmra.mxu2 %v9531_v20  ;;  %v9017_v20 = vld [vmem:[#allocation6 + $0xf8c] sm:$0xf]  ;;  %v7860_v2 = vld [vmem:[#allocation6 + $0xd58] sm:$0xf0] }
 0x293   :  { %v8151_v43 = vor.u32 %v9017_v20, %v8148_v31  ;;  %v7863_v51 = vor.u32 %v8945_v58, %v7860_v2  ;;  %v8941_v61 = vld [vmem:[#allocation6 + $0xd2c] sm:$0xf]  ;;  %v7828_v20 = vld [vmem:[#allocation6 + $0xd18] sm:$0xf0]  ;;  %v4815_v40 = vadd.f32 %v9618_v57, %v4802_v53  ;;  %v9038_v57 = vld [vmem:[#allocation9 + $0x30] sm:$0xff]  ;;  %v1746_v53 = vperm.slane %v9605_v6, 3 }
 0x294   :  { %5092 = vmatpush.bf16.msrb.mxu0 %v7799_v13  ;;  %5105 = vmatpush.bf16.msrb.mxu1 %v7927_v14  ;;  %v9632_v8 = vpop.f32.mrf.mxu3  ;;  %v4842_v41 = vpop.f32.mrf.mxu0  ;;  %v8116_v13 = vld [vmem:[#allocation6 + $0xf58] sm:$0xf0]  ;;  %v8973_v17 = vld [vmem:[#allocation6 + $0xe2c] sm:$0xf]  ;;  %v7847_v44 = vor.u32 %v8941_v61, %v7844_v24  ;;  %v9062_v6 = vld [vmem:[#allocation9 + $0xf0] sm:$0xff] }
 0x295   :  { %5118 = vmatpush.bf16.msrb.mxu2 %v8055_v15  ;;  %v9630_v60 = vpop.f32.mrf.mxu2  ;;  %v7735_v15 = vor.u32 %v8913_v55, %v7732_v56  ;;  %v8119_v22 = vor.u32 %v9009_v12, %v8116_v13  ;;  %v8937_v30 = vld [vmem:[#allocation6 + $0xd0c] sm:$0xf]  ;;  %v8084_v36 = vld [vmem:[#allocation6 + $0xf18] sm:$0xf0]  ;;  %v4828_v49 = vadd.f32 %v9620_v63, %v4815_v40 }
 0x296   :  { %5131 = vmatpush.bf16.msrb.mxu3 %v8183_v18  ;;  %v7716_v18 = vld [vmem:[#allocation6 + $0xc38] sm:$0xf0]  ;;  %v8969_v31 = vld [vmem:[#allocation6 + $0xe0c] sm:$0xf] }
 0x297   :  { %v7719_v0 = vor.u32 %v8909_v16, %v7716_v18  ;;  %v9039_v11 = vld [vmem:[#allocation9 + $0x38] sm:$0xff]  ;;  %v9037_v55 = vld [vmem:[#allocation9 + $0x28] sm:$0xff]  ;;  %v9050_v16 = vld [vmem:[#allocation9 + $0x90] sm:$0xff] }
 0x298   :  { %5093 = vmatpush.bf16.msrb.mxu0 %v7783_v37  ;;  %5106 = vmatpush.bf16.msrb.mxu1 %v7911_v26  ;;  %v7972_v37 = vld [vmem:[#allocation6 + $0xe38] sm:$0xf0]  ;;  %v9005_v26 = vld [vmem:[#allocation6 + $0xf2c] sm:$0xf] }
 0x299   :  { %5119 = vmatpush.bf16.msrb.mxu2 %v8039_v28  ;;  %v4855_v14 = vpop.f32.mrf.mxu1  ;;  %v8100_v28 = vld [vmem:[#allocation6 + $0xf38] sm:$0xf0]  ;;  %v7975_v27 = vor.u32 %v8973_v17, %v7972_v37  ;;  %v9053_v56 = vld [vmem:[#allocation9 + $0xa8] sm:$0xff]  ;;  %v9032_v37 = vld [vmem:[#allocation9] sm:$0xff] }
 0x29a   :  { %5132 = vmatpush.bf16.msrb.mxu3 %v8167_v46  ;;  %v8905_v46 = vld [vmem:[#allocation6 + $0xc0c] sm:$0xf]  ;;  %v8103_v3 = vor.u32 %v9005_v26, %v8100_v28  ;;  %v9047_v48 = vld [vmem:[#allocation9 + $0x78] sm:$0xff]  ;;  %v5143_v26 = vmax.f32 %v9576_v39, 0.0  ;;  %v9040_v28 = vld [vmem:[#allocation9 + $0x40] sm:$0xff] }
 0x29b   :  { %v7703_v25 = vor.u32 %v8905_v46, %v7700_v9  ;;  %v9055_v35 = vld [vmem:[#allocation9 + $0xb8] sm:$0xff]  ;;  %v9041_v61 = vld [vmem:[#allocation9 + $0x48] sm:$0xff] }
 0x29c   :  { %5094 = vmatpush.bf16.msrb.mxu0 %v7767_v32  ;;  %5107 = vmatpush.bf16.msrb.mxu1 %v7895_v33  ;;  %v7956_v32 = vld [vmem:[#allocation6 + $0xe18] sm:$0xf0]  ;;  %v4881_v33 = vpop.f32.mrf.mxu3  ;;  %v9049_v10 = vld [vmem:[#allocation9 + $0x88] sm:$0xff]  ;;  %v5147_v46 = vpack.c.bf16 %v5143_v26, %v5143_v26 }
 0x29d   :  { %5120 = vmatpush.bf16.msrb.mxu2 %v8023_v34  ;;  %v4868_v29 = vpop.f32.mrf.mxu2  ;;  %v9001_v34 = vld [vmem:[#allocation6 + $0xf0c] sm:$0xf]  ;;  %v7959_v45 = vor.u32 %v8969_v31, %v7956_v32  ;;  %v9043_v4 = vld [vmem:[#allocation9 + $0x58] sm:$0xff] }
 0x29e   :  { %5133 = vmatpush.bf16.msrb.mxu3 %v8151_v43  ;;  %v7831_v43 = vor.u32 %v8937_v30, %v7828_v20  ;;  %v8087_v47 = vor.u32 %v9001_v34, %v8084_v36  ;;  %v9051_v41 = vld [vmem:[#allocation9 + $0x98] sm:$0xff] }
 0x29f   :  { %v9071_v26 = vld [vmem:[#allocation12 + $0x38] sm:$0xff] }
 0x2a0   :  { %5095 = vmatpush.bf16.msrb.mxu0 %v7751_v50  ;;  %5108 = vmatpush.bf16.msrb.mxu1 %v7879_v52  ;;  %v4841_v50 = vadd.f32 %v9626_v23, %v4828_v49  ;;  %v9046_v52 = vld [vmem:[#allocation9 + $0x70] sm:$0xff]  ;;  %v9045_v23 = vld [vmem:[#allocation9 + $0x68] sm:$0xff] }
 0x2a1   :  { %5121 = vmatpush.bf16.msrb.mxu2 %v8007_v54  ;;  %v9054_v54 = vld [vmem:[#allocation9 + $0xb0] sm:$0xff] }
 0x2a2   :  { %5134 = vmatpush.bf16.msrb.mxu3 %v8135_v59  ;;  %v4854_v63 = vadd.f32 %v9628_v21, %v4841_v50  ;;  %v9035_v21 = vld [vmem:[#allocation9 + $0x18] sm:$0xff] }
 0x2a4   :  { %5096 = vmatpush.bf16.msrb.mxu0 %v7735_v15  ;;  %5109 = vmatpush.bf16.msrb.mxu1 %v7863_v51  ;;  %v4867_v58 = vadd.f32 %v9630_v60, %v4854_v63  ;;  %v9034_v51 = vld [vmem:[#allocation9 + $0x10] sm:$0xff]  ;;  %v9059_v63 = vld [vmem:[#allocation9 + $0xd8] sm:$0xff] }
 0x2a5   :  { %5122 = vmatpush.bf16.msrb.mxu2 %v7991_v5  ;;  %v9042_v5 = vld [vmem:[#allocation9 + $0x50] sm:$0xff] }
 0x2a6   :  { %5135 = vmatpush.bf16.msrb.mxu3 %v8119_v22 }
 0x2a8   :  { %5097 = vmatpush.bf16.msrb.mxu0 %v7719_v0  ;;  %5110 = vmatpush.bf16.msrb.mxu1 %v7847_v44  ;;  %v9048_v0 = vld [vmem:[#allocation9 + $0x80] sm:$0xff]  ;;  %v5144_v44 = vmax.f32 %v9599_v19, 0.0 }
 0x2a9   :  { %5123 = vmatpush.bf16.msrb.mxu2 %v7975_v27 }
 0x2aa   :  { %5136 = vmatpush.bf16.msrb.mxu3 %v8103_v3  ;;  %v5148_v9 = vpack.c.bf16 %v5144_v44, %v5144_v44 }
 0x2ac   :  { %5098 = vmatpush.bf16.msrb.mxu0 %v7703_v25  ;;  %5111 = vmatpush.bf16.msrb.mxu1 %v7831_v43  ;;  %v4892_v59 = vpop.f32.mrf.mxu0  ;;  %v4905_v2 = vpop.f32.mrf.mxu1 }
 0x2ad   :  { %5124 = vmatpush.bf16.msrb.mxu2 %v7959_v45 }
 0x2ae   :  { %5137 = vmatpush.bf16.msrb.mxu3 %v8087_v47 }
 0x2af   :  { %5099 = vmatmul.bf16.vlgmr.msrb.gmra.mxu0 %v9540_v62  ;;  %5112 = vmatmul.bf16.vlgmr.msrb.gmra.mxu1 %v9543_v1  ;;  %v9036_v62 = vld [vmem:[#allocation9 + $0x20] sm:$0xff] }
 0x2b0   :  { %5411 = vmatpush.bf16.msra.mxu0 %v9039_v11  ;;  %5424 = vmatpush.bf16.msra.mxu1 %v9047_v48  ;;  %v9044_v1 = vld [vmem:[#allocation9 + $0x60] sm:$0xff] }
 0x2b1   :  { %5437 = vmatpush.bf16.msra.mxu2 %v9055_v35  ;;  %5138 = vmatmul.bf16.vlgmr.msrb.gmra.mxu3 %v9549_v42  ;;  %v4880_v42 = vadd.f32 %v9632_v8, %v4867_v58  ;;  %v9033_v8 = vld [vmem:[#allocation9 + $0x8] sm:$0xff]  ;;  %v9063_v35 = vld [vmem:[#allocation9 + $0xf8] sm:$0xff] }
 0x2b2   :  { %5125 = vmatmul.bf16.vlgmr.msrb.gmra.mxu2 %v9547_v38  ;;  %v9052_v38 = vld [vmem:[#allocation9 + $0xa0] sm:$0xff]  ;;  %5450 = vmatpush.bf16.msra.mxu3 %v9063_v35  ;;  %v9057_v58 = vld [vmem:[#allocation9 + $0xc8] sm:$0xff]  ;;  %v9074_v35 = vld [vmem:[#allocation15 + $0x10] sm:$0xff] }
 0x2b3   :  { %v4893_v7 = vadd.f32 %v4892_v59, %v4880_v42  ;;  %v9056_v42 = vld [vmem:[#allocation9 + $0xc0] sm:$0xff] }
 0x2b4   :  { %5412 = vmatpush.bf16.msra.mxu0 %v9038_v57  ;;  %5425 = vmatpush.bf16.msra.mxu1 %v9046_v52  ;;  %v4931_v13 = vpop.f32.mrf.mxu3  ;;  %v4894_v60 = vpop.f32.mrf.mxu0  ;;  %v9061_v52 = vld [vmem:[#allocation9 + $0xe8] sm:$0xff] }
 0x2b5   :  { %5438 = vmatpush.bf16.msra.mxu2 %v9054_v54  ;;  %v4918_v12 = vpop.f32.mrf.mxu2  ;;  %v4906_v14 = vadd.f32 %v4905_v2, %v4893_v7  ;;  %v4907_v15 = vpop.f32.mrf.mxu1  ;;  %v9060_v54 = vld [vmem:[#allocation9 + $0xe0] sm:$0xff] }
 0x2b6   :  { %5451 = vmatpush.bf16.msra.mxu3 %v9062_v6 }
 0x2b7   :  { %v4919_v18 = vadd.f32 %v4918_v12, %v4906_v14 }
 0x2b8   :  { %5413 = vmatpush.bf16.msra.mxu0 %v9037_v55  ;;  %5426 = vmatpush.bf16.msra.mxu1 %v9045_v23 }
 0x2b9   :  { %5439 = vmatpush.bf16.msra.mxu2 %v9053_v56  ;;  %v4932_v22 = vadd.f32 %v4931_v13, %v4919_v18  ;;  %v9058_v56 = vld [vmem:[#allocation9 + $0xd0] sm:$0xff] }
 0x2ba   :  { %5452 = vmatpush.bf16.msra.mxu3 %v9061_v52 }
 0x2bb   :  { %v5145_v27 = vmax.f32 %v4932_v22, 0.0 }
 0x2bc   :  { %5414 = vmatpush.bf16.msra.mxu0 %v9036_v62  ;;  %5427 = vmatpush.bf16.msra.mxu1 %v9044_v1  ;;  %v4933_v17 = vpop.f32.mrf.mxu3 }
 0x2bd   :  { %5440 = vmatpush.bf16.msra.mxu2 %v9052_v38  ;;  %v4920_v24 = vpop.f32.mrf.mxu2  ;;  %v5149_v30 = vpack.c.bf16 %v5145_v27, %v5145_v27 }
 0x2be   :  { %5453 = vmatpush.bf16.msra.mxu3 %v9060_v54  ;;  %v9073_v54 = vld [vmem:[#allocation15 + $0x8] sm:$0xff] }
 0x2c0   :  { %5415 = vmatpush.bf16.msra.mxu0 %v9035_v21  ;;  %5428 = vmatpush.bf16.msra.mxu1 %v9043_v4 }
 0x2c1   :  { %5441 = vmatpush.bf16.msra.mxu2 %v9051_v41 }
 0x2c2   :  { %5454 = vmatpush.bf16.msra.mxu3 %v9059_v63  ;;  %v9072_v63 = vld [vmem:[#allocation15] sm:$0xff] }
 0x2c4   :  { %5416 = vmatpush.bf16.msra.mxu0 %v9034_v51  ;;  %5429 = vmatpush.bf16.msra.mxu1 %v9042_v5 }
 0x2c5   :  { %5442 = vmatpush.bf16.msra.mxu2 %v9050_v16 }
 0x2c6   :  { %5455 = vmatpush.bf16.msra.mxu3 %v9058_v56 }
 0x2c8   :  { %5417 = vmatpush.bf16.msra.mxu0 %v9033_v8  ;;  %5430 = vmatpush.bf16.msra.mxu1 %v9041_v61 }
 0x2c9   :  { %5443 = vmatpush.bf16.msra.mxu2 %v9049_v10 }
 0x2ca   :  { %5456 = vmatpush.bf16.msra.mxu3 %v9057_v58 }
 0x2cc   :  { %5418 = vmatpush.bf16.msra.mxu0 %v9032_v37  ;;  %5431 = vmatpush.bf16.msra.mxu1 %v9040_v28  ;;  %v4944_v3 = vpop.f32.mrf.mxu0  ;;  %v4957_v29 = vpop.f32.mrf.mxu1 }
 0x2cd   :  { %5444 = vmatpush.bf16.msra.mxu2 %v9048_v0  ;;  %v4945_v39 = vadd.f32 %v4944_v3, %v1746_v53  ;;  %v9070_v0 = vld [vmem:[#allocation12 + $0x30] sm:$0xff]  ;;  %v9067_v53 = vld [vmem:[#allocation12 + $0x18] sm:$0xff] }
 0x2ce   :  { %5457 = vmatpush.bf16.msra.mxu3 %v9056_v42 }
 0x2cf   :  { %5419 = vmatmul.bf16.vlgmr.msra.gmra.mxu0 %v5147_v46  ;;  %5432 = vmatmul.bf16.vlgmr.msra.gmra.mxu1 %v5148_v9  ;;  %v4958_v20 = vadd.f32 %v4957_v29, %v4945_v39  ;;  %v9069_v46 = vld [vmem:[#allocation12 + $0x28] sm:$0xff]  ;;  %v9068_v9 = vld [vmem:[#allocation12 + $0x20] sm:$0xff] }
 0x2d0   :  { %5445 = vmatmul.bf16.vlgmr.msra.gmra.mxu2 %v5149_v30  ;;  %5533 = vmatpush.bf16.msrb.mxu0 %v9071_v26  ;;  %v9095_v30 = vld [vmem:[#allocation10] ss:$0 sm:$0xff] }
 0x2d4   :  { %v4983_v33 = vpop.f32.mrf.mxu3  ;;  %v4946_v19 = vpop.f32.mrf.mxu0  ;;  %5534 = vmatpush.bf16.msrb.mxu0 %v9070_v0 }
 0x2d5   :  { %v4970_v31 = vpop.f32.mrf.mxu2  ;;  %v4959_v34 = vpop.f32.mrf.mxu1 }
 0x2d6   :  { %v4971_v32 = vadd.f32 %v4970_v31, %v4958_v20  ;;  %v9066_v20 = vld [vmem:[#allocation12 + $0x10] sm:$0xff] }
 0x2d8   :  { %v4984_v36 = vadd.f32 %v4983_v33, %v4971_v32  ;;  %5535 = vmatpush.bf16.msrb.mxu0 %v9069_v46 }
 0x2dc   :  { %v4985_v25 = vpop.f32.mrf.mxu3  ;;  %5536 = vmatpush.bf16.msrb.mxu0 %v9068_v9 }
 0x2dd   :  { %v4972_v40 = vpop.f32.mrf.mxu2  ;;  %v9064_v25 = vld [vmem:[#allocation12] sm:$0xff] }
 0x2de   :  { %v9065_v40 = vld [vmem:[#allocation12 + $0x8] sm:$0xff] }
 0x2e0   :  { %5537 = vmatpush.bf16.msrb.mxu0 %v9067_v53 }
 0x2e4   :  { %5538 = vmatpush.bf16.msrb.mxu0 %v9066_v20 }
 0x2e8   :  { %5539 = vmatpush.bf16.msrb.mxu0 %v9065_v40 }
 0x2ec   :  { %v4996_v43 = vpop.f32.mrf.mxu0  ;;  %v5009_v45 = vpop.f32.mrf.mxu1  ;;  %5540 = vmatpush.bf16.msrb.mxu0 %v9064_v25 }
 0x2ed   :  { %v4997_v2 = vadd.f32 %v4996_v43, %v4984_v36  ;;  %v9079_v43 = vld [vmem:[#allocation15 + $0x38] sm:$0xff] }
 0x2ee   :  { %5616 = vmatpush.bf16.msrb.mxu1 %v9079_v43 }
 0x2ef   :  { %v5010_v7 = vadd.f32 %v5009_v45, %v4997_v2  ;;  %v9078_v45 = vld [vmem:[#allocation15 + $0x30] sm:$0xff] }
 0x2f2   :  { %5617 = vmatpush.bf16.msrb.mxu1 %v9078_v45 }
 0x2f4   :  { %v5035_v11 = vpop.f32.mrf.mxu3  ;;  %v4998_v48 = vpop.f32.mrf.mxu0 }
 0x2f5   :  { %v5022_v47 = vpop.f32.mrf.mxu2  ;;  %v5011_v49 = vpop.f32.mrf.mxu1  ;;  %v9075_v48 = vld [vmem:[#allocation15 + $0x18] sm:$0xff] }
 0x2f6   :  { %v5023_v21 = vadd.f32 %v5022_v47, %v5010_v7  ;;  %v9077_v47 = vld [vmem:[#allocation15 + $0x28] sm:$0xff] }
 0x2f7   :  { %5618 = vmatpush.bf16.msrb.mxu1 %v9077_v47 }
 0x2f8   :  { %v5036_v12 = vadd.f32 %v5035_v11, %v5023_v21  ;;  %v9076_v11 = vld [vmem:[#allocation15 + $0x20] sm:$0xff] }
 0x2fb   :  { %5619 = vmatpush.bf16.msrb.mxu1 %v9076_v11 }
 0x2fc   :  { %v5037_v57 = vpop.f32.mrf.mxu3 }
 0x2fd   :  { %v5024_v50 = vpop.f32.mrf.mxu2 }
 0x2ff   :  { %5620 = vmatpush.bf16.msrb.mxu1 %v9075_v48 }
 0x303   :  { %5621 = vmatpush.bf16.msrb.mxu1 %v9074_v35 }
 0x307   :  { %5622 = vmatpush.bf16.msrb.mxu1 %v9073_v54 }
 0x30b   :  { %5623 = vmatpush.bf16.msrb.mxu1 %v9072_v63 }
 0x30c   :  { %v5048_v55 = vpop.f32.mrf.mxu0  ;;  %v5061_v23 = vpop.f32.mrf.mxu1 }
 0x30d   :  { %v5049_v13 = vadd.f32 %v5048_v55, %v5036_v12  ;;  %v9096_v55 = vld [vmem:[#allocation13] ss:$0 sm:$0xff] }
 0x30f   :  { %v5062_v60 = vadd.f32 %v5061_v23, %v5049_v13 }
 0x314   :  { %v5087_v62 = vpop.f32.mrf.mxu3  ;;  %v5050_v1 = vpop.f32.mrf.mxu0 }
 0x315   :  { %v5074_v59 = vpop.f32.mrf.mxu2  ;;  %v5063_v38 = vpop.f32.mrf.mxu1 }
 0x316   :  { %v5075_v14 = vadd.f32 %v5074_v59, %v5062_v60 }
 0x318   :  { %v5088_v15 = vadd.f32 %v5087_v62, %v5075_v14  ;;  %v9097_v62 = vld [vmem:[#allocation16] ss:$0 sm:$0xff] }
 0x31c   :  { %v5089_v41 = vpop.f32.mrf.mxu3 }
 0x31d   :  { %v5076_v4 = vpop.f32.mrf.mxu2 }
 0x32c   :  { %v5100_v51 = vpop.f32.mrf.mxu0  ;;  %v5113_v5 = vpop.f32.mrf.mxu1 }
 0x32d   :  { %v5101_v16 = vadd.f32 %v5100_v51, %v5088_v15 }
 0x32f   :  { %v5114_v18 = vadd.f32 %v5113_v5, %v5101_v16 }
 0x334   :  { %v5139_v61 = vpop.f32.mrf.mxu3  ;;  %v5102_v22 = vpop.f32.mrf.mxu0 }
 0x335   :  { %v5126_v8 = vpop.f32.mrf.mxu2  ;;  %v5115_v24 = vpop.f32.mrf.mxu1 }
 0x336   :  { %v5127_v10 = vadd.f32 %v5126_v8, %v5114_v18 }
 0x338   :  { %v5140_v17 = vadd.f32 %v5139_v61, %v5127_v10 }
 0x33a   :  { %v5146_v37 = vmax.f32 %v5140_v17, 0.0 }
 0x33c   :  { %v5150_v28 = vpack.c.bf16 %v5146_v37, %v5146_v37  ;;  %v5141_v27 = vpop.f32.mrf.mxu3 }
 0x33d   :  { %v5128_v44 = vpop.f32.mrf.mxu2 }
 0x33e   :  { %5458 = vmatmul.bf16.vlgmr.msra.gmra.mxu3 %v5150_v28 }
 0x34c   :  { %v5420_v3 = vpop.f32.mrf.mxu0  ;;  %v5433_v29 = vpop.f32.mrf.mxu1 }
 0x34d   :  { %v5421_v39 = vadd.f32 %v9095_v30, %v5420_v3 }
 0x34f   :  { %v5434_v31 = vadd.f32 %v5433_v29, %v5421_v39 }
 0x353   :  { %v5446_v32 = vpop.f32.mrf.mxu2 }
 0x354   :  { %v5447_v33 = vadd.f32 %v5446_v32, %v5434_v31  ;;  %v5422_v19 = vpop.f32.mrf.mxu0  ;;  %v5435_v34 = vpop.f32.mrf.mxu1 }
 0x35b   :  { %v5448_v36 = vpop.f32.mrf.mxu2 }
 0x3c1   :  { %v5459_v49 = vpop.f32.mrf.mxu3 }
 0x3c2   :  { %v5460_v6 = vadd.f32 %v5459_v49, %v5447_v33 }
 0x3c4   :  { %v5463_v50 = vmax.f32 %v5460_v6, 0.0 }
 0x3c6   :  { %v5464_v57 = vpack.c.bf16 %v5463_v50, %v5463_v50 }
 0x3c8   :  { %5541 = vmatmul.bf16.vlgmr.msrb.gmra.mxu0 %v5464_v57 }
 0x3c9   :  { %v5461_v52 = vpop.f32.mrf.mxu3 }
 0x445   :  { %v5542_v23 = vpop.f32.mrf.mxu0 }
 0x446   :  { %v5543_v56 = vadd.f32 %v9096_v55, %v5542_v23 }
 0x448   :  { %v5546_v58 = vmax.f32 %v5543_v56, 0.0 }
 0x44a   :  { %v5547_v59 = vpack.c.bf16 %v5546_v58, %v5546_v58 }
 0x44c   :  { %5624 = vmatmul.bf16.vlgmr.msrb.gmra.mxu1 %v5547_v59 }
 0x44d   :  { %v5544_v2 = vpop.f32.mrf.mxu0 }
 0x4c9   :  { %v5625_v1 = vpop.f32.mrf.mxu1 }
 0x4ca   :  { %v5626_v38 = vadd.f32 %v9097_v62, %v5625_v1 }
 0x4cc   :  { %5629 = vst [vmem:[%s9664_s11] sm:$0xff] %v5626_v38 }
 0x4d1   :  { %v5627_v42 = vpop.f32.mrf.mxu1 }
 0x4d2   :  { %5634 = vsyncpa [#allocation3], 1 }
 0x4d3   :  { %5635 = vsyncpa [#allocation5], 1 }
 0x4d4   :  { %5636 = vsyncpa [#allocation8], 1 }
 0x4d5   :  { %5637 = vsyncpa [#allocation11], 1 }
 0x4d6   :  { %5638 = vsyncpa [#allocation14], 1 }
 0x4d7   :  { %5639 = vsyncpa [#allocation17], 1 }

</bundles_post_ra>
